<compile_context>
chip_gen: v5e
topology: v5e:2x2
jax: 0.10.0
libtpu: 0.0.40
codegen_flags: <defaults>
</compile_context>

<pallas_src>
import functools

import jax
import jax.numpy as jnp
import numpy as np
from jax.experimental import pallas as pl
from jax.experimental.pallas import tpu as pltpu


# --------------------------------------------------------------------------- #
# Kernel
# --------------------------------------------------------------------------- #
def _layernorm(x, eps=1e-5):
    """Mean/variance normalization only (affine is folded into the next matmul)."""
    mu = jnp.mean(x, axis=-1, keepdims=True)
    var = jnp.mean((x - mu) ** 2, axis=-1, keepdims=True)
    return (x - mu) * jax.lax.rsqrt(var + eps)


def block_kernel(*refs, n_head, has_mask, causal, mlp_chunk):
    i = 0
    x_ref = refs[i]; i += 1
    mask_ref = None
    if has_mask:
        mask_ref = refs[i]; i += 1
    (wqkv_ref, bqkv_ref, wo_ref, bo_ref,
     wfc_ref, bfc_ref, wproj_ref, bproj_ref,
     o_ref, ctx_ref) = refs[i:]

    xb = x_ref[...]                                   # (Bt, L, D) f32
    Bt, L, D = xb.shape
    H = n_head
    hd = D // H

    x2 = xb.reshape(Bt * L, D)                        # flatten batch*seq for big matmuls

    # ---------------- attention branch: x + out_proj(MHA(ln_1(x))) ---------------- #
    h1 = _layernorm(x2)                               # ln_1 affine + q-scale folded into wqkv/bqkv
    qkv = jnp.dot(h1.astype(jnp.bfloat16), wqkv_ref[...],
                  preferred_element_type=jnp.float32) + bqkv_ref[...]   # (Bt*L, 3D) f32

    if causal:
        row = jax.lax.broadcasted_iota(jnp.int32, (L, L), 0)
        col = jax.lax.broadcasted_iota(jnp.int32, (L, L), 1)
        add_mask = jnp.where(col <= row, 0.0, -1e30).astype(jnp.float32)
    elif has_mask:
        add_mask = mask_ref[...]                      # (L, L) additive mask, f32
    else:
        add_mask = None

    # Heads are contiguous lane slices of the fused QKV activation -> no cross-lane
    # relayout.  Each head's matmuls are batched over Bt (leading batch dim), and the
    # per-head softmax keeps only one head's (Bt, L, L) scores live at a time.
    # TODO(synk): for long sequences (L >= ~256) switch to key-chunked online softmax.
    for h in range(H):
        qh = qkv[:, h * hd:(h + 1) * hd].astype(jnp.bfloat16).reshape(Bt, L, hd)
        kh = qkv[:, D + h * hd:D + (h + 1) * hd].astype(jnp.bfloat16).reshape(Bt, L, hd)
        vh = qkv[:, 2 * D + h * hd:2 * D + (h + 1) * hd].astype(jnp.bfloat16).reshape(Bt, L, hd)

        s = jnp.einsum('bqd,bkd->bqk', qh, kh,
                       preferred_element_type=jnp.float32)              # (Bt, L, L) f32
        if add_mask is not None:
            s = s + add_mask
        s = s - jnp.max(s, axis=-1, keepdims=True)
        e = jnp.exp(s)
        p = e * pl.reciprocal(jnp.sum(e, axis=-1, keepdims=True), approx=True)
        ctx_h = jnp.einsum('bqk,bkd->bqd', p.astype(jnp.bfloat16), vh,
                           preferred_element_type=jnp.float32)          # (Bt, L, hd)
        ctx_ref[:, h * hd:(h + 1) * hd] = (
            ctx_h.reshape(Bt * L, hd).astype(ctx_ref.dtype))

    attn = jnp.dot(ctx_ref[...], wo_ref[...],
                   preferred_element_type=jnp.float32) + bo_ref[...]
    x2 = x2 + attn

    # ---------------- MLP branch: x + c_proj(QuickGELU(c_fc(ln_2(x)))) ------------- #
    h2 = _layernorm(x2).astype(jnp.bfloat16)          # ln_2 affine folded into wfc/bfc
    F = 4 * D
    y = x2 + bproj_ref[...]                           # start from residual + proj bias
    for c0 in range(0, F, mlp_chunk):                 # chunk hidden dim to cap live f32 temps
        c1 = min(c0 + mlp_chunk, F)
        fc = jnp.dot(h2, wfc_ref[:, c0:c1],
                     preferred_element_type=jnp.float32) + bfc_ref[:, c0:c1]
        g = fc * jax.nn.sigmoid(1.702 * fc)           # QuickGELU in f32
        y = y + jnp.dot(g.astype(jnp.bfloat16), wproj_ref[c0:c1, :],
                        preferred_element_type=jnp.float32)

    o_ref[...] = y.reshape(Bt, L, D)


# --------------------------------------------------------------------------- #
# Wrapper
# --------------------------------------------------------------------------- #
def _vmem_limit_bytes():
    """~3/4 of physical VMEM (leaves headroom for Mosaic scratch + x/o double buffers)."""
    try:
        info = pltpu.get_tpu_info()
        cap = getattr(info, "vmem_capacity_bytes", None)
        if cap:
            return int(cap) * 3 // 4
    except Exception:
        pass
    return 48 * 1024 * 1024


def _num_tensorcores():
    try:
        return max(1, int(getattr(jax.devices()[0], "num_cores", 1)))
    except Exception:
        return 1


def _pick_block_batch(N, L, max_rows=1024, min_steps=1):
    """Largest divisor of N with Bt*L <= max_rows; require >= min_steps grid steps
    only where that is achievable (megacore chips)."""
    def pick(ms):
        best = None
        for cand in range(1, N + 1):
            if N % cand:
                continue
            if cand > 1 and cand * L > max_rows:
                continue
            if N // cand < ms:
                continue
            best = cand
        return best

    bt = pick(min_steps)
    if bt is None:
        bt = pick(1)
    return bt if bt is not None else 1


def prepare_block_params(params, n_head):
    """One-time (out of the hot path) weight fold / transpose / bf16 cast.

    Folds:  ln_1 affine and the 1/sqrt(head_dim) q-scale into (W_qkv, b_qkv),
            ln_2 affine into (W_fc, b_fc).  Biases stay f32; weights become bf16
            contraction-ready (K, N) matrices.
    """
    D = params['in_w'].shape[1]
    assert D % n_head == 0
    hd = D // n_head
    scale = 1.0 / float(np.sqrt(hd))

    w_qkv = params['ln1_w'][:, None] * params['in_w'].T            # (D, 3D)
    b_qkv = params['in_b'] + params['ln1_b'] @ params['in_w'].T    # (3D,)
    col_scale = jnp.concatenate([jnp.full((D,), scale, jnp.float32),
                                 jnp.ones((2 * D,), jnp.float32)])
    w_qkv = w_qkv * col_scale[None, :]
    b_qkv = b_qkv * col_scale

    w_fc = params['ln2_w'][:, None] * params['fc_w'].T             # (D, 4D)
    b_fc = params['fc_b'] + params['ln2_b'] @ params['fc_w'].T     # (4D,)

    return {
        'w_qkv': w_qkv.astype(jnp.bfloat16),
        'b_qkv': b_qkv.reshape(1, -1).astype(jnp.float32),
        'w_out': params['out_w'].T.astype(jnp.bfloat16),            # (D, D)
        'b_out': params['out_b'].reshape(1, -1).astype(jnp.float32),
        'w_fc': w_fc.astype(jnp.bfloat16),                          # (D, 4D)
        'b_fc': b_fc.reshape(1, -1).astype(jnp.float32),
        'w_proj': params['proj_w'].T.astype(jnp.bfloat16),          # (4D, D)
        'b_proj': params['proj_b'].reshape(1, -1).astype(jnp.float32),
    }


def residual_attention_block(x_lnd, prep, *, n_head, attn_mask=None, causal=False,
                             block_batch=None, mlp_chunk=2048):
    """x_lnd: (L, N, D) float32 in PyTorch MultiheadAttention layout."""
    L, N, D = x_lnd.shape
    x = jnp.transpose(x_lnd, (1, 0, 2))               # (N, L, D) for the kernel

    if block_batch is None:
        Bt = _pick_block_batch(N, L, min_steps=_num_tensorcores())
    else:
        Bt = block_batch
    assert N % Bt == 0, "block_batch must divide the batch size"

    has_mask = (attn_mask is not None) and not causal  # causal flag wins (built in-kernel)

    operands = [x]
    if has_mask:
        operands.append(attn_mask.astype(jnp.float32))
    operands += [prep['w_qkv'], prep['b_qkv'], prep['w_out'], prep['b_out'],
                 prep['w_fc'], prep['b_fc'], prep['w_proj'], prep['b_proj']]

    kernel = functools.partial(block_kernel, n_head=n_head, has_mask=has_mask,
                               causal=causal, mlp_chunk=mlp_chunk)

    def run(single_buffer_consts):
        def const_spec(shape):
            nd = len(shape)
            imap = lambda n, _nd=nd: (0,) * _nd
            if single_buffer_consts:
                # Grid-invariant operands: one VMEM buffer instead of two.
                return pl.BlockSpec(shape, imap, pipeline_mode=pl.Buffered(1))
            return pl.BlockSpec(shape, imap)

        in_specs = [pl.BlockSpec((Bt, L, D), lambda n: (n, 0, 0))]
        if has_mask:
            in_specs.append(const_spec((L, L)))
        in_specs += [
            const_spec((D, 3 * D)), const_spec((1, 3 * D)),        # in_proj (folded) / bias
            const_spec((D, D)), const_spec((1, D)),                # out_proj / bias
            const_spec((D, 4 * D)), const_spec((1, 4 * D)),        # c_fc (folded) / bias
            const_spec((4 * D, D)), const_spec((1, D)),            # c_proj / bias
        ]
        return pl.pallas_call(
            kernel,
            out_shape=jax.ShapeDtypeStruct((N, L, D), x.dtype),
            grid=(N // Bt,),
            in_specs=in_specs,
            out_specs=pl.BlockSpec((Bt, L, D), lambda n: (n, 0, 0)),
            scratch_shapes=[pltpu.VMEM((Bt * L, D), jnp.bfloat16)],   # head-context slab
            compiler_params=pltpu.CompilerParams(
                dimension_semantics=("parallel",),
                vmem_limit_bytes=_vmem_limit_bytes(),
            ),
        )(*operands)

    try:
        out = run(True)
    except Exception:
        # Fallback for environments where single-buffered constants are unsupported.
        out = run(False)
    return jnp.transpose(out, (1, 0, 2))               # back to (L, N, D)


# --------------------------------------------------------------------------- #
# Pure-JAX reference (mirrors PyTorch semantics) and parameter init
# --------------------------------------------------------------------------- #
def reference_forward(x_lnd, p, attn_mask, n_head):
    x = jnp.transpose(x_lnd, (1, 0, 2)).astype(jnp.float32)   # (N, L, D)
    N, L, D = x.shape
    hd = D // n_head
    scale = 1.0 / float(np.sqrt(hd))
    mask = (jnp.zeros((L, L), jnp.float32) if attn_mask is None
            else attn_mask.astype(jnp.float32))

    def ln(t, w, b, eps=1e-5):
        mu = jnp.mean(t, -1, keepdims=True)
        var = jnp.mean((t - mu) ** 2, -1, keepdims=True)
        return (t - mu) / jnp.sqrt(var + eps) * w + b

    h = ln(x, p['ln1_w'], p['ln1_b'])
    qkv = h @ p['in_w'].T + p['in_b']
    q = (qkv[..., :D] * scale).reshape(N, L, n_head, hd)
    k = qkv[..., D:2 * D].reshape(N, L, n_head, hd)
    v = qkv[..., 2 * D:].reshape(N, L, n_head, hd)
    s = jnp.einsum('nqhd,nkhd->nhqk', q, k) + mask
    a = jax.nn.softmax(s, axis=-1)
    attn = jnp.einsum('nhqk,nkhd->nqhd', a, v).reshape(N, L, D)
    x = x + attn @ p['out_w'].T + p['out_b']

    h2 = ln(x, p['ln2_w'], p['ln2_b'])
    fc = h2 @ p['fc_w'].T + p['fc_b']
    x = x + (fc * jax.nn.sigmoid(1.702 * fc)) @ p['proj_w'].T + p['proj_b']
    return jnp.transpose(x, (1, 0, 2))


def init_params(key, d_model):
    D = d_model
    ks = jax.random.split(key, 12)
    w = 0.2
    return {
        'ln1_w': 1.0 + 0.1 * jax.random.normal(ks[0], (D,), jnp.float32),
        'ln1_b': 0.1 * jax.random.normal(ks[1], (D,), jnp.float32),
        'in_w': w * jax.random.normal(ks[2], (3 * D, D), jnp.float32),
        'in_b': 0.05 * jax.random.normal(ks[3], (3 * D,), jnp.float32),
        'out_w': w * jax.random.normal(ks[4], (D, D), jnp.float32),
        'out_b': 0.05 * jax.random.normal(ks[5], (D,), jnp.float32),
        'ln2_w': 1.0 + 0.1 * jax.random.normal(ks[6], (D,), jnp.float32),
        'ln2_b': 0.1 * jax.random.normal(ks[7], (D,), jnp.float32),
        'fc_w': w * jax.random.normal(ks[8], (4 * D, D), jnp.float32),
        'fc_b': 0.05 * jax.random.normal(ks[9], (4 * D,), jnp.float32),
        'proj_w': w * jax.random.normal(ks[10], (D, 4 * D), jnp.float32),
        'proj_b': 0.05 * jax.random.normal(ks[11], (D,), jnp.float32),
    }


if __name__ == "__main__":
    # Small shapes consistent with the module: seq L=8, batch N=4, d_model=32, n_head=4.
    L, N, D, H = 8, 4, 32, 4
    key = jax.random.PRNGKey(0)
    kx, kp = jax.random.split(key)
    x = jax.random.normal(kx, (L, N, D), dtype=jnp.float32)   # PyTorch layout (L, N, D)
    params = init_params(kp, D)
    prep = prepare_block_params(params, n_head=H)             # one-time weight fold / cast

    # 1) no attention mask (vision branch)
    out = jax.block_until_ready(residual_attention_block(x, prep, n_head=H))
    ref = reference_forward(x, params, None, H)
    np.testing.assert_allclose(np.asarray(out), np.asarray(ref), rtol=2e-2, atol=3e-2)

    # 2) causal mask generated in-kernel (text branch, CLIP-style)
    out_c = jax.block_until_ready(residual_attention_block(x, prep, n_head=H, causal=True))
    causal_mask = jnp.where(jnp.tril(jnp.ones((L, L), bool)), 0.0, -jnp.inf).astype(jnp.float32)
    ref_c = reference_forward(x, params, causal_mask, H)
    np.testing.assert_allclose(np.asarray(out_c), np.asarray(ref_c), rtol=2e-2, atol=3e-2)

    # 3) explicit additive mask operand path
    out_m = jax.block_until_ready(
        residual_attention_block(x, prep, n_head=H, attn_mask=causal_mask))
    np.testing.assert_allclose(np.asarray(out_m), np.asarray(ref_c), rtol=2e-2, atol=3e-2)

    print("KERNEL_OK")
</pallas_src>

<mosaic_0001>
module attributes {stable_mosaic.version = 11 : i64} {
  func.func @block_kernel(%arg0: i32, %arg1: memref<4x8x32xf32, #tpu.memory_space<vmem>>, %arg2: memref<32x96xbf16, #tpu.memory_space<vmem>>, %arg3: memref<1x96xf32, #tpu.memory_space<vmem>>, %arg4: memref<32x32xbf16, #tpu.memory_space<vmem>>, %arg5: memref<1x32xf32, #tpu.memory_space<vmem>>, %arg6: memref<32x128xbf16, #tpu.memory_space<vmem>>, %arg7: memref<1x128xf32, #tpu.memory_space<vmem>>, %arg8: memref<128x32xbf16, #tpu.memory_space<vmem>>, %arg9: memref<1x32xf32, #tpu.memory_space<vmem>>, %arg10: memref<4x8x32xf32, #tpu.memory_space<vmem>>, %arg11: memref<32x32xbf16, #tpu.memory_space<vmem>>) attributes {dimension_semantics = [#tpu.dimension_semantics<parallel>], iteration_bounds = array<i64: 1>, scalar_prefetch = 0 : i64, scratch_operands = 1 : i64, tpu.core_type = #tpu.core_type<tc>, window_params = [{transform_indices = @transform_0, window_bounds = array<i64: 4, 8, 32>}, {pipeline_mode = #tpu.pipeline_mode<synchronous>, transform_indices = @transform_1, window_bounds = array<i64: 32, 96>}, {pipeline_mode = #tpu.pipeline_mode<synchronous>, transform_indices = @transform_2, window_bounds = array<i64: 1, 96>}, {pipeline_mode = #tpu.pipeline_mode<synchronous>, transform_indices = @transform_3, window_bounds = array<i64: 32, 32>}, {pipeline_mode = #tpu.pipeline_mode<synchronous>, transform_indices = @transform_4, window_bounds = array<i64: 1, 32>}, {pipeline_mode = #tpu.pipeline_mode<synchronous>, transform_indices = @transform_5, window_bounds = array<i64: 32, 128>}, {pipeline_mode = #tpu.pipeline_mode<synchronous>, transform_indices = @transform_6, window_bounds = array<i64: 1, 128>}, {pipeline_mode = #tpu.pipeline_mode<synchronous>, transform_indices = @transform_7, window_bounds = array<i64: 128, 32>}, {pipeline_mode = #tpu.pipeline_mode<synchronous>, transform_indices = @transform_8, window_bounds = array<i64: 1, 32>}, {transform_indices = @transform_9, window_bounds = array<i64: 4, 8, 32>}]} {
    %c0 = arith.constant 0 : index
    %c0_0 = arith.constant 0 : index
    %c0_1 = arith.constant 0 : index
    %0 = vector.load %arg1[%c0, %c0_0, %c0_1] : memref<4x8x32xf32, #tpu.memory_space<vmem>>, vector<4x8x32xf32>
    %1 = vector.shape_cast %0 : vector<4x8x32xf32> to vector<32x32xf32>
    %cst = arith.constant dense<0.000000e+00> : vector<32xf32>
    %2 = vector.multi_reduction <add>, %1, %cst [1] : vector<32x32xf32> to vector<32xf32>
    %3 = vector.shape_cast %2 : vector<32xf32> to vector<32x1xf32>
    %cst_2 = arith.constant 3.200000e+01 : f32
    %4 = vector.broadcast %cst_2 : f32 to vector<32x1xf32>
    %5 = arith.divf %3, %4 : vector<32x1xf32>
    %6 = vector.broadcast %5 : vector<32x1xf32> to vector<32x32xf32>
    %7 = arith.subf %1, %6 : vector<32x32xf32>
    %8 = arith.mulf %7, %7 : vector<32x32xf32>
    %cst_3 = arith.constant dense<0.000000e+00> : vector<32xf32>
    %9 = vector.multi_reduction <add>, %8, %cst_3 [1] : vector<32x32xf32> to vector<32xf32>
    %10 = vector.shape_cast %9 : vector<32xf32> to vector<32x1xf32>
    %cst_4 = arith.constant 3.200000e+01 : f32
    %11 = vector.broadcast %cst_4 : f32 to vector<32x1xf32>
    %12 = arith.divf %10, %11 : vector<32x1xf32>
    %13 = vector.broadcast %5 : vector<32x1xf32> to vector<32x32xf32>
    %14 = arith.subf %1, %13 : vector<32x32xf32>
    %cst_5 = arith.constant 9.99999974E-6 : f32
    %15 = vector.broadcast %cst_5 : f32 to vector<32x1xf32>
    %16 = arith.addf %12, %15 : vector<32x1xf32>
    %17 = math.rsqrt %16 : vector<32x1xf32>
    %18 = vector.broadcast %17 : vector<32x1xf32> to vector<32x32xf32>
    %19 = arith.mulf %14, %18 : vector<32x32xf32>
    %20 = arith.truncf %19 : vector<32x32xf32> to vector<32x32xbf16>
    %c0_6 = arith.constant 0 : index
    %c0_7 = arith.constant 0 : index
    %21 = vector.load %arg2[%c0_6, %c0_7] : memref<32x96xbf16, #tpu.memory_space<vmem>>, vector<32x96xbf16>
    %cst_8 = arith.constant dense<0.000000e+00> : vector<32x96xf32>
    %22 = tpu.matmul %20, %21, %cst_8 {dimension_numbers = #tpu.dot_dimension_numbers<[1], [0], [0], [1], [0, 0, 1, 1], [], []>} : vector<32x32xbf16>, vector<32x96xbf16>, vector<32x96xf32> -> vector<32x96xf32>
    %c0_9 = arith.constant 0 : index
    %c0_10 = arith.constant 0 : index
    %23 = vector.load %arg3[%c0_9, %c0_10] : memref<1x96xf32, #tpu.memory_space<vmem>>, vector<1x96xf32>
    %24 = vector.broadcast %23 : vector<1x96xf32> to vector<32x96xf32>
    %25 = arith.addf %22, %24 : vector<32x96xf32>
    %26 = vector.extract_strided_slice %25 {offsets = [0, 0], sizes = [32, 8], strides = [1, 1]} : vector<32x96xf32> to vector<32x8xf32>
    %27 = arith.truncf %26 : vector<32x8xf32> to vector<32x8xbf16>
    %28 = vector.shape_cast %27 : vector<32x8xbf16> to vector<4x8x8xbf16>
    %29 = vector.extract_strided_slice %25 {offsets = [0, 32], sizes = [32, 8], strides = [1, 1]} : vector<32x96xf32> to vector<32x8xf32>
    %30 = arith.truncf %29 : vector<32x8xf32> to vector<32x8xbf16>
    %31 = vector.shape_cast %30 : vector<32x8xbf16> to vector<4x8x8xbf16>
    %32 = vector.extract_strided_slice %25 {offsets = [0, 64], sizes = [32, 8], strides = [1, 1]} : vector<32x96xf32> to vector<32x8xf32>
    %33 = arith.truncf %32 : vector<32x8xf32> to vector<32x8xbf16>
    %34 = vector.shape_cast %33 : vector<32x8xbf16> to vector<4x8x8xbf16>
    "tpu.trace_start"() <{level = 10 : i32, message = "bqd,bkd->bqk"}> : () -> ()
    %cst_11 = arith.constant dense<0.000000e+00> : vector<4x8x8xf32>
    %35 = tpu.matmul %28, %31, %cst_11 {dimension_numbers = #tpu.dot_dimension_numbers<[2], [2], [1], [1], [0, 0, 0, 1, 1, 1], [0], [0]>} : vector<4x8x8xbf16>, vector<4x8x8xbf16>, vector<4x8x8xf32> -> vector<4x8x8xf32>
    "tpu.trace_stop"() : () -> ()
    %cst_12 = arith.constant dense<0xFF800000> : vector<4x8xf32>
    %36 = vector.multi_reduction <maximumf>, %35, %cst_12 [2] : vector<4x8x8xf32> to vector<4x8xf32>
    %37 = vector.shape_cast %36 : vector<4x8xf32> to vector<4x8x1xf32>
    %38 = vector.broadcast %37 : vector<4x8x1xf32> to vector<4x8x8xf32>
    %39 = arith.subf %35, %38 : vector<4x8x8xf32>
    %40 = math.exp %39 : vector<4x8x8xf32>
    %cst_13 = arith.constant dense<0.000000e+00> : vector<4x8xf32>
    %41 = vector.multi_reduction <add>, %40, %cst_13 [2] : vector<4x8x8xf32> to vector<4x8xf32>
    %42 = vector.shape_cast %41 : vector<4x8xf32> to vector<4x8x1xf32>
    %43 = tpu.reciprocal %42 {approx = true} : vector<4x8x1xf32> -> vector<4x8x1xf32>
    %44 = vector.broadcast %43 : vector<4x8x1xf32> to vector<4x8x8xf32>
    %45 = arith.mulf %40, %44 : vector<4x8x8xf32>
    %46 = arith.truncf %45 : vector<4x8x8xf32> to vector<4x8x8xbf16>
    "tpu.trace_start"() <{level = 10 : i32, message = "bqk,bkd->bqd"}> : () -> ()
    %cst_14 = arith.constant dense<0.000000e+00> : vector<4x8x8xf32>
    %47 = tpu.matmul %46, %34, %cst_14 {dimension_numbers = #tpu.dot_dimension_numbers<[2], [1], [1], [2], [0, 0, 0, 1, 1, 2], [0], [0]>} : vector<4x8x8xbf16>, vector<4x8x8xbf16>, vector<4x8x8xf32> -> vector<4x8x8xf32>
    "tpu.trace_stop"() : () -> ()
    %48 = vector.shape_cast %47 : vector<4x8x8xf32> to vector<32x8xf32>
    %49 = arith.truncf %48 : vector<32x8xf32> to vector<32x8xbf16>
    %c0_15 = arith.constant 0 : index
    %c0_16 = arith.constant 0 : index
    %50 = vector.load %arg11[%c0_15, %c0_16] : memref<32x32xbf16, #tpu.memory_space<vmem>>, vector<32x8xbf16>
    tpu.vector_store %arg11[%c0_15, %c0_16], %49 {strides = array<i32>} : memref<32x32xbf16, #tpu.memory_space<vmem>>, vector<32x8xbf16>,
    %51 = vector.extract_strided_slice %25 {offsets = [0, 8], sizes = [32, 8], strides = [1, 1]} : vector<32x96xf32> to vector<32x8xf32>
    %52 = arith.truncf %51 : vector<32x8xf32> to vector<32x8xbf16>
    %53 = vector.shape_cast %52 : vector<32x8xbf16> to vector<4x8x8xbf16>
    %54 = vector.extract_strided_slice %25 {offsets = [0, 40], sizes = [32, 8], strides = [1, 1]} : vector<32x96xf32> to vector<32x8xf32>
    %55 = arith.truncf %54 : vector<32x8xf32> to vector<32x8xbf16>
    %56 = vector.shape_cast %55 : vector<32x8xbf16> to vector<4x8x8xbf16>
    %57 = vector.extract_strided_slice %25 {offsets = [0, 72], sizes = [32, 8], strides = [1, 1]} : vector<32x96xf32> to vector<32x8xf32>
    %58 = arith.truncf %57 : vector<32x8xf32> to vector<32x8xbf16>
    %59 = vector.shape_cast %58 : vector<32x8xbf16> to vector<4x8x8xbf16>
    "tpu.trace_start"() <{level = 10 : i32, message = "bqd,bkd->bqk"}> : () -> ()
    %cst_17 = arith.constant dense<0.000000e+00> : vector<4x8x8xf32>
    %60 = tpu.matmul %53, %56, %cst_17 {dimension_numbers = #tpu.dot_dimension_numbers<[2], [2], [1], [1], [0, 0, 0, 1, 1, 1], [0], [0]>} : vector<4x8x8xbf16>, vector<4x8x8xbf16>, vector<4x8x8xf32> -> vector<4x8x8xf32>
    "tpu.trace_stop"() : () -> ()
    %cst_18 = arith.constant dense<0xFF800000> : vector<4x8xf32>
    %61 = vector.multi_reduction <maximumf>, %60, %cst_18 [2] : vector<4x8x8xf32> to vector<4x8xf32>
    %62 = vector.shape_cast %61 : vector<4x8xf32> to vector<4x8x1xf32>
    %63 = vector.broadcast %62 : vector<4x8x1xf32> to vector<4x8x8xf32>
    %64 = arith.subf %60, %63 : vector<4x8x8xf32>
    %65 = math.exp %64 : vector<4x8x8xf32>
    %cst_19 = arith.constant dense<0.000000e+00> : vector<4x8xf32>
    %66 = vector.multi_reduction <add>, %65, %cst_19 [2] : vector<4x8x8xf32> to vector<4x8xf32>
    %67 = vector.shape_cast %66 : vector<4x8xf32> to vector<4x8x1xf32>
    %68 = tpu.reciprocal %67 {approx = true} : vector<4x8x1xf32> -> vector<4x8x1xf32>
    %69 = vector.broadcast %68 : vector<4x8x1xf32> to vector<4x8x8xf32>
    %70 = arith.mulf %65, %69 : vector<4x8x8xf32>
    %71 = arith.truncf %70 : vector<4x8x8xf32> to vector<4x8x8xbf16>
    "tpu.trace_start"() <{level = 10 : i32, message = "bqk,bkd->bqd"}> : () -> ()
    %cst_20 = arith.constant dense<0.000000e+00> : vector<4x8x8xf32>
    %72 = tpu.matmul %71, %59, %cst_20 {dimension_numbers = #tpu.dot_dimension_numbers<[2], [1], [1], [2], [0, 0, 0, 1, 1, 2], [0], [0]>} : vector<4x8x8xbf16>, vector<4x8x8xbf16>, vector<4x8x8xf32> -> vector<4x8x8xf32>
    "tpu.trace_stop"() : () -> ()
    %73 = vector.shape_cast %72 : vector<4x8x8xf32> to vector<32x8xf32>
    %74 = arith.truncf %73 : vector<32x8xf32> to vector<32x8xbf16>
    %c0_21 = arith.constant 0 : index
    %c8 = arith.constant 8 : index
    %75 = vector.load %arg11[%c0_21, %c8] : memref<32x32xbf16, #tpu.memory_space<vmem>>, vector<32x8xbf16>
    tpu.vector_store %arg11[%c0_21, %c8], %74 {strides = array<i32>} : memref<32x32xbf16, #tpu.memory_space<vmem>>, vector<32x8xbf16>,
    %76 = vector.extract_strided_slice %25 {offsets = [0, 16], sizes = [32, 8], strides = [1, 1]} : vector<32x96xf32> to vector<32x8xf32>
    %77 = arith.truncf %76 : vector<32x8xf32> to vector<32x8xbf16>
    %78 = vector.shape_cast %77 : vector<32x8xbf16> to vector<4x8x8xbf16>
    %79 = vector.extract_strided_slice %25 {offsets = [0, 48], sizes = [32, 8], strides = [1, 1]} : vector<32x96xf32> to vector<32x8xf32>
    %80 = arith.truncf %79 : vector<32x8xf32> to vector<32x8xbf16>
    %81 = vector.shape_cast %80 : vector<32x8xbf16> to vector<4x8x8xbf16>
    %82 = vector.extract_strided_slice %25 {offsets = [0, 80], sizes = [32, 8], strides = [1, 1]} : vector<32x96xf32> to vector<32x8xf32>
    %83 = arith.truncf %82 : vector<32x8xf32> to vector<32x8xbf16>
    %84 = vector.shape_cast %83 : vector<32x8xbf16> to vector<4x8x8xbf16>
    "tpu.trace_start"() <{level = 10 : i32, message = "bqd,bkd->bqk"}> : () -> ()
    %cst_22 = arith.constant dense<0.000000e+00> : vector<4x8x8xf32>
    %85 = tpu.matmul %78, %81, %cst_22 {dimension_numbers = #tpu.dot_dimension_numbers<[2], [2], [1], [1], [0, 0, 0, 1, 1, 1], [0], [0]>} : vector<4x8x8xbf16>, vector<4x8x8xbf16>, vector<4x8x8xf32> -> vector<4x8x8xf32>
    "tpu.trace_stop"() : () -> ()
    %cst_23 = arith.constant dense<0xFF800000> : vector<4x8xf32>
    %86 = vector.multi_reduction <maximumf>, %85, %cst_23 [2] : vector<4x8x8xf32> to vector<4x8xf32>
    %87 = vector.shape_cast %86 : vector<4x8xf32> to vector<4x8x1xf32>
    %88 = vector.broadcast %87 : vector<4x8x1xf32> to vector<4x8x8xf32>
    %89 = arith.subf %85, %88 : vector<4x8x8xf32>
    %90 = math.exp %89 : vector<4x8x8xf32>
    %cst_24 = arith.constant dense<0.000000e+00> : vector<4x8xf32>
    %91 = vector.multi_reduction <add>, %90, %cst_24 [2] : vector<4x8x8xf32> to vector<4x8xf32>
    %92 = vector.shape_cast %91 : vector<4x8xf32> to vector<4x8x1xf32>
    %93 = tpu.reciprocal %92 {approx = true} : vector<4x8x1xf32> -> vector<4x8x1xf32>
    %94 = vector.broadcast %93 : vector<4x8x1xf32> to vector<4x8x8xf32>
    %95 = arith.mulf %90, %94 : vector<4x8x8xf32>
    %96 = arith.truncf %95 : vector<4x8x8xf32> to vector<4x8x8xbf16>
    "tpu.trace_start"() <{level = 10 : i32, message = "bqk,bkd->bqd"}> : () -> ()
    %cst_25 = arith.constant dense<0.000000e+00> : vector<4x8x8xf32>
    %97 = tpu.matmul %96, %84, %cst_25 {dimension_numbers = #tpu.dot_dimension_numbers<[2], [1], [1], [2], [0, 0, 0, 1, 1, 2], [0], [0]>} : vector<4x8x8xbf16>, vector<4x8x8xbf16>, vector<4x8x8xf32> -> vector<4x8x8xf32>
    "tpu.trace_stop"() : () -> ()
    %98 = vector.shape_cast %97 : vector<4x8x8xf32> to vector<32x8xf32>
    %99 = arith.truncf %98 : vector<32x8xf32> to vector<32x8xbf16>
    %c0_26 = arith.constant 0 : index
    %c16 = arith.constant 16 : index
    %100 = vector.load %arg11[%c0_26, %c16] : memref<32x32xbf16, #tpu.memory_space<vmem>>, vector<32x8xbf16>
    tpu.vector_store %arg11[%c0_26, %c16], %99 {strides = array<i32>} : memref<32x32xbf16, #tpu.memory_space<vmem>>, vector<32x8xbf16>,
    %101 = vector.extract_strided_slice %25 {offsets = [0, 24], sizes = [32, 8], strides = [1, 1]} : vector<32x96xf32> to vector<32x8xf32>
    %102 = arith.truncf %101 : vector<32x8xf32> to vector<32x8xbf16>
    %103 = vector.shape_cast %102 : vector<32x8xbf16> to vector<4x8x8xbf16>
    %104 = vector.extract_strided_slice %25 {offsets = [0, 56], sizes = [32, 8], strides = [1, 1]} : vector<32x96xf32> to vector<32x8xf32>
    %105 = arith.truncf %104 : vector<32x8xf32> to vector<32x8xbf16>
    %106 = vector.shape_cast %105 : vector<32x8xbf16> to vector<4x8x8xbf16>
    %107 = vector.extract_strided_slice %25 {offsets = [0, 88], sizes = [32, 8], strides = [1, 1]} : vector<32x96xf32> to vector<32x8xf32>
    %108 = arith.truncf %107 : vector<32x8xf32> to vector<32x8xbf16>
    %109 = vector.shape_cast %108 : vector<32x8xbf16> to vector<4x8x8xbf16>
    "tpu.trace_start"() <{level = 10 : i32, message = "bqd,bkd->bqk"}> : () -> ()
    %cst_27 = arith.constant dense<0.000000e+00> : vector<4x8x8xf32>
    %110 = tpu.matmul %103, %106, %cst_27 {dimension_numbers = #tpu.dot_dimension_numbers<[2], [2], [1], [1], [0, 0, 0, 1, 1, 1], [0], [0]>} : vector<4x8x8xbf16>, vector<4x8x8xbf16>, vector<4x8x8xf32> -> vector<4x8x8xf32>
    "tpu.trace_stop"() : () -> ()
    %cst_28 = arith.constant dense<0xFF800000> : vector<4x8xf32>
    %111 = vector.multi_reduction <maximumf>, %110, %cst_28 [2] : vector<4x8x8xf32> to vector<4x8xf32>
    %112 = vector.shape_cast %111 : vector<4x8xf32> to vector<4x8x1xf32>
    %113 = vector.broadcast %112 : vector<4x8x1xf32> to vector<4x8x8xf32>
    %114 = arith.subf %110, %113 : vector<4x8x8xf32>
    %115 = math.exp %114 : vector<4x8x8xf32>
    %cst_29 = arith.constant dense<0.000000e+00> : vector<4x8xf32>
    %116 = vector.multi_reduction <add>, %115, %cst_29 [2] : vector<4x8x8xf32> to vector<4x8xf32>
    %117 = vector.shape_cast %116 : vector<4x8xf32> to vector<4x8x1xf32>
    %118 = tpu.reciprocal %117 {approx = true} : vector<4x8x1xf32> -> vector<4x8x1xf32>
    %119 = vector.broadcast %118 : vector<4x8x1xf32> to vector<4x8x8xf32>
    %120 = arith.mulf %115, %119 : vector<4x8x8xf32>
    %121 = arith.truncf %120 : vector<4x8x8xf32> to vector<4x8x8xbf16>
    "tpu.trace_start"() <{level = 10 : i32, message = "bqk,bkd->bqd"}> : () -> ()
    %cst_30 = arith.constant dense<0.000000e+00> : vector<4x8x8xf32>
    %122 = tpu.matmul %121, %109, %cst_30 {dimension_numbers = #tpu.dot_dimension_numbers<[2], [1], [1], [2], [0, 0, 0, 1, 1, 2], [0], [0]>} : vector<4x8x8xbf16>, vector<4x8x8xbf16>, vector<4x8x8xf32> -> vector<4x8x8xf32>
    "tpu.trace_stop"() : () -> ()
    %123 = vector.shape_cast %122 : vector<4x8x8xf32> to vector<32x8xf32>
    %124 = arith.truncf %123 : vector<32x8xf32> to vector<32x8xbf16>
    %c0_31 = arith.constant 0 : index
    %c24 = arith.constant 24 : index
    %125 = vector.load %arg11[%c0_31, %c24] : memref<32x32xbf16, #tpu.memory_space<vmem>>, vector<32x8xbf16>
    tpu.vector_store %arg11[%c0_31, %c24], %124 {strides = array<i32>} : memref<32x32xbf16, #tpu.memory_space<vmem>>, vector<32x8xbf16>,
    %c0_32 = arith.constant 0 : index
    %c0_33 = arith.constant 0 : index
    %126 = vector.load %arg11[%c0_32, %c0_33] : memref<32x32xbf16, #tpu.memory_space<vmem>>, vector<32x32xbf16>
    %c0_34 = arith.constant 0 : index
    %c0_35 = arith.constant 0 : index
    %127 = vector.load %arg4[%c0_34, %c0_35] : memref<32x32xbf16, #tpu.memory_space<vmem>>, vector<32x32xbf16>
    %cst_36 = arith.constant dense<0.000000e+00> : vector<32x32xf32>
    %128 = tpu.matmul %126, %127, %cst_36 {dimension_numbers = #tpu.dot_dimension_numbers<[1], [0], [0], [1], [0, 0, 1, 1], [], []>} : vector<32x32xbf16>, vector<32x32xbf16>, vector<32x32xf32> -> vector<32x32xf32>
    %c0_37 = arith.constant 0 : index
    %c0_38 = arith.constant 0 : index
    %129 = vector.load %arg5[%c0_37, %c0_38] : memref<1x32xf32, #tpu.memory_space<vmem>>, vector<1x32xf32>
    %130 = vector.broadcast %129 : vector<1x32xf32> to vector<32x32xf32>
    %131 = arith.addf %128, %130 : vector<32x32xf32>
    %132 = arith.addf %1, %131 : vector<32x32xf32>
    %cst_39 = arith.constant dense<0.000000e+00> : vector<32xf32>
    %133 = vector.multi_reduction <add>, %132, %cst_39 [1] : vector<32x32xf32> to vector<32xf32>
    %134 = vector.shape_cast %133 : vector<32xf32> to vector<32x1xf32>
    %cst_40 = arith.constant 3.200000e+01 : f32
    %135 = vector.broadcast %cst_40 : f32 to vector<32x1xf32>
    %136 = arith.divf %134, %135 : vector<32x1xf32>
    %137 = vector.broadcast %136 : vector<32x1xf32> to vector<32x32xf32>
    %138 = arith.subf %132, %137 : vector<32x32xf32>
    %139 = arith.mulf %138, %138 : vector<32x32xf32>
    %cst_41 = arith.constant dense<0.000000e+00> : vector<32xf32>
    %140 = vector.multi_reduction <add>, %139, %cst_41 [1] : vector<32x32xf32> to vector<32xf32>
    %141 = vector.shape_cast %140 : vector<32xf32> to vector<32x1xf32>
    %cst_42 = arith.constant 3.200000e+01 : f32
    %142 = vector.broadcast %cst_42 : f32 to vector<32x1xf32>
    %143 = arith.divf %141, %142 : vector<32x1xf32>
    %144 = vector.broadcast %136 : vector<32x1xf32> to vector<32x32xf32>
    %145 = arith.subf %132, %144 : vector<32x32xf32>
    %cst_43 = arith.constant 9.99999974E-6 : f32
    %146 = vector.broadcast %cst_43 : f32 to vector<32x1xf32>
    %147 = arith.addf %143, %146 : vector<32x1xf32>
    %148 = math.rsqrt %147 : vector<32x1xf32>
    %149 = vector.broadcast %148 : vector<32x1xf32> to vector<32x32xf32>
    %150 = arith.mulf %145, %149 : vector<32x32xf32>
    %151 = arith.truncf %150 : vector<32x32xf32> to vector<32x32xbf16>
    %c0_44 = arith.constant 0 : index
    %c0_45 = arith.constant 0 : index
    %152 = vector.load %arg9[%c0_44, %c0_45] : memref<1x32xf32, #tpu.memory_space<vmem>>, vector<1x32xf32>
    %153 = vector.broadcast %152 : vector<1x32xf32> to vector<32x32xf32>
    %154 = arith.addf %132, %153 : vector<32x32xf32>
    %c0_46 = arith.constant 0 : index
    %c0_47 = arith.constant 0 : index
    %155 = vector.load %arg6[%c0_46, %c0_47] : memref<32x128xbf16, #tpu.memory_space<vmem>>, vector<32x128xbf16>
    %cst_48 = arith.constant dense<0.000000e+00> : vector<32x128xf32>
    %156 = tpu.matmul %151, %155, %cst_48 {dimension_numbers = #tpu.dot_dimension_numbers<[1], [0], [0], [1], [0, 0, 1, 1], [], []>} : vector<32x32xbf16>, vector<32x128xbf16>, vector<32x128xf32> -> vector<32x128xf32>
    %c0_49 = arith.constant 0 : index
    %c0_50 = arith.constant 0 : index
    %157 = vector.load %arg7[%c0_49, %c0_50] : memref<1x128xf32, #tpu.memory_space<vmem>>, vector<1x128xf32>
    %158 = vector.broadcast %157 : vector<1x128xf32> to vector<32x128xf32>
    %159 = arith.addf %156, %158 : vector<32x128xf32>
    %cst_51 = arith.constant 1.702000e+00 : f32
    %160 = vector.broadcast %cst_51 : f32 to vector<32x128xf32>
    %161 = arith.mulf %160, %159 : vector<32x128xf32>
    %162 = arith.negf %161 : vector<32x128xf32>
    %163 = math.exp %162 : vector<32x128xf32>
    %cst_52 = arith.constant 1.000000e+00 : f32
    %164 = vector.broadcast %cst_52 : f32 to vector<32x128xf32>
    %165 = arith.addf %164, %163 : vector<32x128xf32>
    %166 = arith.divf %164, %165 : vector<32x128xf32>
    %167 = arith.mulf %159, %166 : vector<32x128xf32>
    %168 = arith.truncf %167 : vector<32x128xf32> to vector<32x128xbf16>
    %c0_53 = arith.constant 0 : index
    %c0_54 = arith.constant 0 : index
    %169 = vector.load %arg8[%c0_53, %c0_54] : memref<128x32xbf16, #tpu.memory_space<vmem>>, vector<128x32xbf16>
    %cst_55 = arith.constant dense<0.000000e+00> : vector<32x32xf32>
    %170 = tpu.matmul %168, %169, %cst_55 {dimension_numbers = #tpu.dot_dimension_numbers<[1], [0], [0], [1], [0, 0, 1, 1], [], []>} : vector<32x128xbf16>, vector<128x32xbf16>, vector<32x32xf32> -> vector<32x32xf32>
    %171 = arith.addf %154, %170 : vector<32x32xf32>
    %172 = vector.shape_cast %171 : vector<32x32xf32> to vector<4x8x32xf32>
    %c0_56 = arith.constant 0 : index
    %c0_57 = arith.constant 0 : index
    %c0_58 = arith.constant 0 : index
    %173 = vector.load %arg10[%c0_56, %c0_57, %c0_58] : memref<4x8x32xf32, #tpu.memory_space<vmem>>, vector<4x8x32xf32>
    tpu.vector_store %arg10[%c0_56, %c0_57, %c0_58], %172 {strides = array<i32>} : memref<4x8x32xf32, #tpu.memory_space<vmem>>, vector<4x8x32xf32>,
    return
  }
  func.func @transform_0(%arg0: i32) -> (i32, i32, i32) {
    %c0_i32 = arith.constant 0 : i32
    %c0_i32_0 = arith.constant 0 : i32
    %c0_i32_1 = arith.constant 0 : i32
    return %arg0, %c0_i32, %c0_i32_0 : i32, i32, i32
  }
  func.func @transform_1(%arg0: i32) -> (i32, i32) {
    %c0_i32 = arith.constant 0 : i32
    %c0_i32_0 = arith.constant 0 : i32
    %c0_i32_1 = arith.constant 0 : i32
    return %c0_i32, %c0_i32_0 : i32, i32
  }
  func.func @transform_2(%arg0: i32) -> (i32, i32) {
    %c0_i32 = arith.constant 0 : i32
    %c0_i32_0 = arith.constant 0 : i32
    %c0_i32_1 = arith.constant 0 : i32
    return %c0_i32, %c0_i32_0 : i32, i32
  }
  func.func @transform_3(%arg0: i32) -> (i32, i32) {
    %c0_i32 = arith.constant 0 : i32
    %c0_i32_0 = arith.constant 0 : i32
    %c0_i32_1 = arith.constant 0 : i32
    return %c0_i32, %c0_i32_0 : i32, i32
  }
  func.func @transform_4(%arg0: i32) -> (i32, i32) {
    %c0_i32 = arith.constant 0 : i32
    %c0_i32_0 = arith.constant 0 : i32
    %c0_i32_1 = arith.constant 0 : i32
    return %c0_i32, %c0_i32_0 : i32, i32
  }
  func.func @transform_5(%arg0: i32) -> (i32, i32) {
    %c0_i32 = arith.constant 0 : i32
    %c0_i32_0 = arith.constant 0 : i32
    %c0_i32_1 = arith.constant 0 : i32
    return %c0_i32, %c0_i32_0 : i32, i32
  }
  func.func @transform_6(%arg0: i32) -> (i32, i32) {
    %c0_i32 = arith.constant 0 : i32
    %c0_i32_0 = arith.constant 0 : i32
    %c0_i32_1 = arith.constant 0 : i32
    return %c0_i32, %c0_i32_0 : i32, i32
  }
  func.func @transform_7(%arg0: i32) -> (i32, i32) {
    %c0_i32 = arith.constant 0 : i32
    %c0_i32_0 = arith.constant 0 : i32
    %c0_i32_1 = arith.constant 0 : i32
    return %c0_i32, %c0_i32_0 : i32, i32
  }
  func.func @transform_8(%arg0: i32) -> (i32, i32) {
    %c0_i32 = arith.constant 0 : i32
    %c0_i32_0 = arith.constant 0 : i32
    %c0_i32_1 = arith.constant 0 : i32
    return %c0_i32, %c0_i32_0 : i32, i32
  }
  func.func @transform_9(%arg0: i32) -> (i32, i32, i32) {
    %c0_i32 = arith.constant 0 : i32
    %c0_i32_0 = arith.constant 0 : i32
    %c0_i32_1 = arith.constant 0 : i32
    return %arg0, %c0_i32, %c0_i32_0 : i32, i32, i32
  }
}

module attributes {stable_mosaic.version = 11 : i64} {
  func.func @block_kernel(%arg0: i32, %arg1: memref<4x8x32xf32, #tpu.memory_space<vmem>>, %arg2: memref<32x96xbf16, #tpu.memory_space<vmem>>, %arg3: memref<1x96xf32, #tpu.memory_space<vmem>>, %arg4: memref<32x32xbf16, #tpu.memory_space<vmem>>, %arg5: memref<1x32xf32, #tpu.memory_space<vmem>>, %arg6: memref<32x128xbf16, #tpu.memory_space<vmem>>, %arg7: memref<1x128xf32, #tpu.memory_space<vmem>>, %arg8: memref<128x32xbf16, #tpu.memory_space<vmem>>, %arg9: memref<1x32xf32, #tpu.memory_space<vmem>>, %arg10: memref<4x8x32xf32, #tpu.memory_space<vmem>>, %arg11: memref<32x32xbf16, #tpu.memory_space<vmem>>) attributes {dimension_semantics = [#tpu.dimension_semantics<parallel>], iteration_bounds = array<i64: 1>, scalar_prefetch = 0 : i64, scratch_operands = 1 : i64, tpu.core_type = #tpu.core_type<tc>, window_params = [{transform_indices = @transform_0, window_bounds = array<i64: 4, 8, 32>}, {pipeline_mode = #tpu.pipeline_mode<synchronous>, transform_indices = @transform_1, window_bounds = array<i64: 32, 96>}, {pipeline_mode = #tpu.pipeline_mode<synchronous>, transform_indices = @transform_2, window_bounds = array<i64: 1, 96>}, {pipeline_mode = #tpu.pipeline_mode<synchronous>, transform_indices = @transform_3, window_bounds = array<i64: 32, 32>}, {pipeline_mode = #tpu.pipeline_mode<synchronous>, transform_indices = @transform_4, window_bounds = array<i64: 1, 32>}, {pipeline_mode = #tpu.pipeline_mode<synchronous>, transform_indices = @transform_5, window_bounds = array<i64: 32, 128>}, {pipeline_mode = #tpu.pipeline_mode<synchronous>, transform_indices = @transform_6, window_bounds = array<i64: 1, 128>}, {pipeline_mode = #tpu.pipeline_mode<synchronous>, transform_indices = @transform_7, window_bounds = array<i64: 128, 32>}, {pipeline_mode = #tpu.pipeline_mode<synchronous>, transform_indices = @transform_8, window_bounds = array<i64: 1, 32>}, {transform_indices = @transform_9, window_bounds = array<i64: 4, 8, 32>}]} {
    %c0 = arith.constant 0 : index
    %c0_0 = arith.constant 0 : index
    %c0_1 = arith.constant 0 : index
    %0 = vector.load %arg1[%c0, %c0_0, %c0_1] : memref<4x8x32xf32, #tpu.memory_space<vmem>>, vector<4x8x32xf32>
    %1 = vector.shape_cast %0 : vector<4x8x32xf32> to vector<32x32xf32>
    %cst = arith.constant dense<0.000000e+00> : vector<32xf32>
    %2 = vector.multi_reduction <add>, %1, %cst [1] : vector<32x32xf32> to vector<32xf32>
    %3 = vector.shape_cast %2 : vector<32xf32> to vector<32x1xf32>
    %cst_2 = arith.constant 3.200000e+01 : f32
    %4 = vector.broadcast %cst_2 : f32 to vector<32x1xf32>
    %5 = arith.divf %3, %4 : vector<32x1xf32>
    %6 = vector.broadcast %5 : vector<32x1xf32> to vector<32x32xf32>
    %7 = arith.subf %1, %6 : vector<32x32xf32>
    %8 = arith.mulf %7, %7 : vector<32x32xf32>
    %cst_3 = arith.constant dense<0.000000e+00> : vector<32xf32>
    %9 = vector.multi_reduction <add>, %8, %cst_3 [1] : vector<32x32xf32> to vector<32xf32>
    %10 = vector.shape_cast %9 : vector<32xf32> to vector<32x1xf32>
    %cst_4 = arith.constant 3.200000e+01 : f32
    %11 = vector.broadcast %cst_4 : f32 to vector<32x1xf32>
    %12 = arith.divf %10, %11 : vector<32x1xf32>
    %13 = vector.broadcast %5 : vector<32x1xf32> to vector<32x32xf32>
    %14 = arith.subf %1, %13 : vector<32x32xf32>
    %cst_5 = arith.constant 9.99999974E-6 : f32
    %15 = vector.broadcast %cst_5 : f32 to vector<32x1xf32>
    %16 = arith.addf %12, %15 : vector<32x1xf32>
    %17 = math.rsqrt %16 : vector<32x1xf32>
    %18 = vector.broadcast %17 : vector<32x1xf32> to vector<32x32xf32>
    %19 = arith.mulf %14, %18 : vector<32x32xf32>
    %20 = arith.truncf %19 : vector<32x32xf32> to vector<32x32xbf16>
    %c0_6 = arith.constant 0 : index
    %c0_7 = arith.constant 0 : index
    %21 = vector.load %arg2[%c0_6, %c0_7] : memref<32x96xbf16, #tpu.memory_space<vmem>>, vector<32x96xbf16>
    %cst_8 = arith.constant dense<0.000000e+00> : vector<32x96xf32>
    %22 = tpu.matmul %20, %21, %cst_8 {dimension_numbers = #tpu.dot_dimension_numbers<[1], [0], [0], [1], [0, 0, 1, 1], [], []>} : vector<32x32xbf16>, vector<32x96xbf16>, vector<32x96xf32> -> vector<32x96xf32>
    %c0_9 = arith.constant 0 : index
    %c0_10 = arith.constant 0 : index
    %23 = vector.load %arg3[%c0_9, %c0_10] : memref<1x96xf32, #tpu.memory_space<vmem>>, vector<1x96xf32>
    %24 = vector.broadcast %23 : vector<1x96xf32> to vector<32x96xf32>
    %25 = arith.addf %22, %24 : vector<32x96xf32>
    %26 = vector.extract_strided_slice %25 {offsets = [0, 0], sizes = [32, 8], strides = [1, 1]} : vector<32x96xf32> to vector<32x8xf32>
    %27 = arith.truncf %26 : vector<32x8xf32> to vector<32x8xbf16>
    %28 = vector.shape_cast %27 : vector<32x8xbf16> to vector<4x8x8xbf16>
    %29 = vector.extract_strided_slice %25 {offsets = [0, 32], sizes = [32, 8], strides = [1, 1]} : vector<32x96xf32> to vector<32x8xf32>
    %30 = arith.truncf %29 : vector<32x8xf32> to vector<32x8xbf16>
    %31 = vector.shape_cast %30 : vector<32x8xbf16> to vector<4x8x8xbf16>
    %32 = vector.extract_strided_slice %25 {offsets = [0, 64], sizes = [32, 8], strides = [1, 1]} : vector<32x96xf32> to vector<32x8xf32>
    %33 = arith.truncf %32 : vector<32x8xf32> to vector<32x8xbf16>
    %34 = vector.shape_cast %33 : vector<32x8xbf16> to vector<4x8x8xbf16>
    "tpu.trace_start"() <{level = 10 : i32, message = "bqd,bkd->bqk"}> : () -> ()
    %cst_11 = arith.constant dense<0.000000e+00> : vector<4x8x8xf32>
    %35 = tpu.matmul %28, %31, %cst_11 {dimension_numbers = #tpu.dot_dimension_numbers<[2], [2], [1], [1], [0, 0, 0, 1, 1, 1], [0], [0]>} : vector<4x8x8xbf16>, vector<4x8x8xbf16>, vector<4x8x8xf32> -> vector<4x8x8xf32>
    "tpu.trace_stop"() : () -> ()
    %cst_12 = arith.constant dense<0xFF800000> : vector<4x8xf32>
    %36 = vector.multi_reduction <maximumf>, %35, %cst_12 [2] : vector<4x8x8xf32> to vector<4x8xf32>
    %37 = vector.shape_cast %36 : vector<4x8xf32> to vector<4x8x1xf32>
    %38 = vector.broadcast %37 : vector<4x8x1xf32> to vector<4x8x8xf32>
    %39 = arith.subf %35, %38 : vector<4x8x8xf32>
    %40 = math.exp %39 : vector<4x8x8xf32>
    %cst_13 = arith.constant dense<0.000000e+00> : vector<4x8xf32>
    %41 = vector.multi_reduction <add>, %40, %cst_13 [2] : vector<4x8x8xf32> to vector<4x8xf32>
    %42 = vector.shape_cast %41 : vector<4x8xf32> to vector<4x8x1xf32>
    %43 = tpu.reciprocal %42 {approx = true} : vector<4x8x1xf32> -> vector<4x8x1xf32>
    %44 = vector.broadcast %43 : vector<4x8x1xf32> to vector<4x8x8xf32>
    %45 = arith.mulf %40, %44 : vector<4x8x8xf32>
    %46 = arith.truncf %45 : vector<4x8x8xf32> to vector<4x8x8xbf16>
    "tpu.trace_start"() <{level = 10 : i32, message = "bqk,bkd->bqd"}> : () -> ()
    %cst_14 = arith.constant dense<0.000000e+00> : vector<4x8x8xf32>
    %47 = tpu.matmul %46, %34, %cst_14 {dimension_numbers = #tpu.dot_dimension_numbers<[2], [1], [1], [2], [0, 0, 0, 1, 1, 2], [0], [0]>} : vector<4x8x8xbf16>, vector<4x8x8xbf16>, vector<4x8x8xf32> -> vector<4x8x8xf32>
    "tpu.trace_stop"() : () -> ()
    %48 = vector.shape_cast %47 : vector<4x8x8xf32> to vector<32x8xf32>
    %49 = arith.truncf %48 : vector<32x8xf32> to vector<32x8xbf16>
    %c0_15 = arith.constant 0 : index
    %c0_16 = arith.constant 0 : index
    %50 = vector.load %arg11[%c0_15, %c0_16] : memref<32x32xbf16, #tpu.memory_space<vmem>>, vector<32x8xbf16>
    tpu.vector_store %arg11[%c0_15, %c0_16], %49 {strides = array<i32>} : memref<32x32xbf16, #tpu.memory_space<vmem>>, vector<32x8xbf16>,
    %51 = vector.extract_strided_slice %25 {offsets = [0, 8], sizes = [32, 8], strides = [1, 1]} : vector<32x96xf32> to vector<32x8xf32>
    %52 = arith.truncf %51 : vector<32x8xf32> to vector<32x8xbf16>
    %53 = vector.shape_cast %52 : vector<32x8xbf16> to vector<4x8x8xbf16>
    %54 = vector.extract_strided_slice %25 {offsets = [0, 40], sizes = [32, 8], strides = [1, 1]} : vector<32x96xf32> to vector<32x8xf32>
    %55 = arith.truncf %54 : vector<32x8xf32> to vector<32x8xbf16>
    %56 = vector.shape_cast %55 : vector<32x8xbf16> to vector<4x8x8xbf16>
    %57 = vector.extract_strided_slice %25 {offsets = [0, 72], sizes = [32, 8], strides = [1, 1]} : vector<32x96xf32> to vector<32x8xf32>
    %58 = arith.truncf %57 : vector<32x8xf32> to vector<32x8xbf16>
    %59 = vector.shape_cast %58 : vector<32x8xbf16> to vector<4x8x8xbf16>
    "tpu.trace_start"() <{level = 10 : i32, message = "bqd,bkd->bqk"}> : () -> ()
    %cst_17 = arith.constant dense<0.000000e+00> : vector<4x8x8xf32>
    %60 = tpu.matmul %53, %56, %cst_17 {dimension_numbers = #tpu.dot_dimension_numbers<[2], [2], [1], [1], [0, 0, 0, 1, 1, 1], [0], [0]>} : vector<4x8x8xbf16>, vector<4x8x8xbf16>, vector<4x8x8xf32> -> vector<4x8x8xf32>
    "tpu.trace_stop"() : () -> ()
    %cst_18 = arith.constant dense<0xFF800000> : vector<4x8xf32>
    %61 = vector.multi_reduction <maximumf>, %60, %cst_18 [2] : vector<4x8x8xf32> to vector<4x8xf32>
    %62 = vector.shape_cast %61 : vector<4x8xf32> to vector<4x8x1xf32>
    %63 = vector.broadcast %62 : vector<4x8x1xf32> to vector<4x8x8xf32>
    %64 = arith.subf %60, %63 : vector<4x8x8xf32>
    %65 = math.exp %64 : vector<4x8x8xf32>
    %cst_19 = arith.constant dense<0.000000e+00> : vector<4x8xf32>
    %66 = vector.multi_reduction <add>, %65, %cst_19 [2] : vector<4x8x8xf32> to vector<4x8xf32>
    %67 = vector.shape_cast %66 : vector<4x8xf32> to vector<4x8x1xf32>
    %68 = tpu.reciprocal %67 {approx = true} : vector<4x8x1xf32> -> vector<4x8x1xf32>
    %69 = vector.broadcast %68 : vector<4x8x1xf32> to vector<4x8x8xf32>
    %70 = arith.mulf %65, %69 : vector<4x8x8xf32>
    %71 = arith.truncf %70 : vector<4x8x8xf32> to vector<4x8x8xbf16>
    "tpu.trace_start"() <{level = 10 : i32, message = "bqk,bkd->bqd"}> : () -> ()
    %cst_20 = arith.constant dense<0.000000e+00> : vector<4x8x8xf32>
    %72 = tpu.matmul %71, %59, %cst_20 {dimension_numbers = #tpu.dot_dimension_numbers<[2], [1], [1], [2], [0, 0, 0, 1, 1, 2], [0], [0]>} : vector<4x8x8xbf16>, vector<4x8x8xbf16>, vector<4x8x8xf32> -> vector<4x8x8xf32>
    "tpu.trace_stop"() : () -> ()
    %73 = vector.shape_cast %72 : vector<4x8x8xf32> to vector<32x8xf32>
    %74 = arith.truncf %73 : vector<32x8xf32> to vector<32x8xbf16>
    %c0_21 = arith.constant 0 : index
    %c8 = arith.constant 8 : index
    %75 = vector.load %arg11[%c0_21, %c8] : memref<32x32xbf16, #tpu.memory_space<vmem>>, vector<32x8xbf16>
    tpu.vector_store %arg11[%c0_21, %c8], %74 {strides = array<i32>} : memref<32x32xbf16, #tpu.memory_space<vmem>>, vector<32x8xbf16>,
    %76 = vector.extract_strided_slice %25 {offsets = [0, 16], sizes = [32, 8], strides = [1, 1]} : vector<32x96xf32> to vector<32x8xf32>
    %77 = arith.truncf %76 : vector<32x8xf32> to vector<32x8xbf16>
    %78 = vector.shape_cast %77 : vector<32x8xbf16> to vector<4x8x8xbf16>
    %79 = vector.extract_strided_slice %25 {offsets = [0, 48], sizes = [32, 8], strides = [1, 1]} : vector<32x96xf32> to vector<32x8xf32>
    %80 = arith.truncf %79 : vector<32x8xf32> to vector<32x8xbf16>
    %81 = vector.shape_cast %80 : vector<32x8xbf16> to vector<4x8x8xbf16>
    %82 = vector.extract_strided_slice %25 {offsets = [0, 80], sizes = [32, 8], strides = [1, 1]} : vector<32x96xf32> to vector<32x8xf32>
    %83 = arith.truncf %82 : vector<32x8xf32> to vector<32x8xbf16>
    %84 = vector.shape_cast %83 : vector<32x8xbf16> to vector<4x8x8xbf16>
    "tpu.trace_start"() <{level = 10 : i32, message = "bqd,bkd->bqk"}> : () -> ()
    %cst_22 = arith.constant dense<0.000000e+00> : vector<4x8x8xf32>
    %85 = tpu.matmul %78, %81, %cst_22 {dimension_numbers = #tpu.dot_dimension_numbers<[2], [2], [1], [1], [0, 0, 0, 1, 1, 1], [0], [0]>} : vector<4x8x8xbf16>, vector<4x8x8xbf16>, vector<4x8x8xf32> -> vector<4x8x8xf32>
    "tpu.trace_stop"() : () -> ()
    %cst_23 = arith.constant dense<0xFF800000> : vector<4x8xf32>
    %86 = vector.multi_reduction <maximumf>, %85, %cst_23 [2] : vector<4x8x8xf32> to vector<4x8xf32>
    %87 = vector.shape_cast %86 : vector<4x8xf32> to vector<4x8x1xf32>
    %88 = vector.broadcast %87 : vector<4x8x1xf32> to vector<4x8x8xf32>
    %89 = arith.subf %85, %88 : vector<4x8x8xf32>
    %90 = math.exp %89 : vector<4x8x8xf32>
    %cst_24 = arith.constant dense<0.000000e+00> : vector<4x8xf32>
    %91 = vector.multi_reduction <add>, %90, %cst_24 [2] : vector<4x8x8xf32> to vector<4x8xf32>
    %92 = vector.shape_cast %91 : vector<4x8xf32> to vector<4x8x1xf32>
    %93 = tpu.reciprocal %92 {approx = true} : vector<4x8x1xf32> -> vector<4x8x1xf32>
    %94 = vector.broadcast %93 : vector<4x8x1xf32> to vector<4x8x8xf32>
    %95 = arith.mulf %90, %94 : vector<4x8x8xf32>
    %96 = arith.truncf %95 : vector<4x8x8xf32> to vector<4x8x8xbf16>
    "tpu.trace_start"() <{level = 10 : i32, message = "bqk,bkd->bqd"}> : () -> ()
    %cst_25 = arith.constant dense<0.000000e+00> : vector<4x8x8xf32>
    %97 = tpu.matmul %96, %84, %cst_25 {dimension_numbers = #tpu.dot_dimension_numbers<[2], [1], [1], [2], [0, 0, 0, 1, 1, 2], [0], [0]>} : vector<4x8x8xbf16>, vector<4x8x8xbf16>, vector<4x8x8xf32> -> vector<4x8x8xf32>
    "tpu.trace_stop"() : () -> ()
    %98 = vector.shape_cast %97 : vector<4x8x8xf32> to vector<32x8xf32>
    %99 = arith.truncf %98 : vector<32x8xf32> to vector<32x8xbf16>
    %c0_26 = arith.constant 0 : index
    %c16 = arith.constant 16 : index
    %100 = vector.load %arg11[%c0_26, %c16] : memref<32x32xbf16, #tpu.memory_space<vmem>>, vector<32x8xbf16>
    tpu.vector_store %arg11[%c0_26, %c16], %99 {strides = array<i32>} : memref<32x32xbf16, #tpu.memory_space<vmem>>, vector<32x8xbf16>,
    %101 = vector.extract_strided_slice %25 {offsets = [0, 24], sizes = [32, 8], strides = [1, 1]} : vector<32x96xf32> to vector<32x8xf32>
    %102 = arith.truncf %101 : vector<32x8xf32> to vector<32x8xbf16>
    %103 = vector.shape_cast %102 : vector<32x8xbf16> to vector<4x8x8xbf16>
    %104 = vector.extract_strided_slice %25 {offsets = [0, 56], sizes = [32, 8], strides = [1, 1]} : vector<32x96xf32> to vector<32x8xf32>
    %105 = arith.truncf %104 : vector<32x8xf32> to vector<32x8xbf16>
    %106 = vector.shape_cast %105 : vector<32x8xbf16> to vector<4x8x8xbf16>
    %107 = vector.extract_strided_slice %25 {offsets = [0, 88], sizes = [32, 8], strides = [1, 1]} : vector<32x96xf32> to vector<32x8xf32>
    %108 = arith.truncf %107 : vector<32x8xf32> to vector<32x8xbf16>
    %109 = vector.shape_cast %108 : vector<32x8xbf16> to vector<4x8x8xbf16>
    "tpu.trace_start"() <{level = 10 : i32, message = "bqd,bkd->bqk"}> : () -> ()
    %cst_27 = arith.constant dense<0.000000e+00> : vector<4x8x8xf32>
    %110 = tpu.matmul %103, %106, %cst_27 {dimension_numbers = #tpu.dot_dimension_numbers<[2], [2], [1], [1], [0, 0, 0, 1, 1, 1], [0], [0]>} : vector<4x8x8xbf16>, vector<4x8x8xbf16>, vector<4x8x8xf32> -> vector<4x8x8xf32>
    "tpu.trace_stop"() : () -> ()
    %cst_28 = arith.constant dense<0xFF800000> : vector<4x8xf32>
    %111 = vector.multi_reduction <maximumf>, %110, %cst_28 [2] : vector<4x8x8xf32> to vector<4x8xf32>
    %112 = vector.shape_cast %111 : vector<4x8xf32> to vector<4x8x1xf32>
    %113 = vector.broadcast %112 : vector<4x8x1xf32> to vector<4x8x8xf32>
    %114 = arith.subf %110, %113 : vector<4x8x8xf32>
    %115 = math.exp %114 : vector<4x8x8xf32>
    %cst_29 = arith.constant dense<0.000000e+00> : vector<4x8xf32>
    %116 = vector.multi_reduction <add>, %115, %cst_29 [2] : vector<4x8x8xf32> to vector<4x8xf32>
    %117 = vector.shape_cast %116 : vector<4x8xf32> to vector<4x8x1xf32>
    %118 = tpu.reciprocal %117 {approx = true} : vector<4x8x1xf32> -> vector<4x8x1xf32>
    %119 = vector.broadcast %118 : vector<4x8x1xf32> to vector<4x8x8xf32>
    %120 = arith.mulf %115, %119 : vector<4x8x8xf32>
    %121 = arith.truncf %120 : vector<4x8x8xf32> to vector<4x8x8xbf16>
    "tpu.trace_start"() <{level = 10 : i32, message = "bqk,bkd->bqd"}> : () -> ()
    %cst_30 = arith.constant dense<0.000000e+00> : vector<4x8x8xf32>
    %122 = tpu.matmul %121, %109, %cst_30 {dimension_numbers = #tpu.dot_dimension_numbers<[2], [1], [1], [2], [0, 0, 0, 1, 1, 2], [0], [0]>} : vector<4x8x8xbf16>, vector<4x8x8xbf16>, vector<4x8x8xf32> -> vector<4x8x8xf32>
    "tpu.trace_stop"() : () -> ()
    %123 = vector.shape_cast %122 : vector<4x8x8xf32> to vector<32x8xf32>
    %124 = arith.truncf %123 : vector<32x8xf32> to vector<32x8xbf16>
    %c0_31 = arith.constant 0 : index
    %c24 = arith.constant 24 : index
    %125 = vector.load %arg11[%c0_31, %c24] : memref<32x32xbf16, #tpu.memory_space<vmem>>, vector<32x8xbf16>
    tpu.vector_store %arg11[%c0_31, %c24], %124 {strides = array<i32>} : memref<32x32xbf16, #tpu.memory_space<vmem>>, vector<32x8xbf16>,
    %c0_32 = arith.constant 0 : index
    %c0_33 = arith.constant 0 : index
    %126 = vector.load %arg11[%c0_32, %c0_33] : memref<32x32xbf16, #tpu.memory_space<vmem>>, vector<32x32xbf16>
    %c0_34 = arith.constant 0 : index
    %c0_35 = arith.constant 0 : index
    %127 = vector.load %arg4[%c0_34, %c0_35] : memref<32x32xbf16, #tpu.memory_space<vmem>>, vector<32x32xbf16>
    %cst_36 = arith.constant dense<0.000000e+00> : vector<32x32xf32>
    %128 = tpu.matmul %126, %127, %cst_36 {dimension_numbers = #tpu.dot_dimension_numbers<[1], [0], [0], [1], [0, 0, 1, 1], [], []>} : vector<32x32xbf16>, vector<32x32xbf16>, vector<32x32xf32> -> vector<32x32xf32>
    %c0_37 = arith.constant 0 : index
    %c0_38 = arith.constant 0 : index
    %129 = vector.load %arg5[%c0_37, %c0_38] : memref<1x32xf32, #tpu.memory_space<vmem>>, vector<1x32xf32>
    %130 = vector.broadcast %129 : vector<1x32xf32> to vector<32x32xf32>
    %131 = arith.addf %128, %130 : vector<32x32xf32>
    %132 = arith.addf %1, %131 : vector<32x32xf32>
    %cst_39 = arith.constant dense<0.000000e+00> : vector<32xf32>
    %133 = vector.multi_reduction <add>, %132, %cst_39 [1] : vector<32x32xf32> to vector<32xf32>
    %134 = vector.shape_cast %133 : vector<32xf32> to vector<32x1xf32>
    %cst_40 = arith.constant 3.200000e+01 : f32
    %135 = vector.broadcast %cst_40 : f32 to vector<32x1xf32>
    %136 = arith.divf %134, %135 : vector<32x1xf32>
    %137 = vector.broadcast %136 : vector<32x1xf32> to vector<32x32xf32>
    %138 = arith.subf %132, %137 : vector<32x32xf32>
    %139 = arith.mulf %138, %138 : vector<32x32xf32>
    %cst_41 = arith.constant dense<0.000000e+00> : vector<32xf32>
    %140 = vector.multi_reduction <add>, %139, %cst_41 [1] : vector<32x32xf32> to vector<32xf32>
    %141 = vector.shape_cast %140 : vector<32xf32> to vector<32x1xf32>
    %cst_42 = arith.constant 3.200000e+01 : f32
    %142 = vector.broadcast %cst_42 : f32 to vector<32x1xf32>
    %143 = arith.divf %141, %142 : vector<32x1xf32>
    %144 = vector.broadcast %136 : vector<32x1xf32> to vector<32x32xf32>
    %145 = arith.subf %132, %144 : vector<32x32xf32>
    %cst_43 = arith.constant 9.99999974E-6 : f32
    %146 = vector.broadcast %cst_43 : f32 to vector<32x1xf32>
    %147 = arith.addf %143, %146 : vector<32x1xf32>
    %148 = math.rsqrt %147 : vector<32x1xf32>
    %149 = vector.broadcast %148 : vector<32x1xf32> to vector<32x32xf32>
    %150 = arith.mulf %145, %149 : vector<32x32xf32>
    %151 = arith.truncf %150 : vector<32x32xf32> to vector<32x32xbf16>
    %c0_44 = arith.constant 0 : index
    %c0_45 = arith.constant 0 : index
    %152 = vector.load %arg9[%c0_44, %c0_45] : memref<1x32xf32, #tpu.memory_space<vmem>>, vector<1x32xf32>
    %153 = vector.broadcast %152 : vector<1x32xf32> to vector<32x32xf32>
    %154 = arith.addf %132, %153 : vector<32x32xf32>
    %c0_46 = arith.constant 0 : index
    %c0_47 = arith.constant 0 : index
    %155 = vector.load %arg6[%c0_46, %c0_47] : memref<32x128xbf16, #tpu.memory_space<vmem>>, vector<32x128xbf16>
    %cst_48 = arith.constant dense<0.000000e+00> : vector<32x128xf32>
    %156 = tpu.matmul %151, %155, %cst_48 {dimension_numbers = #tpu.dot_dimension_numbers<[1], [0], [0], [1], [0, 0, 1, 1], [], []>} : vector<32x32xbf16>, vector<32x128xbf16>, vector<32x128xf32> -> vector<32x128xf32>
    %c0_49 = arith.constant 0 : index
    %c0_50 = arith.constant 0 : index
    %157 = vector.load %arg7[%c0_49, %c0_50] : memref<1x128xf32, #tpu.memory_space<vmem>>, vector<1x128xf32>
    %158 = vector.broadcast %157 : vector<1x128xf32> to vector<32x128xf32>
    %159 = arith.addf %156, %158 : vector<32x128xf32>
    %cst_51 = arith.constant 1.702000e+00 : f32
    %160 = vector.broadcast %cst_51 : f32 to vector<32x128xf32>
    %161 = arith.mulf %160, %159 : vector<32x128xf32>
    %162 = arith.negf %161 : vector<32x128xf32>
    %163 = math.exp %162 : vector<32x128xf32>
    %cst_52 = arith.constant 1.000000e+00 : f32
    %164 = vector.broadcast %cst_52 : f32 to vector<32x128xf32>
    %165 = arith.addf %164, %163 : vector<32x128xf32>
    %166 = arith.divf %164, %165 : vector<32x128xf32>
    %167 = arith.mulf %159, %166 : vector<32x128xf32>
    %168 = arith.truncf %167 : vector<32x128xf32> to vector<32x128xbf16>
    %c0_53 = arith.constant 0 : index
    %c0_54 = arith.constant 0 : index
    %169 = vector.load %arg8[%c0_53, %c0_54] : memref<128x32xbf16, #tpu.memory_space<vmem>>, vector<128x32xbf16>
    %cst_55 = arith.constant dense<0.000000e+00> : vector<32x32xf32>
    %170 = tpu.matmul %168, %169, %cst_55 {dimension_numbers = #tpu.dot_dimension_numbers<[1], [0], [0], [1], [0, 0, 1, 1], [], []>} : vector<32x128xbf16>, vector<128x32xbf16>, vector<32x32xf32> -> vector<32x32xf32>
    %171 = arith.addf %154, %170 : vector<32x32xf32>
    %172 = vector.shape_cast %171 : vector<32x32xf32> to vector<4x8x32xf32>
    %c0_56 = arith.constant 0 : index
    %c0_57 = arith.constant 0 : index
    %c0_58 = arith.constant 0 : index
    %173 = vector.load %arg10[%c0_56, %c0_57, %c0_58] : memref<4x8x32xf32, #tpu.memory_space<vmem>>, vector<4x8x32xf32>
    tpu.vector_store %arg10[%c0_56, %c0_57, %c0_58], %172 {strides = array<i32>} : memref<4x8x32xf32, #tpu.memory_space<vmem>>, vector<4x8x32xf32>,
    return
  }
  func.func @transform_0(%arg0: i32) -> (i32, i32, i32) {
    %c0_i32 = arith.constant 0 : i32
    %c0_i32_0 = arith.constant 0 : i32
    %c0_i32_1 = arith.constant 0 : i32
    return %arg0, %c0_i32, %c0_i32_0 : i32, i32, i32
  }
  func.func @transform_1(%arg0: i32) -> (i32, i32) {
    %c0_i32 = arith.constant 0 : i32
    %c0_i32_0 = arith.constant 0 : i32
    %c0_i32_1 = arith.constant 0 : i32
    return %c0_i32, %c0_i32_0 : i32, i32
  }
  func.func @transform_2(%arg0: i32) -> (i32, i32) {
    %c0_i32 = arith.constant 0 : i32
    %c0_i32_0 = arith.constant 0 : i32
    %c0_i32_1 = arith.constant 0 : i32
    return %c0_i32, %c0_i32_0 : i32, i32
  }
  func.func @transform_3(%arg0: i32) -> (i32, i32) {
    %c0_i32 = arith.constant 0 : i32
    %c0_i32_0 = arith.constant 0 : i32
    %c0_i32_1 = arith.constant 0 : i32
    return %c0_i32, %c0_i32_0 : i32, i32
  }
  func.func @transform_4(%arg0: i32) -> (i32, i32) {
    %c0_i32 = arith.constant 0 : i32
    %c0_i32_0 = arith.constant 0 : i32
    %c0_i32_1 = arith.constant 0 : i32
    return %c0_i32, %c0_i32_0 : i32, i32
  }
  func.func @transform_5(%arg0: i32) -> (i32, i32) {
    %c0_i32 = arith.constant 0 : i32
    %c0_i32_0 = arith.constant 0 : i32
    %c0_i32_1 = arith.constant 0 : i32
    return %c0_i32, %c0_i32_0 : i32, i32
  }
  func.func @transform_6(%arg0: i32) -> (i32, i32) {
    %c0_i32 = arith.constant 0 : i32
    %c0_i32_0 = arith.constant 0 : i32
    %c0_i32_1 = arith.constant 0 : i32
    return %c0_i32, %c0_i32_0 : i32, i32
  }
  func.func @transform_7(%arg0: i32) -> (i32, i32) {
    %c0_i32 = arith.constant 0 : i32
    %c0_i32_0 = arith.constant 0 : i32
    %c0_i32_1 = arith.constant 0 : i32
    return %c0_i32, %c0_i32_0 : i32, i32
  }
  func.func @transform_8(%arg0: i32) -> (i32, i32) {
    %c0_i32 = arith.constant 0 : i32
    %c0_i32_0 = arith.constant 0 : i32
    %c0_i32_1 = arith.constant 0 : i32
    return %c0_i32, %c0_i32_0 : i32, i32
  }
  func.func @transform_9(%arg0: i32) -> (i32, i32, i32) {
    %c0_i32 = arith.constant 0 : i32
    %c0_i32_0 = arith.constant 0 : i32
    %c0_i32_1 = arith.constant 0 : i32
    return %arg0, %c0_i32, %c0_i32_0 : i32, i32, i32
  }
}

</mosaic_0001>

<bundles_post_ra>
// kernel: tpu_custom_call.1
= control target key start
LH: loop header
LB: loop body
LE: loop exit
PB: predicated region body
PF: predicated region fallthrough
CT: control target
= control target key end

     0   :  { %vm38_vm0 = vcmask 261120   ;;  %s2309_s0 = inlined_call_operand.vmem [shape: f32[4,8,32], index: 0, kind: input, shape index: {}]   ;;  %s2310_s1 = inlined_call_operand.vmem [shape: bf16[32,96], index: 1, kind: input, shape index: {}]   ;;  %s2311_s2 = inlined_call_operand.vmem [shape: f32[1,96], index: 2, kind: input, shape index: {}]   ;;  %s2312_s3 = inlined_call_operand.vmem [shape: bf16[32,32], index: 3, kind: input, shape index: {}]   ;;  %s2313_s4 = inlined_call_operand.vmem [shape: f32[1,32], index: 4, kind: input, shape index: {}]   ;;  %s2314_s5 = inlined_call_operand.vmem [shape: bf16[32,128], index: 5, kind: input, shape index: {}]   ;;  %s2315_s6 = inlined_call_operand.vmem [shape: f32[1,128], index: 6, kind: input, shape index: {}]   ;;  %s2316_s7 = inlined_call_operand.vmem [shape: bf16[128,32], index: 7, kind: input, shape index: {}]   ;;  %s2317_s8 = inlined_call_operand.vmem [shape: f32[1,32], index: 8, kind: input, shape index: {}]   ;;  %s2318_s9 = inlined_call_operand.hbm [shape: f32[4,8,32], index: 9, kind: output, shape index: {}]  }
   0x1   :  { %v36_v0 = vld [vmem:[%s2309_s0 + $0x10] sm:$0xff]  ;;  %v34_v1 = vld [vmem:[%s2309_s0] sm:$0xff] }
   0x2   :  { %v45_v2 = vsel %vm38_vm0, %v36_v0, 0.0  ;;  %v39_v3 = vsel %vm38_vm0, %v34_v1, 0.0 }
   0x3   :  { %46 = vadd.xlane.f32.xlu1 %v45_v2  ;;  %40 = vadd.xlane.f32.xlu0 %v39_v3 }
   0x4   :  { %14 = vsyncpa [#allocation4], 0  ;;  %v37_v4 = vld [vmem:[%s2309_s0 + $0x18] sm:$0xff]  ;;  %v35_v5 = vld [vmem:[%s2309_s0 + $0x8] sm:$0xff]  ;;  %v1843_v8 = vmov 32.0   ;;  %s1844_s22 = smov 96  }
   0x5   :  { %v48_v6 = vsel %vm38_vm0, %v37_v4, 0.0  ;;  %v42_v7 = vsel %vm38_vm0, %v35_v5, 0.0  ;;  %1715 = vrcp.f32 %v1843_v8  ;;  %v1679_v35 = vld [vmem:[%s2310_s1 + $0x8] sm:$0xff]  ;;  %v1678_v36 = vld [vmem:[%s2310_s1] sm:$0xff]  ;;  %vm190_vm14 = vcmask 64512   ;;  %s1846_s23 = smov 88  }
   0x6   :  { %168 = vmatpush.bf16.msra.mxu1 %v1679_v35  ;;  %s1847_s24 = smov 120   ;;  %vm335_vm15 = vcmask 1043456   ;;  %s1848_s25 = smov 56  }
   0x7   :  { %s1849_s26 = smov 80   ;;  %s1850_s27 = smov 112  }
   0x8   :  { %s1851_s28 = smov 48   ;;  %s1852_s29 = smov 72  }
   0x9   :  { %s1853_s30 = smov 104   ;;  %s1854_s10 = smov 40  }
   0xa   :  { %169 = vmatpush.bf16.msra.mxu1 %v1678_v36  ;;  %s1855_s11 = smov 8   ;;  %s1856_s12 = smov 16  }
   0xb   :  { %49 = vadd.xlane.f32.xlu1 %v48_v6  ;;  %43 = vadd.xlane.f32.xlu0 %v42_v7  ;;  %v1716_v9 = vpop.eup %1715  ;;  %s1857_s13 = smov 24  }
   0xc   :  { %v52_v10 = vmul.f32 32.0, %v1716_v9  ;;  %vm56_vm1 = vweird.f32 %v1716_v9 }
   0xe   :  { %v53_v11 = vsub.f32 1.0, %v52_v10 }
  0x10   :  { %v54_v12 = vmul.f32 %v1716_v9, %v53_v11 }
  0x12   :  { %v55_v13 = vadd.f32 %v1716_v9, %v54_v12 }
  0x14   :  { %v1926_v14 = vsel %vm56_vm1, %v1716_v9, %v55_v13  ;;  %vm419_vm1 = vcmask 60416  }
  0x76   :  { %v47_v15 = vpop.xlane.xlu1 %46  ;;  %v41_v16 = vpop.xlane.xlu0 %40 }
  0x77   :  { %v60_v17 = vmul.f32 %v1926_v14, %v47_v15  ;;  %v58_v18 = vmul.f32 %v1926_v14, %v41_v16 }
  0x79   :  { %v1930_v19 = vsub.f32 %v36_v0, %v60_v17  ;;  %v1932_v20 = vsub.f32 %v34_v1, %v58_v18 }
  0x7b   :  { %v68_v21 = vmul.f32 %v1930_v19, %v1930_v19  ;;  %v66_v22 = vmul.f32 %v1932_v20, %v1932_v20 }
  0x7d   :  { %v76_v23 = vsel %vm38_vm0, %v68_v21, 0.0  ;;  %v70_v24 = vsel %vm38_vm0, %v66_v22, 0.0  ;;  %v1711_v21 = vld [vmem:[%s2311_s2] ss:$0 sm:$0xff]  ;;  %s1845_s2 = smov 64  }
  0x7e   :  { %v50_v25 = vpop.xlane.xlu1 %49  ;;  %77 = vadd.xlane.f32.xlu0 %v76_v23  ;;  %71 = vadd.xlane.f32.xlu2 %v70_v24  ;;  %v44_v26 = vpop.xlane.xlu0 %43 }
  0x7f   :  { %v61_v27 = vmul.f32 %v1926_v14, %v50_v25  ;;  %v59_v28 = vmul.f32 %v1926_v14, %v44_v26 }
  0x81   :  { %v1942_v29 = vsub.f32 %v37_v4, %v61_v27  ;;  %v63_v30 = vsub.f32 %v35_v5, %v59_v28 }
  0x83   :  { %v69_v31 = vmul.f32 %v1942_v29, %v1942_v29  ;;  %v67_v32 = vmul.f32 %v63_v30, %v63_v30 }
  0x85   :  { %v79_v33 = vsel %vm38_vm0, %v69_v31, 0.0  ;;  %v73_v34 = vsel %vm38_vm0, %v67_v32, 0.0 }
  0x86   :  { %80 = vadd.xlane.f32.xlu1 %v79_v33  ;;  %74 = vadd.xlane.f32.xlu2 %v73_v34 }
  0xf1   :  { %v72_v37 = vpop.xlane.xlu2 %71  ;;  %v78_v40 = vpop.xlane.xlu0 %77 }
  0xf2   :  { %v82_v38 = vmul.f32 %v72_v37, %v1926_v14  ;;  %v84_v41 = vmul.f32 %v78_v40, %v1926_v14 }
  0xf4   :  { %v86_v39 = vadd.f32 1e-05, %v82_v38  ;;  %v88_v50 = vadd.f32 1e-05, %v84_v41 }
  0xf6   :  { %1717 = vrsqrt.f32 %v86_v39  ;;  %vm96_vm3 = vweird.f32 %v86_v39  ;;  %vm116_vm10 = vweird.f32 %v88_v50 }
  0xf9   :  { %v81_v42 = vpop.xlane.xlu1 %80  ;;  %v75_v43 = vpop.xlane.xlu2 %74 }
  0xfa   :  { %v85_v44 = vmul.f32 %v81_v42, %v1926_v14  ;;  %v83_v45 = vmul.f32 %v75_v43, %v1926_v14 }
  0xfc   :  { %v1718_v46 = vpop.eup %1717  ;;  %v89_v47 = vadd.f32 1e-05, %v85_v44  ;;  %v87_v48 = vadd.f32 1e-05, %v83_v45 }
  0xfd   :  { %v91_v49 = vmul.f32 %v1718_v46, %v86_v39  ;;  %vm97_vm2 = vweird.f32 %v1718_v46 }
  0xfe   :  { %1719 = vrsqrt.f32 %v89_v47  ;;  %vm98_vm5 = vmor %vm96_vm3, %vm97_vm2  ;;  %vm106_vm6 = vweird.f32 %v87_v48  ;;  %vm126_vm8 = vweird.f32 %v89_v47  ;;  %vm668_vm2 = vcmask 126016  }
  0xff   :  { %v92_v51 = vmul.f32 %v1718_v46, %v91_v49  ;;  %1721 = vrsqrt.f32 %v87_v48  ;;  %vm917_vm3 = vcmask 191616  }
 0x100   :  { %1723 = vrsqrt.f32 %v88_v50 }
 0x101   :  { %v93_v52 = vmul.f32 0.5, %v92_v51 }
 0x103   :  { %v94_v55 = vsub.f32 1.5, %v93_v52 }
 0x104   :  { %v1720_v53 = vpop.eup %1719 }
 0x105   :  { %v1722_v54 = vpop.eup %1721  ;;  %v121_v58 = vmul.f32 %v1720_v53, %v89_v47  ;;  %v95_v60 = vmul.f32 %v1718_v46, %v94_v55  ;;  %vm127_vm9 = vweird.f32 %v1720_v53 }
 0x106   :  { %v101_v56 = vmul.f32 %v1722_v54, %v87_v48  ;;  %v1724_v57 = vpop.eup %1723  ;;  %vm107_vm4 = vweird.f32 %v1722_v54  ;;  %vm128_vm12 = vmor %vm126_vm8, %vm127_vm9 }
 0x107   :  { %v111_v61 = vmul.f32 %v1724_v57, %v88_v50  ;;  %v122_v63 = vmul.f32 %v1720_v53, %v121_v58  ;;  %v99_v3 = vsel %vm98_vm5, %v1718_v46, %v95_v60  ;;  %vm108_vm7 = vmor %vm106_vm6, %vm107_vm4  ;;  %vm117_vm11 = vweird.f32 %v1724_v57 }
 0x108   :  { %v102_v59 = vmul.f32 %v1722_v54, %v101_v56  ;;  %v130_v6 = vmul.f32 %v99_v3, %v1932_v20  ;;  %vm118_vm13 = vmor %vm116_vm10, %vm117_vm11  ;;  %vm1166_vm4 = vcmask 257216  }
 0x109   :  { %v112_v1 = vmul.f32 %v1724_v57, %v111_v61  ;;  %v123_v4 = vmul.f32 0.5, %v122_v63 }
 0x10a   :  { %v103_v62 = vmul.f32 0.5, %v102_v59 }
 0x10b   :  { %v113_v8 = vmul.f32 0.5, %v112_v1  ;;  %v124_v10 = vsub.f32 1.5, %v123_v4 }
 0x10c   :  { %v104_v0 = vsub.f32 1.5, %v103_v62 }
 0x10d   :  { %v114_v11 = vsub.f32 1.5, %v113_v8  ;;  %v125_v12 = vmul.f32 %v1720_v53, %v124_v10 }
 0x10e   :  { %v105_v2 = vmul.f32 %v1722_v54, %v104_v0 }
 0x10f   :  { %v115_v13 = vmul.f32 %v1724_v57, %v114_v11  ;;  %v129_v15 = vsel %vm128_vm12, %v1720_v53, %v125_v12 }
 0x110   :  { %v109_v5 = vsel %vm108_vm7, %v1722_v54, %v105_v2  ;;  %v133_v17 = vmul.f32 %v129_v15, %v1942_v29 }
 0x111   :  { %v131_v7 = vmul.f32 %v109_v5, %v63_v30  ;;  %v119_v16 = vsel %vm118_vm13, %v1724_v57, %v115_v13 }
 0x112   :  { %v132_v18 = vmul.f32 %v119_v16, %v1930_v19 }
 0x113   :  { %v134_v9 = vpack.c.bf16 %v131_v7, %v130_v6 }
 0x114   :  { %v135_v20 = vpack.c.bf16 %v133_v17, %v132_v18 }
 0x115   :  { %1580 = vmatmul.msk.bf16.vlgmr.msra.gmra.mxu1 %vm38_vm0, %v134_v9 }
 0x125   :  { %1581 = vmatmul.msk.bf16.gmra.mxu1 %vm38_vm0, %v135_v20 }
 0x192   :  { %v171_v22 = vpop.f32.mrf.mxu1 }
 0x193   :  { %v172_v23 = vadd.f32 %v1711_v21, %v171_v22 }
 0x195   :  { %v181_v24 = vpack.c.bf16 %v172_v23, %v172_v23 }
 0x197   :  { %v186_v25 = vunpack.c.l.b16 %v181_v24 }
 0x199   :  { %v1966_v26 = vpack.c.b16 %v186_v25, %v186_v25 }
 0x19a   :  { %v173_v27 = vpop.f32.mrf.mxu1 }
 0x19b   :  { %v174_v28 = vadd.f32 %v1711_v21, %v173_v27  ;;  %188 = vrot.lane.b32.xlu0 %v1966_v26, %s1844_s22 }
 0x19d   :  { %v182_v29 = vpack.c.bf16 %v174_v28, %v174_v28 }
 0x19f   :  { %v211_v19 = vunpack.c.l.b16 %v182_v29 }
 0x1a1   :  { %v1969_v30 = vpack.c.b16 %v211_v19, %v211_v19 }
 0x1a2   :  { %v176_v31 = vpop.f32.mrf.mxu1 }
 0x1a3   :  { %v177_v32 = vadd.f32 %v1711_v21, %v176_v31  ;;  %213 = vrot.lane.b32.xlu2 %v1969_v30, %s1844_s22 }
 0x1a5   :  { %v183_v33 = vpack.c.bf16 %v177_v32, %v177_v32 }
 0x1a7   :  { %v235_v34 = vunpack.c.l.b16 %v183_v33 }
 0x1a9   :  { %v1972_v35 = vpack.c.b16 %v235_v34, %v235_v34 }
 0x1aa   :  { %v178_v36 = vpop.f32.mrf.mxu1 }
 0x1ab   :  { %v179_v37 = vadd.f32 %v1711_v21, %v178_v36  ;;  %237 = vrot.lane.b32.xlu1 %v1972_v35, %s1844_s22 }
 0x1ad   :  { %v184_v38 = vpack.c.bf16 %v179_v37, %v179_v37 }
 0x1af   :  { %v259_v39 = vunpack.c.l.b16 %v184_v38 }
 0x1b1   :  { %v1975_v40 = vpack.c.b16 %v259_v39, %v259_v39 }
 0x1b3   :  { %261 = vrot.lane.b32.xlu2 %v1975_v40, %s1844_s22 }
 0x1fd   :  { %v214_v41 = vpop.permute.xlu2 %213 }
 0x1fe   :  { %v219_v42 = vsel %vm190_vm14, %v214_v41, 0 }
 0x1ff   :  { %228 = vmatpush.bf16.xpose.msra.mxu2 %v219_v42 }
 0x206   :  { %1583 = vmatmul.msk.bf16.vlgmr.msra.gmra.mxu2 %vm190_vm14, %v182_v29 }
 0x20d   :  { %v262_v43 = vpop.permute.xlu2 %261  ;;  %v189_v44 = vpop.permute.xlu0 %188 }
 0x20e   :  { %v267_v45 = vsel %vm190_vm14, %v262_v43, 0  ;;  %v195_v46 = vsel %vm190_vm14, %v189_v44, 0 }
 0x20f   :  { %204 = vmatpush.bf16.xpose.msrb.mxu1 %v195_v46 }
 0x216   :  { %1582 = vmatmul.msk.bf16.vlgmr.msrb.gmra.mxu1 %vm190_vm14, %v181_v24 }
 0x217   :  { %276 = vmatpush.bf16.xpose.msra.mxu1 %v267_v45 }
 0x21d   :  { %v238_v47 = vpop.permute.xlu1 %237 }
 0x21e   :  { %v243_v48 = vsel %vm190_vm14, %v238_v47, 0 }
 0x21f   :  { %252 = vmatpush.bf16.xpose.msra.mxu3 %v243_v48 }
 0x226   :  { %1584 = vmatmul.msk.bf16.vlgmr.msra.gmra.mxu3 %vm190_vm14, %v183_v33  ;;  %1585 = vmatmul.msk.bf16.vlgmr.msra.gmra.mxu1 %vm190_vm14, %v184_v38 }
 0x289   :  { %v230_v49 = vpop.f32.mrf.mxu2 }
 0x28a   :  { %v285_v50 = vsel %vm190_vm14, %v230_v49, -inf }
 0x28b   :  { %286 = vmax.xlane.f32.xlu2 %v285_v50 }
 0x291   :  { %v232_v51 = vpop.f32.mrf.mxu2 }
 0x293   :  { %v206_v52 = vpop.f32.mrf.mxu1 }
 0x294   :  { %v282_v53 = vsel %vm190_vm14, %v206_v52, -inf }
 0x295   :  { %283 = vmax.xlane.f32.xlu0 %v282_v53 }
 0x29b   :  { %v208_v54 = vpop.f32.mrf.mxu1 }
 0x2a3   :  { %v278_v55 = vpop.f32.mrf.mxu1 }
 0x2a4   :  { %v291_v60 = vsel %vm190_vm14, %v278_v55, -inf }
 0x2a9   :  { %v254_v56 = vpop.f32.mrf.mxu3  ;;  %330 = vrot.lane.b32.xlu0 %v1966_v26, %s1845_s2 }
 0x2aa   :  { %v288_v57 = vsel %vm190_vm14, %v254_v56, -inf }
 0x2ab   :  { %289 = vmax.xlane.f32.xlu1 %v288_v57  ;;  %v280_v58 = vpop.f32.mrf.mxu1 }
 0x2b1   :  { %v256_v59 = vpop.f32.mrf.mxu3 }
 0x2c4   :  { %426 = vrot.lane.b32.xlu1 %v1966_v26, %s1846_s23 }
 0x2d3   :  { %292 = vmax.xlane.f32.xlu0 %v291_v60 }
 0x2e7   :  { %449 = vrot.lane.b32.xlu0 %v1969_v30, %s1846_s23 }
 0x2ef   :  { %424 = vrot.lane.b32.xlu0 %v1966_v26, %s1847_s24 }
 0x2f7   :  { %373 = vrot.lane.b32.xlu0 %v1972_v35, %s1845_s2 }
 0x2fe   :  { %v287_v61 = vpop.xlane.xlu2 %286 }
 0x2ff   :  { %v295_v62 = vsub.f32 %v230_v49, %v287_v61  ;;  %394 = vrot.lane.b32.xlu0 %v1975_v40, %s1845_s2 }
 0x301   :  { %v300_v63 = vmul.f32 1.442695, %v295_v62 }
 0x303   :  { %1725 = vpow2.f32 %v300_v63 }
 0x307   :  { %472 = vrot.lane.b32.xlu0 %v1972_v35, %s1846_s23 }
 0x308   :  { %v284_v0 = vpop.xlane.xlu0 %283 }
 0x309   :  { %v1726_v1 = vpop.eup %1725  ;;  %v294_v2 = vsub.f32 %v206_v52, %v284_v0 }
 0x30a   :  { %v309_v3 = vsel %vm190_vm14, %v1726_v1, 0.0 }
 0x30b   :  { %v298_v4 = vmul.f32 1.442695, %v294_v2  ;;  %310 = vadd.xlane.f32.xlu1 %v309_v3 }
 0x30d   :  { %1727 = vpow2.f32 %v298_v4 }
 0x30f   :  { %495 = vrot.lane.b32.xlu0 %v1975_v40, %s1846_s23  ;;  %s1560_s23 = sshll.u32 %s2318_s9, 4  ;;  %s1561_s23 = int_to_ptr.hbm [resolvable:$true] %s1560_s23 }
 0x313   :  { %v1728_v5 = vpop.eup %1727 }
 0x314   :  { %v306_v6 = vsel %vm190_vm14, %v1728_v5, 0.0 }
 0x315   :  { %307 = vadd.xlane.f32.xlu2 %v306_v6 }
 0x317   :  { %470 = vrot.lane.b32.xlu0 %v1972_v35, %s1847_s24 }
 0x31b   :  { %v331_v7 = vpop.permute.xlu0 %330 }
 0x31c   :  { %v337_v8 = vsel %vm335_vm15, %v331_v7, 0 }
 0x31d   :  { %346 = vmatpush.bf16.msrb.mxu2 %v337_v8 }
 0x31e   :  { %v290_v9 = vpop.xlane.xlu1 %289 }
 0x31f   :  { %v296_v12 = vsub.f32 %v254_v56, %v290_v9 }
 0x321   :  { %v302_v16 = vmul.f32 1.442695, %v296_v12 }
 0x324   :  { %447 = vrot.lane.b32.xlu1 %v1969_v30, %s1847_s24 }
 0x32d   :  { %352 = vrot.lane.b32.xlu2 %v1969_v30, %s1845_s2 }
 0x336   :  { %v427_v10 = vpop.permute.xlu1 %426 }
 0x337   :  { %v432_v11 = vsel %vm190_vm14, %v427_v10, 0 }
 0x338   :  { %441 = vmatpush.bf16.xpose.msra.mxu2 %v432_v11 }
 0x346   :  { %v293_v13 = vpop.xlane.xlu0 %292 }
 0x347   :  { %v297_v15 = vsub.f32 %v278_v55, %v293_v13 }
 0x349   :  { %v304_v17 = vmul.f32 1.442695, %v297_v15 }
 0x34b   :  { %1729 = vpow2.f32 %v304_v17 }
 0x34c   :  { %1731 = vpow2.f32 %v302_v16 }
 0x351   :  { %v1730_v18 = vpop.eup %1729 }
 0x352   :  { %v1732_v20 = vpop.eup %1731  ;;  %v315_v21 = vsel %vm190_vm14, %v1730_v18, 0.0 }
 0x353   :  { %316 = vadd.xlane.f32.xlu1 %v315_v21  ;;  %v312_v22 = vsel %vm190_vm14, %v1732_v20, 0.0 }
 0x356   :  { %313 = vadd.xlane.f32.xlu2 %v312_v22 }
 0x359   :  { %v450_v23 = vpop.permute.xlu0 %449 }
 0x35a   :  { %v455_v43 = vsel %vm190_vm14, %v450_v23, 0 }
 0x361   :  { %v425_v24 = vpop.permute.xlu0 %424 }
 0x369   :  { %v374_v25 = vpop.permute.xlu0 %373 }
 0x36a   :  { %v379_v27 = vsel %vm335_vm15, %v374_v25, 0 }
 0x36b   :  { %388 = vmatpush.bf16.msra.mxu0 %v379_v27 }
 0x36c   :  { %564 = vrot.lane.b32.xlu1 %v1966_v26, %s1848_s25 }
 0x36e   :  { %493 = vrot.lane.b32.xlu2 %v1975_v40, %s1847_s24 }
 0x371   :  { %v395_v28 = vpop.permute.xlu0 %394 }
 0x372   :  { %v400_v29 = vsel %vm335_vm15, %v395_v28, 0 }
 0x373   :  { %409 = vmatpush.bf16.msrb.mxu0 %v400_v29 }
 0x374   :  { %698 = vrot.lane.b32.xlu1 %v1969_v30, %s1849_s26 }
 0x379   :  { %v473_v19 = vpop.permute.xlu0 %472 }
 0x37a   :  { %v478_v53 = vsel %vm190_vm14, %v473_v19, 0 }
 0x37e   :  { %v311_v33 = vpop.xlane.xlu1 %310 }
 0x37f   :  { %1733 = vrcp.f32 %v311_v33 }
 0x381   :  { %v496_v31 = vpop.permute.xlu0 %495 }
 0x382   :  { %v501_v32 = vsel %vm190_vm14, %v496_v31, 0 }
 0x383   :  { %510 = vmatpush.bf16.xpose.msrb.mxu1 %v501_v32 }
 0x385   :  { %v1734_v36 = vpop.eup %1733 }
 0x386   :  { %v323_v38 = vmul.f32 %v1734_v36, %v1726_v1 }
 0x388   :  { %v308_v34 = vpop.xlane.xlu2 %307  ;;  %v327_v45 = vpack.c.bf16 %v323_v38, %v323_v38 }
 0x389   :  { %1735 = vrcp.f32 %v308_v34  ;;  %v471_v59 = vpop.permute.xlu0 %470 }
 0x38f   :  { %v1736_v37 = vpop.eup %1735 }
 0x390   :  { %v322_v39 = vmul.f32 %v1736_v37, %v1728_v5  ;;  %v353_v41 = vpop.permute.xlu2 %352 }
 0x391   :  { %v358_v42 = vsel %vm335_vm15, %v353_v41, 0 }
 0x392   :  { %367 = vmatpush.bf16.msrb.mxu3 %v358_v42  ;;  %v326_v44 = vpack.c.bf16 %v322_v39, %v322_v39 }
 0x394   :  { %1586 = vmatmul.msk.bf16.vlgmr.msrb.gmra.mxu2 %vm190_vm14, %v326_v44 }
 0x395   :  { %1587 = vmatmul.msk.bf16.vlgmr.msrb.gmra.mxu3 %vm190_vm14, %v327_v45 }
 0x396   :  { %464 = vmatpush.bf16.xpose.msra.mxu3 %v455_v43  ;;  %v448_v46 = vpop.permute.xlu1 %447 }
 0x3a4   :  { %1590 = vmatmul.msk.bf16.vlgmr.msra.gmra.mxu2 %vm190_vm14, %v425_v24 }
 0x3a5   :  { %1591 = vmatmul.msk.bf16.vlgmr.msra.gmra.mxu3 %vm190_vm14, %v448_v46 }
 0x3c6   :  { %v317_v51 = vpop.xlane.xlu1 %316 }
 0x3c9   :  { %v314_v47 = vpop.xlane.xlu2 %313 }
 0x3ca   :  { %1737 = vrcp.f32 %v314_v47 }
 0x3cb   :  { %1739 = vrcp.f32 %v317_v51 }
 0x3d0   :  { %v1738_v48 = vpop.eup %1737 }
 0x3d1   :  { %v494_v49 = vpop.permute.xlu2 %493  ;;  %v324_v50 = vmul.f32 %v1738_v48, %v1732_v20  ;;  %v1740_v54 = vpop.eup %1739 }
 0x3d2   :  { %1593 = vmatmul.msk.bf16.vlgmr.msrb.gmra.mxu1 %vm190_vm14, %v494_v49  ;;  %v325_v56 = vmul.f32 %v1740_v54, %v1730_v18 }
 0x3d3   :  { %v328_v52 = vpack.c.bf16 %v324_v50, %v324_v50 }
 0x3d4   :  { %v329_v58 = vpack.c.bf16 %v325_v56, %v325_v56 }
 0x3d5   :  { %1588 = vmatmul.msk.bf16.vlgmr.msra.gmra.mxu0 %vm190_vm14, %v328_v52 }
 0x3d6   :  { %487 = vmatpush.bf16.xpose.msra.mxu0 %v478_v53 }
 0x3de   :  { %v565_v55 = vpop.permute.xlu1 %564 }
 0x3df   :  { %v570_v57 = vsel %vm335_vm15, %v565_v55, 0 }
 0x3e0   :  { %579 = vmatpush.bf16.msrb.mxu2 %v570_v57 }
 0x3e5   :  { %1589 = vmatmul.msk.bf16.vlgmr.msrb.gmra.mxu0 %vm190_vm14, %v329_v58 }
 0x3e6   :  { %v699_v22 = vpop.permute.xlu1 %698 }
 0x3e7   :  { %v704_v37 = vsel %vm190_vm14, %v699_v22, 0 }
 0x3f5   :  { %1592 = vmatmul.msk.bf16.vlgmr.msra.gmra.mxu0 %vm190_vm14, %v471_v59 }
 0x417   :  { %v348_v60 = vpop.f32.mrf.mxu2 }
 0x418   :  { %v415_v61 = vpack.c.bf16 %v348_v60, %v348_v60  ;;  %v369_v62 = vpop.f32.mrf.mxu3 }
 0x419   :  { %v416_v63 = vpack.c.bf16 %v369_v62, %v369_v62 }
 0x41a   :  { %420 = vst.msk [vmem:[#allocation2] sm:$0xf] %vm419_vm1, %v415_v61 }
 0x41b   :  { %421 = vst.msk [vmem:[#allocation2 + $0x4] sm:$0xf] %vm419_vm1, %v416_v63 }
 0x41f   :  { %v350_v0 = vpop.f32.mrf.mxu2 }
 0x420   :  { %v371_v1 = vpop.f32.mrf.mxu3 }
 0x427   :  { %v443_v2 = vpop.f32.mrf.mxu2 }
 0x428   :  { %v466_v3 = vpop.f32.mrf.mxu3  ;;  %v516_v4 = vsel %vm190_vm14, %v443_v2, -inf }
 0x429   :  { %517 = vmax.xlane.f32.xlu0 %v516_v4  ;;  %v519_v5 = vsel %vm190_vm14, %v466_v3, -inf }
 0x42a   :  { %520 = vmax.xlane.f32.xlu1 %v519_v5 }
 0x42f   :  { %v445_v6 = vpop.f32.mrf.mxu2 }
 0x430   :  { %v468_v7 = vpop.f32.mrf.mxu3 }
 0x43d   :  { %585 = vrot.lane.b32.xlu0 %v1969_v30, %s1848_s25 }
 0x445   :  { %673 = vrot.lane.b32.xlu0 %v1966_v26, %s1850_s27 }
 0x44f   :  { %v512_v8 = vpop.f32.mrf.mxu1 }
 0x450   :  { %v525_v9 = vsel %vm190_vm14, %v512_v8, -inf }
 0x451   :  { %526 = vmax.xlane.f32.xlu2 %v525_v9 }
 0x452   :  { %v390_v10 = vpop.f32.mrf.mxu0 }
 0x453   :  { %v417_v11 = vpack.c.bf16 %v390_v10, %v390_v10 }
 0x455   :  { %422 = vst.msk [vmem:[#allocation2 + $0x8] sm:$0xf] %vm419_vm1, %v417_v11 }
 0x457   :  { %v514_v12 = vpop.f32.mrf.mxu1 }
 0x45a   :  { %v392_v13 = vpop.f32.mrf.mxu0 }
 0x462   :  { %v411_v15 = vpop.f32.mrf.mxu0 }
 0x463   :  { %v418_v16 = vpack.c.bf16 %v411_v15, %v411_v15 }
 0x465   :  { %423 = vst.msk [vmem:[#allocation2 + $0xc] sm:$0xf] %vm419_vm1, %v418_v16 }
 0x469   :  { %675 = vrot.lane.b32.xlu2 %v1966_v26, %s1849_s26 }
 0x46a   :  { %v413_v17 = vpop.f32.mrf.mxu0 }
 0x471   :  { %606 = vrot.lane.b32.xlu2 %v1972_v35, %s1848_s25 }
 0x472   :  { %v489_v18 = vpop.f32.mrf.mxu0 }
 0x473   :  { %v522_v20 = vsel %vm190_vm14, %v489_v18, -inf }
 0x474   :  { %523 = vmax.xlane.f32.xlu1 %v522_v20 }
 0x479   :  { %627 = vrot.lane.b32.xlu2 %v1975_v40, %s1848_s25 }
 0x47a   :  { %v491_v21 = vpop.f32.mrf.mxu0 }
 0x481   :  { %721 = vrot.lane.b32.xlu2 %v1972_v35, %s1849_s26 }
 0x489   :  { %744 = vrot.lane.b32.xlu2 %v1975_v40, %s1849_s26 }
 0x491   :  { %742 = vrot.lane.b32.xlu2 %v1975_v40, %s1850_s27 }
 0x49c   :  { %v518_v23 = vpop.xlane.xlu0 %517 }
 0x49d   :  { %v528_v24 = vsub.f32 %v443_v2, %v518_v23  ;;  %v521_v25 = vpop.xlane.xlu1 %520 }
 0x49e   :  { %v529_v28 = vsub.f32 %v466_v3, %v521_v25 }
 0x49f   :  { %v532_v27 = vmul.f32 1.442695, %v528_v24 }
 0x4a0   :  { %v534_v29 = vmul.f32 1.442695, %v529_v28 }
 0x4a1   :  { %1741 = vpow2.f32 %v532_v27 }
 0x4a2   :  { %1743 = vpow2.f32 %v534_v29 }
 0x4a7   :  { %v1742_v19 = vpop.eup %1741 }
 0x4a8   :  { %v540_v31 = vsel %vm190_vm14, %v1742_v19, 0.0  ;;  %v1744_v32 = vpop.eup %1743 }
 0x4a9   :  { %541 = vadd.xlane.f32.xlu1 %v540_v31  ;;  %v543_v36 = vsel %vm190_vm14, %v1744_v32, 0.0 }
 0x4af   :  { %v586_v33 = vpop.permute.xlu0 %585 }
 0x4b0   :  { %v591_v34 = vsel %vm335_vm15, %v586_v33, 0 }
 0x4b1   :  { %544 = vadd.xlane.f32.xlu1 %v543_v36  ;;  %600 = vmatpush.bf16.msrb.mxu3 %v591_v34 }
 0x4b5   :  { %713 = vmatpush.bf16.xpose.msra.mxu3 %v704_v37 }
 0x4b7   :  { %v674_v3 = vpop.permute.xlu0 %673 }
 0x4c4   :  { %v527_v38 = vpop.xlane.xlu2 %526 }
 0x4c5   :  { %v531_v46 = vsub.f32 %v512_v8, %v527_v38 }
 0x4c7   :  { %v538_v49 = vmul.f32 1.442695, %v531_v46 }
 0x4c9   :  { %1745 = vpow2.f32 %v538_v49 }
 0x4ca   :  { %696 = vrot.lane.b32.xlu1 %v1969_v30, %s1850_s27 }
 0x4cc   :  { %v676_v39 = vpop.permute.xlu2 %675 }
 0x4cd   :  { %v681_v41 = vsel %vm190_vm14, %v676_v39, 0 }
 0x4ce   :  { %690 = vmatpush.bf16.xpose.msra.mxu2 %v681_v41 }
 0x4cf   :  { %v1746_v55 = vpop.eup %1745 }
 0x4d0   :  { %v549_v58 = vsel %vm190_vm14, %v1746_v55, 0.0 }
 0x4d4   :  { %v607_v42 = vpop.permute.xlu2 %606 }
 0x4d5   :  { %v612_v43 = vsel %vm335_vm15, %v607_v42, 0 }
 0x4d6   :  { %621 = vmatpush.bf16.msrb.mxu0 %v612_v43 }
 0x4dc   :  { %v628_v44 = vpop.permute.xlu2 %627 }
 0x4dd   :  { %v633_v45 = vsel %vm335_vm15, %v628_v44, 0 }
 0x4de   :  { %642 = vmatpush.bf16.msra.mxu1 %v633_v45 }
 0x4e4   :  { %v722_v47 = vpop.permute.xlu2 %721 }
 0x4e5   :  { %v727_v48 = vsel %vm190_vm14, %v722_v47, 0 }
 0x4e6   :  { %736 = vmatpush.bf16.xpose.msra.mxu0 %v727_v48 }
 0x4e7   :  { %v524_v50 = vpop.xlane.xlu1 %523 }
 0x4e8   :  { %v530_v51 = vsub.f32 %v489_v18, %v524_v50 }
 0x4ea   :  { %v536_v52 = vmul.f32 1.442695, %v530_v51 }
 0x4ec   :  { %1747 = vpow2.f32 %v536_v52  ;;  %v745_v53 = vpop.permute.xlu2 %744 }
 0x4ed   :  { %v750_v54 = vsel %vm190_vm14, %v745_v53, 0 }
 0x4ee   :  { %759 = vmatpush.bf16.xpose.msrb.mxu1 %v750_v54 }
 0x4f2   :  { %v1748_v56 = vpop.eup %1747 }
 0x4f3   :  { %v546_v57 = vsel %vm190_vm14, %v1748_v56, 0.0 }
 0x4f4   :  { %547 = vadd.xlane.f32.xlu0 %v546_v57  ;;  %550 = vadd.xlane.f32.xlu1 %v549_v58  ;;  %v743_v15 = vpop.permute.xlu2 %742 }
 0x508   :  { %719 = vrot.lane.b32.xlu0 %v1972_v35, %s1850_s27 }
 0x51c   :  { %v542_v59 = vpop.xlane.xlu1 %541 }
 0x51d   :  { %1749 = vrcp.f32 %v542_v59 }
 0x523   :  { %v1750_v60 = vpop.eup %1749 }
 0x524   :  { %v556_v61 = vmul.f32 %v1750_v60, %v1742_v19  ;;  %v545_v62 = vpop.xlane.xlu1 %544 }
 0x525   :  { %1751 = vrcp.f32 %v545_v62 }
 0x526   :  { %v560_v63 = vpack.c.bf16 %v556_v61, %v556_v61 }
 0x528   :  { %1594 = vmatmul.msk.bf16.vlgmr.msrb.gmra.mxu2 %vm190_vm14, %v560_v63 }
 0x52b   :  { %v1752_v0 = vpop.eup %1751 }
 0x52c   :  { %v557_v1 = vmul.f32 %v1752_v0, %v1744_v32 }
 0x52e   :  { %v561_v2 = vpack.c.bf16 %v557_v1, %v557_v1 }
 0x530   :  { %1595 = vmatmul.msk.bf16.vlgmr.msrb.gmra.mxu3 %vm190_vm14, %v561_v2 }
 0x538   :  { %1598 = vmatmul.msk.bf16.vlgmr.msra.gmra.mxu2 %vm190_vm14, %v674_v3 }
 0x53c   :  { %v697_v4 = vpop.permute.xlu1 %696 }
 0x540   :  { %1599 = vmatmul.msk.bf16.vlgmr.msra.gmra.mxu3 %vm190_vm14, %v697_v4 }
 0x567   :  { %v548_v5 = vpop.xlane.xlu0 %547  ;;  %v551_v6 = vpop.xlane.xlu1 %550 }
 0x568   :  { %1753 = vrcp.f32 %v548_v5 }
 0x569   :  { %1755 = vrcp.f32 %v551_v6 }
 0x56e   :  { %v1754_v7 = vpop.eup %1753 }
 0x56f   :  { %v1756_v8 = vpop.eup %1755  ;;  %v558_v9 = vmul.f32 %v1754_v7, %v1748_v56 }
 0x570   :  { %v559_v10 = vmul.f32 %v1756_v8, %v1746_v55 }
 0x571   :  { %v562_v11 = vpack.c.bf16 %v558_v9, %v558_v9 }
 0x572   :  { %v563_v12 = vpack.c.bf16 %v559_v10, %v559_v10 }
 0x573   :  { %1596 = vmatmul.msk.bf16.vlgmr.msrb.gmra.mxu0 %vm190_vm14, %v562_v11 }
 0x574   :  { %1597 = vmatmul.msk.bf16.vlgmr.msra.gmra.mxu1 %vm190_vm14, %v563_v12 }
 0x57a   :  { %v720_v13 = vpop.permute.xlu0 %719 }
 0x583   :  { %1600 = vmatmul.msk.bf16.vlgmr.msra.gmra.mxu0 %vm190_vm14, %v720_v13 }
 0x584   :  { %1601 = vmatmul.msk.bf16.vlgmr.msrb.gmra.mxu1 %vm190_vm14, %v743_v15 }
 0x5ab   :  { %v2082_v16 = vpop.f32.mrf.mxu2 }
 0x5b3   :  { %v583_v17 = vpop.f32.mrf.mxu2  ;;  %v2084_v18 = vpop.f32.mrf.mxu3 }
 0x5bb   :  { %v604_v20 = vpop.f32.mrf.mxu3  ;;  %v692_v21 = vpop.f32.mrf.mxu2 }
 0x5bc   :  { %v765_v22 = vsel %vm190_vm14, %v692_v21, -inf }
 0x5bd   :  { %766 = vmax.xlane.f32.xlu1 %v765_v22 }
 0x5c3   :  { %v694_v23 = vpop.f32.mrf.mxu2  ;;  %v715_v24 = vpop.f32.mrf.mxu3 }
 0x5c4   :  { %v768_v25 = vsel %vm190_vm14, %v715_v24, -inf }
 0x5c5   :  { %769 = vmax.xlane.f32.xlu2 %v768_v25 }
 0x5cb   :  { %v717_v27 = vpop.f32.mrf.mxu3 }
 0x5d6   :  { %813 = vrot.lane.b32.xlu1 %v1966_v26, %s1851_s28 }
 0x5dd   :  { %834 = vrot.lane.b32.xlu2 %v1969_v30, %s1851_s28 }
 0x5f0   :  { %v2090_v28 = vpop.f32.mrf.mxu0 }
 0x5f1   :  { %v2092_v29 = vpop.f32.mrf.mxu1 }
 0x5f8   :  { %v625_v19 = vpop.f32.mrf.mxu0 }
 0x5f9   :  { %v646_v31 = vpop.f32.mrf.mxu1 }
 0x600   :  { %v738_v32 = vpop.f32.mrf.mxu0 }
 0x601   :  { %v761_v33 = vpop.f32.mrf.mxu1  ;;  %v771_v34 = vsel %vm190_vm14, %v738_v32, -inf }
 0x602   :  { %772 = vmax.xlane.f32.xlu1 %v771_v34  ;;  %v774_v36 = vsel %vm190_vm14, %v761_v33, -inf }
 0x603   :  { %775 = vmax.xlane.f32.xlu0 %v774_v36 }
 0x608   :  { %v740_v37 = vpop.f32.mrf.mxu0 }
 0x609   :  { %v763_v38 = vpop.f32.mrf.mxu1 }
 0x617   :  { %924 = vrot.lane.b32.xlu0 %v1966_v26, %s1852_s29 }
 0x61b   :  { %947 = vrot.lane.b32.xlu1 %v1969_v30, %s1852_s29 }
 0x61f   :  { %922 = vrot.lane.b32.xlu0 %v1966_v26, %s1853_s30 }
 0x627   :  { %945 = vrot.lane.b32.xlu0 %v1969_v30, %s1853_s30 }
 0x62f   :  { %855 = vrot.lane.b32.xlu0 %v1972_v35, %s1851_s28 }
 0x630   :  { %v767_v39 = vpop.xlane.xlu1 %766 }
 0x631   :  { %v777_v41 = vsub.f32 %v692_v21, %v767_v39 }
 0x633   :  { %v781_v42 = vmul.f32 1.442695, %v777_v41 }
 0x635   :  { %1757 = vpow2.f32 %v781_v42 }
 0x637   :  { %876 = vrot.lane.b32.xlu0 %v1975_v40, %s1851_s28 }
 0x638   :  { %v770_v43 = vpop.xlane.xlu2 %769 }
 0x639   :  { %v778_v44 = vsub.f32 %v715_v24, %v770_v43 }
 0x63b   :  { %v783_v45 = vmul.f32 1.442695, %v778_v44  ;;  %v1758_v47 = vpop.eup %1757 }
 0x63c   :  { %v789_v49 = vsel %vm190_vm14, %v1758_v47, 0.0 }
 0x63d   :  { %1759 = vpow2.f32 %v783_v45 }
 0x63f   :  { %970 = vrot.lane.b32.xlu0 %v1972_v35, %s1852_s29 }
 0x640   :  { %v835_v46 = vpop.permute.xlu2 %834 }
 0x641   :  { %v840_v48 = vsel %vm335_vm15, %v835_v46, 0 }
 0x642   :  { %849 = vmatpush.bf16.msrb.mxu3 %v840_v48 }
 0x643   :  { %v1760_v51 = vpop.eup %1759 }
 0x644   :  { %v792_v53 = vsel %vm190_vm14, %v1760_v51, 0.0 }
 0x645   :  { %790 = vadd.xlane.f32.xlu1 %v789_v49 }
 0x647   :  { %991 = vrot.lane.b32.xlu0 %v1975_v40, %s1853_s30 }
 0x648   :  { %v814_v50 = vpop.permute.xlu1 %813 }
 0x649   :  { %v819_v52 = vsel %vm335_vm15, %v814_v50, 0 }
 0x64a   :  { %828 = vmatpush.bf16.msrb.mxu2 %v819_v52 }
 0x64d   :  { %793 = vadd.xlane.f32.xlu1 %v792_v53 }
 0x675   :  { %v773_v54 = vpop.xlane.xlu1 %772 }
 0x676   :  { %v779_v55 = vsub.f32 %v738_v32, %v773_v54  ;;  %v776_v56 = vpop.xlane.xlu0 %775 }
 0x677   :  { %v780_v57 = vsub.f32 %v761_v33, %v776_v56 }
 0x678   :  { %v785_v58 = vmul.f32 1.442695, %v779_v55  ;;  %v649_v55 = vpack.c.bf16 %v2084_v18, %v2084_v18 }
 0x679   :  { %v787_v59 = vmul.f32 1.442695, %v780_v57 }
 0x67a   :  { %1761 = vpow2.f32 %v785_v58 }
 0x67b   :  { %1763 = vpow2.f32 %v787_v59 }
 0x680   :  { %v1762_v60 = vpop.eup %1761 }
 0x681   :  { %v1764_v61 = vpop.eup %1763  ;;  %v795_v62 = vsel %vm190_vm14, %v1762_v60, 0.0 }
 0x682   :  { %796 = vadd.xlane.f32.xlu1 %v795_v62  ;;  %v798_v63 = vsel %vm190_vm14, %v1764_v61, 0.0 }
 0x683   :  { %799 = vadd.xlane.f32.xlu2 %v798_v63 }
 0x689   :  { %v925_v0 = vpop.permute.xlu0 %924 }
 0x68a   :  { %v930_v1 = vsel %vm190_vm14, %v925_v0, 0 }
 0x68b   :  { %939 = vmatpush.bf16.xpose.msra.mxu2 %v930_v1 }
 0x68d   :  { %v948_v2 = vpop.permute.xlu1 %947 }
 0x68e   :  { %v953_v3 = vsel %vm190_vm14, %v948_v2, 0 }
 0x68f   :  { %962 = vmatpush.bf16.xpose.msra.mxu3 %v953_v3 }
 0x691   :  { %v923_v4 = vpop.permute.xlu0 %922 }
 0x699   :  { %v946_v5 = vpop.permute.xlu0 %945 }
 0x69b   :  { %968 = vrot.lane.b32.xlu2 %v1972_v35, %s1853_s30  ;;  %993 = vrot.lane.b32.xlu1 %v1975_v40, %s1852_s29 }
 0x6a1   :  { %v856_v6 = vpop.permute.xlu0 %855 }
 0x6a2   :  { %v861_v7 = vsel %vm335_vm15, %v856_v6, 0 }
 0x6a3   :  { %870 = vmatpush.bf16.msrb.mxu0 %v861_v7 }
 0x6a9   :  { %v877_v8 = vpop.permute.xlu0 %876 }
 0x6aa   :  { %v882_v9 = vsel %vm335_vm15, %v877_v8, 0 }
 0x6ab   :  { %891 = vmatpush.bf16.msra.mxu1 %v882_v9 }
 0x6b1   :  { %v971_v10 = vpop.permute.xlu0 %970 }
 0x6b2   :  { %v976_v11 = vsel %vm190_vm14, %v971_v10, 0 }
 0x6b3   :  { %985 = vmatpush.bf16.xpose.msra.mxu0 %v976_v11 }
 0x6b8   :  { %v791_v12 = vpop.xlane.xlu1 %790 }
 0x6b9   :  { %1765 = vrcp.f32 %v791_v12  ;;  %v992_v39 = vpop.permute.xlu0 %991 }
 0x6bf   :  { %v1766_v13 = vpop.eup %1765 }
 0x6c0   :  { %v805_v15 = vmul.f32 %v1766_v13, %v1758_v47  ;;  %v794_v17 = vpop.xlane.xlu1 %793 }
 0x6c1   :  { %1767 = vrcp.f32 %v794_v17 }
 0x6c2   :  { %v809_v20 = vpack.c.bf16 %v805_v15, %v805_v15 }
 0x6c4   :  { %1602 = vmatmul.msk.bf16.vlgmr.msrb.gmra.mxu2 %vm190_vm14, %v809_v20 }
 0x6c7   :  { %v1768_v21 = vpop.eup %1767 }
 0x6c8   :  { %v806_v22 = vmul.f32 %v1768_v21, %v1760_v51 }
 0x6ca   :  { %v810_v23 = vpack.c.bf16 %v806_v22, %v806_v22 }
 0x6cc   :  { %1603 = vmatmul.msk.bf16.vlgmr.msrb.gmra.mxu3 %vm190_vm14, %v810_v23 }
 0x6d4   :  { %1606 = vmatmul.msk.bf16.vlgmr.msra.gmra.mxu2 %vm190_vm14, %v923_v4 }
 0x6dc   :  { %1607 = vmatmul.msk.bf16.vlgmr.msra.gmra.mxu3 %vm190_vm14, %v946_v5 }
 0x6f5   :  { %v797_v24 = vpop.xlane.xlu1 %796 }
 0x6f6   :  { %1769 = vrcp.f32 %v797_v24  ;;  %v800_v25 = vpop.xlane.xlu2 %799 }
 0x6f7   :  { %1771 = vrcp.f32 %v800_v25 }
 0x6fc   :  { %v1770_v27 = vpop.eup %1769 }
 0x6fd   :  { %v1772_v19 = vpop.eup %1771  ;;  %v807_v31 = vmul.f32 %v1770_v27, %v1762_v60  ;;  %v650_v60 = vpack.c.bf16 %v2090_v28, %v2090_v28  ;;  %v648_v28 = vpack.c.bf16 %v2082_v16, %v2082_v16 }
 0x6fe   :  { %v808_v32 = vmul.f32 %v1772_v19, %v1764_v61  ;;  %v969_v38 = vpop.permute.xlu2 %968 }
 0x6ff   :  { %v811_v33 = vpack.c.bf16 %v807_v31, %v807_v31 }
 0x700   :  { %v812_v34 = vpack.c.bf16 %v808_v32, %v808_v32 }
 0x701   :  { %1604 = vmatmul.msk.bf16.vlgmr.msrb.gmra.mxu0 %vm190_vm14, %v811_v33 }
 0x702   :  { %1605 = vmatmul.msk.bf16.vlgmr.msra.gmra.mxu1 %vm190_vm14, %v812_v34 }
 0x70d   :  { %v994_v36 = vpop.permute.xlu1 %993 }
 0x70e   :  { %v999_v37 = vsel %vm190_vm14, %v994_v36, 0 }
 0x70f   :  { %1008 = vmatpush.bf16.xpose.msrb.mxu1 %v999_v37 }
 0x711   :  { %1608 = vmatmul.msk.bf16.vlgmr.msra.gmra.mxu0 %vm190_vm14, %v969_v38 }
 0x716   :  { %1609 = vmatmul.msk.bf16.vlgmr.msrb.gmra.mxu1 %vm190_vm14, %v992_v39 }
 0x747   :  { %v830_v41 = vpop.f32.mrf.mxu2 }
 0x748   :  { %v897_v8 = vpack.c.bf16 %v830_v41, %v830_v41 }
 0x74f   :  { %v832_v42 = vpop.f32.mrf.mxu2  ;;  %v851_v43 = vpop.f32.mrf.mxu3 }
 0x750   :  { %v898_v58 = vpack.c.bf16 %v851_v43, %v851_v43 }
 0x757   :  { %v853_v44 = vpop.f32.mrf.mxu3  ;;  %v941_v45 = vpop.f32.mrf.mxu2 }
 0x758   :  { %v1014_v46 = vsel %vm190_vm14, %v941_v45, -inf }
 0x759   :  { %1015 = vmax.xlane.f32.xlu0 %v1014_v46 }
 0x75f   :  { %v943_v47 = vpop.f32.mrf.mxu2  ;;  %v964_v48 = vpop.f32.mrf.mxu3 }
 0x760   :  { %v1017_v49 = vsel %vm190_vm14, %v964_v48, -inf }
 0x761   :  { %1018 = vmax.xlane.f32.xlu1 %v1017_v49 }
 0x767   :  { %v966_v50 = vpop.f32.mrf.mxu3 }
 0x77a   :  { %1062 = vrot.lane.b32.xlu1 %v1966_v26, %s1854_s10 }
 0x77e   :  { %v2138_v51 = vpop.f32.mrf.mxu0 }
 0x77f   :  { %v893_v52 = vpop.f32.mrf.mxu1 }
 0x780   :  { %v900_v61 = vpack.c.bf16 %v893_v52, %v893_v52 }
 0x782   :  { %1125 = vrot.lane.b32.xlu1 %v1975_v40, %s1854_s10 }
 0x786   :  { %v874_v53 = vpop.f32.mrf.mxu0 }
 0x787   :  { %v895_v54 = vpop.f32.mrf.mxu1 }
 0x78a   :  { %658 = vrot.lane.b32.xlu1 %v649_v55, %s1855_s11 }
 0x78e   :  { %v987_v56 = vpop.f32.mrf.mxu0 }
 0x78f   :  { %v1020_v57 = vsel %vm190_vm14, %v987_v56, -inf }
 0x790   :  { %1021 = vmax.xlane.f32.xlu2 %v1020_v57 }
 0x792   :  { %907 = vrot.lane.b32.xlu1 %v898_v58, %s1856_s12  ;;  %v651_v58 = vpack.c.bf16 %v2092_v29, %v2092_v29 }
 0x793   :  { %v1010_v26 = vpop.f32.mrf.mxu1 }
 0x794   :  { %v1023_v59 = vsel %vm190_vm14, %v1010_v26, -inf }
 0x795   :  { %1024 = vmax.xlane.f32.xlu0 %v1023_v59 }
 0x796   :  { %v989_v40 = vpop.f32.mrf.mxu0 }
 0x79a   :  { %660 = vrot.lane.b32.xlu1 %v650_v60, %s1855_s11 }
 0x79b   :  { %v1012_v18 = vpop.f32.mrf.mxu1 }
 0x7a2   :  { %911 = vrot.lane.b32.xlu1 %v900_v61, %s1856_s12 }
 0x7cc   :  { %v1016_v62 = vpop.xlane.xlu0 %1015 }
 0x7cd   :  { %v1026_v63 = vsub.f32 %v941_v45, %v1016_v62 }
 0x7cf   :  { %v1030_v0 = vmul.f32 1.442695, %v1026_v63  ;;  %v899_v63 = vpack.c.bf16 %v2138_v51, %v2138_v51  ;;  %v1682_v51 = vld [vmem:[%s2312_s3] sm:$0xff] }
 0x7d1   :  { %1773 = vpow2.f32 %v1030_v0 }
 0x7d4   :  { %v1019_v3 = vpop.xlane.xlu1 %1018 }
 0x7d5   :  { %v1027_v16 = vsub.f32 %v964_v48, %v1019_v3 }
 0x7d7   :  { %v1774_v1 = vpop.eup %1773  ;;  %v1032_v15 = vmul.f32 1.442695, %v1027_v16  ;;  %v1813_v16 = vld [vmem:[%s2309_s0] sm:$0xff] }
 0x7d8   :  { %v1038_v2 = vsel %vm190_vm14, %v1774_v1, 0.0 }
 0x7d9   :  { %1039 = vadd.xlane.f32.xlu0 %v1038_v2 }
 0x7ec   :  { %v1063_v4 = vpop.permute.xlu1 %1062 }
 0x7ed   :  { %v1068_v5 = vsel %vm335_vm15, %v1063_v4, 0  ;;  %1083 = vrot.lane.b32.xlu0 %v1969_v30, %s1854_s10  ;;  %v1683_v4 = vld [vmem:[%s2312_s3 + $0x8] sm:$0xff] }
 0x7ee   :  { %1077 = vmatpush.bf16.msrb.mxu2 %v1068_v5 }
 0x7f2   :  { %1217 = vmatpush.bf16.msra.mxu2 %v1683_v4 }
 0x7f4   :  { %v1126_v6 = vpop.permute.xlu1 %1125 }
 0x7f5   :  { %v1131_v7 = vsel %vm335_vm15, %v1126_v6, 0  ;;  %656 = vrot.lane.b32.xlu0 %v648_v28, %s1855_s11 }
 0x7f6   :  { %1140 = vmatpush.bf16.msra.mxu1 %v1131_v7  ;;  %1218 = vmatpush.bf16.msra.mxu2 %v1682_v51 }
 0x7fc   :  { %v659_v9 = vpop.permute.xlu1 %658 }
 0x7fd   :  { %670 = vst.msk [vmem:[#allocation2 + $0x4] sm:$0xf] %vm668_vm2, %v659_v9  ;;  %905 = vrot.lane.b32.xlu0 %v897_v8, %s1856_s12 }
 0x803   :  { %v1022_v17 = vpop.xlane.xlu2 %1021 }
 0x804   :  { %v908_v10 = vpop.permute.xlu1 %907  ;;  %v1028_v21 = vsub.f32 %v987_v56, %v1022_v17 }
 0x805   :  { %919 = vst.msk [vmem:[#allocation2 + $0x4] sm:$0xf] %vm917_vm3, %v908_v10  ;;  %v1712_v10 = vld [vmem:[%s2313_s4] ss:$0 sm:$0xff]  ;;  %s1858_s4 = smov [#allocation3]  }
 0x806   :  { %v1034_v23 = vmul.f32 1.442695, %v1028_v21 }
 0x808   :  { %v1025_v30 = vpop.xlane.xlu0 %1024 }
 0x809   :  { %v1029_v11 = vsub.f32 %v1010_v26, %v1025_v30 }
 0x80b   :  { %v1036_v12 = vmul.f32 1.442695, %v1029_v11 }
 0x80c   :  { %v661_v13 = vpop.permute.xlu1 %660 }
 0x80d   :  { %1775 = vpow2.f32 %v1036_v12  ;;  %671 = vst.msk [vmem:[#allocation2 + $0x8] sm:$0xf] %vm668_vm2, %v661_v13 }
 0x80e   :  { %1777 = vpow2.f32 %v1032_v15 }
 0x80f   :  { %1779 = vpow2.f32 %v1034_v23 }
 0x813   :  { %v1776_v20 = vpop.eup %1775 }
 0x814   :  { %v1047_v22 = vsel %vm190_vm14, %v1776_v20, 0.0  ;;  %v1778_v24 = vpop.eup %1777  ;;  %v912_v3 = vpop.permute.xlu1 %911 }
 0x815   :  { %1048 = vadd.xlane.f32.xlu2 %v1047_v22  ;;  %v1041_v25 = vsel %vm190_vm14, %v1778_v24, 0.0  ;;  %v1780_v27 = vpop.eup %1779 }
 0x816   :  { %v1044_v19 = vsel %vm190_vm14, %v1780_v27, 0.0 }
 0x81d   :  { %1042 = vadd.xlane.f32.xlu2 %v1041_v25  ;;  %v1815_v25 = vld [vmem:[%s2309_s0 + $0x10] sm:$0xff] }
 0x825   :  { %1045 = vadd.xlane.f32.xlu2 %v1044_v19 }
 0x83d   :  { %1104 = vrot.lane.b32.xlu2 %v1972_v35, %s1854_s10 }
 0x84c   :  { %v1040_v31 = vpop.xlane.xlu0 %1039 }
 0x84d   :  { %1781 = vrcp.f32 %v1040_v31 }
 0x853   :  { %v1782_v32 = vpop.eup %1781 }
 0x854   :  { %v1054_v33 = vmul.f32 %v1782_v32, %v1774_v1 }
 0x856   :  { %v1058_v34 = vpack.c.bf16 %v1054_v33, %v1054_v33  ;;  %v1816_v33 = vld [vmem:[%s2309_s0 + $0x18] sm:$0xff] }
 0x858   :  { %1610 = vmatmul.msk.bf16.vlgmr.msrb.gmra.mxu2 %vm190_vm14, %v1058_v34 }
 0x85f   :  { %v1084_v36 = vpop.permute.xlu0 %1083 }
 0x860   :  { %v1089_v37 = vsel %vm335_vm15, %v1084_v36, 0 }
 0x861   :  { %1098 = vmatpush.bf16.msrb.mxu3 %v1089_v37 }
 0x867   :  { %v657_v38 = vpop.permute.xlu0 %656 }
 0x868   :  { %669 = vst.msk [vmem:[#allocation2] sm:$0xf] %vm668_vm2, %v657_v38 }
 0x86f   :  { %v906_v39 = vpop.permute.xlu0 %905 }
 0x870   :  { %918 = vst.msk [vmem:[#allocation2] sm:$0xf] %vm917_vm3, %v906_v39 }
 0x888   :  { %v1049_v41 = vpop.xlane.xlu2 %1048 }
 0x889   :  { %1783 = vrcp.f32 %v1049_v41 }
 0x88f   :  { %v1784_v35 = vpop.eup %1783 }
 0x890   :  { %v1057_v42 = vmul.f32 %v1784_v35, %v1776_v20  ;;  %v1043_v43 = vpop.xlane.xlu2 %1042  ;;  %v1814_v20 = vld [vmem:[%s2309_s0 + $0x8] sm:$0xff]  ;;  %s1859_s0 = smov 128  }
 0x891   :  { %1785 = vrcp.f32 %v1043_v43 }
 0x892   :  { %v1061_v44 = vpack.c.bf16 %v1057_v42, %v1057_v42 }
 0x894   :  { %1613 = vmatmul.msk.bf16.vlgmr.msra.gmra.mxu1 %vm190_vm14, %v1061_v44 }
 0x897   :  { %v1786_v45 = vpop.eup %1785 }
 0x898   :  { %v1055_v46 = vmul.f32 %v1786_v45, %v1778_v24  ;;  %v1046_v47 = vpop.xlane.xlu2 %1045 }
 0x899   :  { %1787 = vrcp.f32 %v1046_v47 }
 0x89a   :  { %v1059_v48 = vpack.c.bf16 %v1055_v46, %v1055_v46 }
 0x89c   :  { %1611 = vmatmul.msk.bf16.vlgmr.msrb.gmra.mxu3 %vm190_vm14, %v1059_v48 }
 0x89f   :  { %v1788_v49 = vpop.eup %1787 }
 0x8a0   :  { %v1056_v50 = vmul.f32 %v1788_v49, %v1780_v27  ;;  %v1105_v52 = vpop.permute.xlu2 %1104 }
 0x8a1   :  { %v1110_v53 = vsel %vm335_vm15, %v1105_v52, 0 }
 0x8a2   :  { %v1060_v54 = vpack.c.bf16 %v1056_v50, %v1056_v50  ;;  %1119 = vmatpush.bf16.msrb.mxu0 %v1110_v53 }
 0x8a5   :  { %1612 = vmatmul.msk.bf16.vlgmr.msrb.gmra.mxu0 %vm190_vm14, %v1060_v54 }
 0x8db   :  { %v1079_v55 = vpop.f32.mrf.mxu2 }
 0x8dc   :  { %v1146_v56 = vpack.c.bf16 %v1079_v55, %v1079_v55 }
 0x8de   :  { %1154 = vrot.lane.b32.xlu0 %v1146_v56, %s1857_s13 }
 0x8e3   :  { %v1081_v57 = vpop.f32.mrf.mxu2 }
 0x8e6   :  { %662 = vrot.lane.b32.xlu0 %v651_v58, %s1855_s11  ;;  %v1685_v58 = vld [vmem:[%s2314_s5 + $0x8] sm:$0xff] }
 0x8e7   :  { %1364 = vmatpush.bf16.msra.mxu3 %v1685_v58 }
 0x911   :  { %v1142_v26 = vpop.f32.mrf.mxu1 }
 0x912   :  { %v1149_v1 = vpack.c.bf16 %v1142_v26, %v1142_v26  ;;  %v1684_v26 = vld [vmem:[%s2314_s5] sm:$0xff] }
 0x913   :  { %1365 = vmatpush.bf16.msra.mxu3 %v1684_v26 }
 0x919   :  { %v1144_v59 = vpop.f32.mrf.mxu1 }
 0x91f   :  { %v1100_v40 = vpop.f32.mrf.mxu3 }
 0x920   :  { %v1147_v60 = vpack.c.bf16 %v1100_v40, %v1100_v40 }
 0x922   :  { %v1121_v18 = vpop.f32.mrf.mxu0  ;;  %1156 = vrot.lane.b32.xlu2 %v1147_v60, %s1857_s13 }
 0x923   :  { %v1148_v61 = vpack.c.bf16 %v1121_v18, %v1121_v18 }
 0x925   :  { %1158 = vrot.lane.b32.xlu0 %v1148_v61, %s1857_s13 }
 0x927   :  { %v1102_v62 = vpop.f32.mrf.mxu3 }
 0x92a   :  { %v1123_v0 = vpop.f32.mrf.mxu0  ;;  %909 = vrot.lane.b32.xlu2 %v899_v63, %s1856_s12 }
 0x932   :  { %1160 = vrot.lane.b32.xlu2 %v1149_v1, %s1857_s13 }
 0x950   :  { %v1155_v29 = vpop.permute.xlu0 %1154 }
 0x951   :  { %1167 = vst.msk [vmem:[#allocation2] sm:$0xf] %vm1166_vm4, %v1155_v29 }
 0x958   :  { %v663_v2 = vpop.permute.xlu0 %662 }
 0x959   :  { %672 = vst.msk [vmem:[#allocation2 + $0xc] sm:$0xf] %vm668_vm2, %v663_v2 }
 0x95a   :  { %921 = vst.msk [vmem:[#allocation2 + $0xc] sm:$0xf] %vm917_vm3, %v912_v3 }
 0x97c   :  { %v1157_v5 = vpop.permute.xlu2 %1156 }
 0x97d   :  { %1168 = vst.msk [vmem:[#allocation2 + $0x4] sm:$0xf] %vm1166_vm4, %v1157_v5 }
 0x984   :  { %v910_v28 = vpop.permute.xlu2 %909  ;;  %v1680_v6 = vld [vmem:[#allocation2] sm:$0xff] }
 0x985   :  { %920 = vst.msk [vmem:[#allocation2 + $0x8] sm:$0xf] %vm917_vm3, %v910_v28  ;;  %1630 = vmatmul.msk.bf16.vlgmr.msra.gmra.mxu2 %vm38_vm0, %v1680_v6 }
 0x98c   :  { %v1161_v7 = vpop.permute.xlu2 %1160 }
 0x98d   :  { %1170 = vst.msk [vmem:[#allocation2 + $0xc] sm:$0xf] %vm1166_vm4, %v1161_v7 }
 0x997   :  { %v1159_v8 = vpop.permute.xlu0 %1158 }
 0x998   :  { %1169 = vst.msk [vmem:[#allocation2 + $0x8] sm:$0xf] %vm1166_vm4, %v1159_v8 }
 0x99f   :  { %v1681_v9 = vld [vmem:[#allocation2 + $0x8] sm:$0xff] }
 0x9a0   :  { %1631 = vmatmul.msk.bf16.gmra.mxu2 %vm38_vm0, %v1681_v9 }
 0xa08   :  { %v1220_v30 = vpop.f32.mrf.mxu2 }
 0xa09   :  { %v1221_v11 = vadd.f32 %v1712_v10, %v1220_v30 }
 0xa0b   :  { %v2204_v12 = vadd.f32 %v1813_v16, %v1221_v11 }
 0xa0d   :  { %v1234_v13 = vsel %vm38_vm0, %v2204_v12, 0.0 }
 0xa0e   :  { %1235 = vadd.xlane.f32.xlu1 %v1234_v13 }
 0xa10   :  { %v1222_v15 = vpop.f32.mrf.mxu2 }
 0xa11   :  { %v1223_v17 = vadd.f32 %v1712_v10, %v1222_v15 }
 0xa13   :  { %v2211_v21 = vadd.f32 %v1814_v20, %v1223_v17 }
 0xa15   :  { %v1237_v22 = vsel %vm38_vm0, %v2211_v21, 0.0 }
 0xa16   :  { %1238 = vadd.xlane.f32.xlu0 %v1237_v22 }
 0xa23   :  { %v1225_v23 = vpop.f32.mrf.mxu2 }
 0xa24   :  { %v1226_v24 = vadd.f32 %v1712_v10, %v1225_v23 }
 0xa26   :  { %v2218_v27 = vadd.f32 %v1815_v25, %v1226_v24 }
 0xa28   :  { %v1240_v19 = vsel %vm38_vm0, %v2218_v27, 0.0 }
 0xa29   :  { %1241 = vadd.xlane.f32.xlu2 %v1240_v19 }
 0xa2b   :  { %v1227_v31 = vpop.f32.mrf.mxu2 }
 0xa2c   :  { %v1228_v32 = vadd.f32 %v1712_v10, %v1227_v31 }
 0xa2e   :  { %v2225_v34 = vadd.f32 %v1816_v33, %v1228_v32 }
 0xa30   :  { %v1243_v36 = vsel %vm38_vm0, %v2225_v34, 0.0 }
 0xa31   :  { %1244 = vadd.xlane.f32.xlu1 %v1243_v36 }
 0xa81   :  { %v1236_v37 = vpop.xlane.xlu1 %1235 }
 0xa82   :  { %v1246_v38 = vmul.f32 %v1236_v37, %v1926_v14 }
 0xa84   :  { %v1250_v39 = vsub.f32 %v2204_v12, %v1246_v38 }
 0xa86   :  { %v1254_v41 = vmul.f32 %v1250_v39, %v1250_v39 }
 0xa88   :  { %v1258_v35 = vsel %vm38_vm0, %v1254_v41, 0.0 }
 0xa89   :  { %1259 = vadd.xlane.f32.xlu0 %v1258_v35  ;;  %v1239_v42 = vpop.xlane.xlu0 %1238 }
 0xa8a   :  { %v1247_v43 = vmul.f32 %v1239_v42, %v1926_v14 }
 0xa8c   :  { %v1251_v44 = vsub.f32 %v2211_v21, %v1247_v43 }
 0xa8e   :  { %v1255_v45 = vmul.f32 %v1251_v44, %v1251_v44 }
 0xa90   :  { %v1261_v46 = vsel %vm38_vm0, %v1255_v45, 0.0  ;;  %v1693_v45 = vld [vmem:[%s2316_s7 + $0x38] sm:$0xff] }
 0xa91   :  { %1262 = vadd.xlane.f32.xlu2 %v1261_v46  ;;  %1527 = vmatpush.bf16.msra.mxu0 %v1693_v45  ;;  %v1692_v46 = vld [vmem:[%s2316_s7 + $0x30] sm:$0xff] }
 0xa95   :  { %1528 = vmatpush.bf16.msra.mxu0 %v1692_v46 }
 0xa9c   :  { %v1242_v47 = vpop.xlane.xlu2 %1241 }
 0xa9d   :  { %v1248_v48 = vmul.f32 %v1242_v47, %v1926_v14  ;;  %v1691_v47 = vld [vmem:[%s2316_s7 + $0x28] sm:$0xff] }
 0xa9e   :  { %1529 = vmatpush.bf16.msra.mxu0 %v1691_v47 }
 0xa9f   :  { %v2237_v49 = vsub.f32 %v2218_v27, %v1248_v48  ;;  %v1690_v48 = vld [vmem:[%s2316_s7 + $0x20] sm:$0xff] }
 0xaa1   :  { %v1256_v50 = vmul.f32 %v2237_v49, %v2237_v49 }
 0xaa2   :  { %1530 = vmatpush.bf16.msra.mxu0 %v1690_v48 }
 0xaa3   :  { %v1264_v52 = vsel %vm38_vm0, %v1256_v50, 0.0  ;;  %v1689_v50 = vld [vmem:[%s2316_s7 + $0x18] sm:$0xff] }
 0xaa4   :  { %v1245_v53 = vpop.xlane.xlu1 %1244  ;;  %1265 = vadd.xlane.f32.xlu1 %v1264_v52 }
 0xaa5   :  { %v1249_v54 = vmul.f32 %v1245_v53, %v1926_v14 }
 0xaa6   :  { %1531 = vmatpush.bf16.msra.mxu0 %v1689_v50 }
 0xaa7   :  { %v2244_v55 = vsub.f32 %v2225_v34, %v1249_v54  ;;  %v1688_v54 = vld [vmem:[%s2316_s7 + $0x10] sm:$0xff] }
 0xaa9   :  { %v1257_v56 = vmul.f32 %v2244_v55, %v2244_v55 }
 0xaaa   :  { %1532 = vmatpush.bf16.msra.mxu0 %v1688_v54 }
 0xaab   :  { %v1267_v57 = vsel %vm38_vm0, %v1257_v56, 0.0 }
 0xaac   :  { %1268 = vadd.xlane.f32.xlu0 %v1267_v57  ;;  %v1687_v57 = vld [vmem:[%s2316_s7 + $0x8] sm:$0xff] }
 0xaae   :  { %1533 = vmatpush.bf16.msra.mxu0 %v1687_v57 }
 0xafc   :  { %v1260_v59 = vpop.xlane.xlu0 %1259 }
 0xafd   :  { %v1270_v40 = vmul.f32 %v1260_v59, %v1926_v14  ;;  %v1686_v59 = vld [vmem:[%s2316_s7] sm:$0xff] }
 0xafe   :  { %1534 = vmatpush.bf16.msra.mxu0 %v1686_v59 }
 0xaff   :  { %v1274_v60 = vadd.f32 1e-05, %v1270_v40 }
 0xb01   :  { %1789 = vrsqrt.f32 %v1274_v60  ;;  %vm1284_vm6 = vweird.f32 %v1274_v60 }
 0xb04   :  { %v1263_v18 = vpop.xlane.xlu2 %1262 }
 0xb05   :  { %v1271_v61 = vmul.f32 %v1263_v18, %v1926_v14 }
 0xb07   :  { %v1790_v62 = vpop.eup %1789  ;;  %v1275_v63 = vadd.f32 1e-05, %v1271_v61 }
 0xb08   :  { %v1279_v0 = vmul.f32 %v1790_v62, %v1274_v60  ;;  %vm1285_vm5 = vweird.f32 %v1790_v62 }
 0xb09   :  { %1791 = vrsqrt.f32 %v1275_v63  ;;  %vm1286_vm8 = vmor %vm1284_vm6, %vm1285_vm5  ;;  %vm1294_vm9 = vweird.f32 %v1275_v63 }
 0xb0a   :  { %v1280_v1 = vmul.f32 %v1790_v62, %v1279_v0 }
 0xb0c   :  { %v1281_v29 = vmul.f32 0.5, %v1280_v1 }
 0xb0e   :  { %v1282_v3 = vsub.f32 1.5, %v1281_v29 }
 0xb0f   :  { %v1792_v2 = vpop.eup %1791 }
 0xb10   :  { %v1289_v4 = vmul.f32 %v1792_v2, %v1275_v63  ;;  %v1283_v5 = vmul.f32 %v1790_v62, %v1282_v3  ;;  %vm1295_vm7 = vweird.f32 %v1792_v2 }
 0xb11   :  { %vm1296_vm10 = vmor %vm1294_vm9, %vm1295_vm7 }
 0xb12   :  { %v1290_v51 = vmul.f32 %v1792_v2, %v1289_v4  ;;  %v1287_v8 = vsel %vm1286_vm8, %v1790_v62, %v1283_v5 }
 0xb13   :  { %v1318_v16 = vmul.f32 %v1287_v8, %v1250_v39 }
 0xb14   :  { %v1291_v28 = vmul.f32 0.5, %v1290_v51 }
 0xb16   :  { %v1292_v6 = vsub.f32 1.5, %v1291_v28 }
 0xb17   :  { %v1266_v7 = vpop.xlane.xlu1 %1265 }
 0xb18   :  { %v1293_v9 = vmul.f32 %v1792_v2, %v1292_v6  ;;  %v1272_v10 = vmul.f32 %v1266_v7, %v1926_v14 }
 0xb1a   :  { %v1297_v30 = vsel %vm1296_vm10, %v1792_v2, %v1293_v9  ;;  %v1276_v11 = vadd.f32 1e-05, %v1272_v10 }
 0xb1b   :  { %v1319_v13 = vmul.f32 %v1297_v30, %v1251_v44 }
 0xb1c   :  { %1793 = vrsqrt.f32 %v1276_v11  ;;  %vm1304_vm12 = vweird.f32 %v1276_v11 }
 0xb1d   :  { %v1322_v15 = vpack.c.bf16 %v1319_v13, %v1318_v16 }
 0xb1f   :  { %v1269_v17 = vpop.xlane.xlu0 %1268  ;;  %1640 = vmatmul.msk.bf16.vlgmr.msra.gmra.mxu3 %vm38_vm0, %v1322_v15 }
 0xb20   :  { %v1273_v20 = vmul.f32 %v1269_v17, %v1926_v14 }
 0xb22   :  { %v1794_v22 = vpop.eup %1793  ;;  %v1277_v23 = vadd.f32 1e-05, %v1273_v20 }
 0xb23   :  { %v1299_v24 = vmul.f32 %v1794_v22, %v1276_v11  ;;  %vm1305_vm11 = vweird.f32 %v1794_v22 }
 0xb24   :  { %1795 = vrsqrt.f32 %v1277_v23  ;;  %vm1306_vm14 = vmor %vm1304_vm12, %vm1305_vm11  ;;  %vm1314_vm15 = vweird.f32 %v1277_v23 }
 0xb25   :  { %v1300_v25 = vmul.f32 %v1794_v22, %v1299_v24 }
 0xb27   :  { %v1301_v19 = vmul.f32 0.5, %v1300_v25 }
 0xb29   :  { %v1302_v32 = vsub.f32 1.5, %v1301_v19 }
 0xb2a   :  { %v1796_v31 = vpop.eup %1795 }
 0xb2b   :  { %v1309_v33 = vmul.f32 %v1796_v31, %v1277_v23  ;;  %v1303_v37 = vmul.f32 %v1794_v22, %v1302_v32  ;;  %vm1315_vm13 = vweird.f32 %v1796_v31 }
 0xb2c   :  { %vm1316_vm1 = vmor %vm1314_vm15, %vm1315_vm13 }
 0xb2d   :  { %v1310_v36 = vmul.f32 %v1796_v31, %v1309_v33  ;;  %v1307_v14 = vsel %vm1306_vm14, %v1794_v22, %v1303_v37 }
 0xb2e   :  { %v1320_v42 = vmul.f32 %v1307_v14, %v2237_v49  ;;  %v1713_v49 = vld [vmem:[%s2315_s6] ss:$0 sm:$0xff] }
 0xb2f   :  { %v1311_v38 = vmul.f32 0.5, %v1310_v36 }
 0xb31   :  { %v1312_v39 = vsub.f32 1.5, %v1311_v38 }
 0xb33   :  { %v1313_v41 = vmul.f32 %v1796_v31, %v1312_v39 }
 0xb35   :  { %v1317_v35 = vsel %vm1316_vm1, %v1796_v31, %v1313_v41 }
 0xb36   :  { %v1321_v43 = vmul.f32 %v1317_v35, %v2244_v55 }
 0xb38   :  { %v1323_v44 = vpack.c.bf16 %v1321_v43, %v1320_v42 }
 0xb3a   :  { %1641 = vmatmul.msk.bf16.gmra.mxu3 %vm38_vm0, %v1323_v44 }
 0xba2   :  { %v1367_v52 = vpop.f32.mrf.mxu3 }
 0xba3   :  { %v1368_v53 = vadd.f32 %v1713_v49, %v1367_v52 }
 0xba5   :  { %v1642_v55 = vmul.f32 -1.702, %v1368_v53 }
 0xba7   :  { %v1385_v56 = vmul.f32 1.442695, %v1642_v55 }
 0xba9   :  { %1797 = vpow2.f32 %v1385_v56 }
 0xbaa   :  { %v1369_v58 = vpop.f32.mrf.mxu3 }
 0xbab   :  { %v1370_v26 = vadd.f32 %v1713_v49, %v1369_v58 }
 0xbad   :  { %v1643_v40 = vmul.f32 -1.702, %v1370_v26 }
 0xbaf   :  { %v1798_v60 = vpop.eup %1797  ;;  %v1387_v18 = vmul.f32 1.442695, %v1643_v40 }
 0xbb0   :  { %v1393_v61 = vadd.f32 1.0, %v1798_v60 }
 0xbb1   :  { %1799 = vpow2.f32 %v1387_v18 }
 0xbb2   :  { %1801 = vrcp.f32 %v1393_v61  ;;  %v1408_v7 = vand.u32 2147483648, %v1393_v61  ;;  %vm1402_vm3 = vweird.f32 %v1393_v61  ;;  %v1406_v9 = vand.u32 2147483647, %v1393_v61 }
 0xbb4   :  { %v1409_v17 = vor.u32 1.1754944e-38, %v1408_v7  ;;  %vm1407_vm6 = vcmp.eq.f32.partialorder %v1406_v9, 8.507059e+37 }
 0xbb7   :  { %v1800_v62 = vpop.eup %1799 }
 0xbb8   :  { %v1802_v63 = vpop.eup %1801  ;;  %v1394_v0 = vadd.f32 1.0, %v1800_v62  ;;  %v1714_v62 = vld [vmem:[%s2317_s8] ss:$0 sm:$0xff]  ;;  %s1558_s8 = sshll.u32 %s1858_s4, 4  ;;  %s1559_s8 = int_to_ptr.vmem [resolvable:$true] %s1558_s8 }
 0xbb9   :  { %v1398_v1 = vmul.f32 %v1802_v63, %v1393_v61  ;;  %vm1403_vm2 = vweird.f32 %v1802_v63 }
 0xbba   :  { %1803 = vrcp.f32 %v1394_v0  ;;  %vm1404_vm4 = vmor %vm1402_vm3, %vm1403_vm2  ;;  %v1423_v30 = vand.u32 2147483648, %v1394_v0  ;;  %v1421_v13 = vand.u32 2147483647, %v1394_v0  ;;  %vm1417_vm7 = vweird.f32 %v1394_v0 }
 0xbbb   :  { %v1399_v29 = vsub.f32 1.0, %v1398_v1 }
 0xbbc   :  { %v1424_v24 = vor.u32 1.1754944e-38, %v1423_v30  ;;  %vm1422_vm9 = vcmp.eq.f32.partialorder %v1421_v13, 8.507059e+37 }
 0xbbd   :  { %v1400_v2 = vmul.f32 %v1802_v63, %v1399_v29  ;;  %v1372_v3 = vpop.f32.mrf.mxu3  ;;  %v1329_v29 = vadd.f32 %v1714_v62, %v2211_v21 }
 0xbbe   :  { %v2290_v4 = vadd.f32 %v1713_v49, %v1372_v3 }
 0xbbf   :  { %v1401_v28 = vadd.f32 %v1802_v63, %v1400_v2 }
 0xbc0   :  { %v1804_v51 = vpop.eup %1803  ;;  %v1644_v5 = vmul.f32 -1.702, %v2290_v4 }
 0xbc1   :  { %v1413_v6 = vmul.f32 %v1804_v51, %v1394_v0  ;;  %v1405_v11 = vsel %vm1404_vm4, %v1802_v63, %v1401_v28  ;;  %vm1418_vm5 = vweird.f32 %v1804_v51  ;;  %v1328_v63 = vadd.f32 %v1714_v62, %v2204_v12 }
 0xbc2   :  { %v1389_v8 = vmul.f32 1.442695, %v1644_v5  ;;  %v1410_v23 = vsel %vm1407_vm6, %v1409_v17, %v1405_v11  ;;  %vm1419_vm8 = vmor %vm1417_vm7, %vm1418_vm5  ;;  %v1331_v12 = vadd.f32 %v1714_v62, %v2225_v34 }
 0xbc3   :  { %v1414_v10 = vsub.f32 1.0, %v1413_v6  ;;  %v1457_v36 = vmul.f32 %v1410_v23, %v1368_v53 }
 0xbc4   :  { %1805 = vpow2.f32 %v1389_v8 }
 0xbc5   :  { %v1415_v16 = vmul.f32 %v1804_v51, %v1414_v10  ;;  %v1374_v15 = vpop.f32.mrf.mxu3 }
 0xbc6   :  { %v1375_v20 = vadd.f32 %v1713_v49, %v1374_v15 }
 0xbc7   :  { %v1416_v22 = vadd.f32 %v1804_v51, %v1415_v16 }
 0xbc8   :  { %v1645_v25 = vmul.f32 -1.702, %v1375_v20 }
 0xbc9   :  { %v1420_v19 = vsel %vm1419_vm8, %v1804_v51, %v1416_v22 }
 0xbca   :  { %v1806_v31 = vpop.eup %1805  ;;  %v1425_v32 = vsel %vm1422_vm9, %v1424_v24, %v1420_v19  ;;  %v1391_v33 = vmul.f32 1.442695, %v1645_v25 }
 0xbcb   :  { %v1458_v37 = vmul.f32 %v1425_v32, %v1370_v26  ;;  %v1395_v38 = vadd.f32 1.0, %v1806_v31 }
 0xbcc   :  { %1807 = vpow2.f32 %v1391_v33 }
 0xbcd   :  { %v1461_v39 = vpack.c.bf16 %v1458_v37, %v1457_v36  ;;  %1809 = vrcp.f32 %v1395_v38  ;;  %v1438_v48 = vand.u32 2147483648, %v1395_v38  ;;  %vm1432_vm11 = vweird.f32 %v1395_v38 }
 0xbce   :  { %v1436_v49 = vand.u32 2147483647, %v1395_v38 }
 0xbcf   :  { %1535 = vmatmul.bf16.vlgmr.msra.gmra.mxu0 %v1461_v39  ;;  %v1439_v56 = vor.u32 1.1754944e-38, %v1438_v48 }
 0xbd0   :  { %vm1437_vm14 = vcmp.eq.f32.partialorder %v1436_v49, 8.507059e+37 }
 0xbd2   :  { %v1808_v41 = vpop.eup %1807 }
 0xbd3   :  { %v1810_v14 = vpop.eup %1809  ;;  %v1396_v35 = vadd.f32 1.0, %v1808_v41 }
 0xbd4   :  { %v1428_v42 = vmul.f32 %v1810_v14, %v1395_v38  ;;  %vm1433_vm10 = vweird.f32 %v1810_v14 }
 0xbd5   :  { %1811 = vrcp.f32 %v1396_v35  ;;  %vm1434_vm12 = vmor %vm1432_vm11, %vm1433_vm10  ;;  %v1453_v52 = vand.u32 2147483648, %v1396_v35  ;;  %v1451_v55 = vand.u32 2147483647, %v1396_v35  ;;  %vm1447_vm15 = vweird.f32 %v1396_v35 }
 0xbd6   :  { %v1429_v43 = vsub.f32 1.0, %v1428_v42 }
 0xbd7   :  { %v1454_v26 = vor.u32 1.1754944e-38, %v1453_v52  ;;  %vm1452_vm2 = vcmp.eq.f32.partialorder %v1451_v55, 8.507059e+37 }
 0xbd8   :  { %v1430_v44 = vmul.f32 %v1810_v14, %v1429_v43 }
 0xbda   :  { %v1431_v46 = vadd.f32 %v1810_v14, %v1430_v44 }
 0xbdb   :  { %v1812_v45 = vpop.eup %1811 }
 0xbdc   :  { %v1443_v47 = vmul.f32 %v1812_v45, %v1396_v35  ;;  %v1435_v53 = vsel %vm1434_vm12, %v1810_v14, %v1431_v46  ;;  %vm1448_vm13 = vweird.f32 %v1812_v45 }
 0xbdd   :  { %v1440_v58 = vsel %vm1437_vm14, %v1439_v56, %v1435_v53  ;;  %vm1449_vm1 = vmor %vm1447_vm15, %vm1448_vm13 }
 0xbde   :  { %v1444_v50 = vsub.f32 1.0, %v1443_v47  ;;  %v1459_v60 = vmul.f32 %v1440_v58, %v2290_v4  ;;  %v1330_v4 = vadd.f32 %v1714_v62, %v2218_v27 }
 0xbe0   :  { %v1445_v54 = vmul.f32 %v1812_v45, %v1444_v50 }
 0xbe2   :  { %v1446_v57 = vadd.f32 %v1812_v45, %v1445_v54 }
 0xbe4   :  { %v1450_v59 = vsel %vm1449_vm1, %v1812_v45, %v1446_v57 }
 0xbe5   :  { %v1455_v40 = vsel %vm1452_vm2, %v1454_v26, %v1450_v59 }
 0xbe6   :  { %v1460_v18 = vmul.f32 %v1455_v40, %v1375_v20 }
 0xbe8   :  { %v1462_v61 = vpack.c.bf16 %v1460_v18, %v1459_v60 }
 0xbea   :  { %1540 = vmatmul.bf16.gmra.mxu0 %v1462_v61 }
 0xc4c   :  { %v1536_v0 = vpop.f32.mrf.mxu0 }
 0xc4d   :  { %v1546_v1 = vadd.f32 %v1536_v0, %v1328_v63 }
 0xc4f   :  { %1550 = vst.msk [vmem:[#allocation3] sm:$0xff] %vm38_vm0, %v1546_v1 }
 0xc54   :  { %v1538_v2 = vpop.f32.mrf.mxu0 }
 0xc55   :  { %v1547_v3 = vadd.f32 %v1538_v2, %v1329_v29 }
 0xc57   :  { %1551 = vst.msk [vmem:[#allocation3 + $0x8] sm:$0xff] %vm38_vm0, %v1547_v3 }
 0xc67   :  { %v1541_v51 = vpop.f32.mrf.mxu0 }
 0xc68   :  { %v1548_v5 = vadd.f32 %v1541_v51, %v1330_v4 }
 0xc6a   :  { %1552 = vst.msk [vmem:[#allocation3 + $0x10] sm:$0xff] %vm38_vm0, %v1548_v5 }
 0xc6f   :  { %v1543_v28 = vpop.f32.mrf.mxu0 }
 0xc70   :  { %v1549_v21 = vadd.f32 %v1543_v28, %v1331_v12 }
 0xc72   :  { %1553 = vst.msk [vmem:[#allocation3 + $0x18] sm:$0xff] %vm38_vm0, %v1549_v21 }
 0xc73   :  { %1566 = dma.vmem_to_hbm [thread:$0]  %s1559_s8, 512, %s1561_s23, [#allocation4], %s1859_s0, %s1859_s0, %s1855_s11  }
 0xc74   :  { %1841 = dma.done.wait [#allocation4], 512  }
 0xc75   :  { %1842 = vsyncadd [#allocation4], 4294966784 }
 0xc76   :  { %1571 = vsyncpa [#allocation4], 1 }

// kernel: tpu_custom_call.1
= control target key start
LH: loop header
LB: loop body
LE: loop exit
PB: predicated region body
PF: predicated region fallthrough
CT: control target
= control target key end

     0   :  { %vm38_vm0 = vcmask 261120   ;;  %s2309_s0 = inlined_call_operand.vmem [shape: f32[4,8,32], index: 0, kind: input, shape index: {}]   ;;  %s2310_s1 = inlined_call_operand.vmem [shape: bf16[32,96], index: 1, kind: input, shape index: {}]   ;;  %s2311_s2 = inlined_call_operand.vmem [shape: f32[1,96], index: 2, kind: input, shape index: {}]   ;;  %s2312_s3 = inlined_call_operand.vmem [shape: bf16[32,32], index: 3, kind: input, shape index: {}]   ;;  %s2313_s4 = inlined_call_operand.vmem [shape: f32[1,32], index: 4, kind: input, shape index: {}]   ;;  %s2314_s5 = inlined_call_operand.vmem [shape: bf16[32,128], index: 5, kind: input, shape index: {}]   ;;  %s2315_s6 = inlined_call_operand.vmem [shape: f32[1,128], index: 6, kind: input, shape index: {}]   ;;  %s2316_s7 = inlined_call_operand.vmem [shape: bf16[128,32], index: 7, kind: input, shape index: {}]   ;;  %s2317_s8 = inlined_call_operand.vmem [shape: f32[1,32], index: 8, kind: input, shape index: {}]   ;;  %s2318_s9 = inlined_call_operand.hbm [shape: f32[4,8,32], index: 9, kind: output, shape index: {}]  }
   0x1   :  { %v36_v0 = vld [vmem:[%s2309_s0 + $0x10] sm:$0xff]  ;;  %v34_v1 = vld [vmem:[%s2309_s0] sm:$0xff] }
   0x2   :  { %v45_v2 = vsel %vm38_vm0, %v36_v0, 0.0  ;;  %v39_v3 = vsel %vm38_vm0, %v34_v1, 0.0 }
   0x3   :  { %46 = vadd.xlane.f32.xlu1 %v45_v2  ;;  %40 = vadd.xlane.f32.xlu0 %v39_v3 }
   0x4   :  { %14 = vsyncpa [#allocation4], 0  ;;  %v37_v4 = vld [vmem:[%s2309_s0 + $0x18] sm:$0xff]  ;;  %v35_v5 = vld [vmem:[%s2309_s0 + $0x8] sm:$0xff]  ;;  %v1843_v8 = vmov 32.0   ;;  %s1844_s22 = smov 96  }
   0x5   :  { %v48_v6 = vsel %vm38_vm0, %v37_v4, 0.0  ;;  %v42_v7 = vsel %vm38_vm0, %v35_v5, 0.0  ;;  %1715 = vrcp.f32 %v1843_v8  ;;  %v1679_v35 = vld [vmem:[%s2310_s1 + $0x8] sm:$0xff]  ;;  %v1678_v36 = vld [vmem:[%s2310_s1] sm:$0xff]  ;;  %vm190_vm14 = vcmask 64512   ;;  %s1846_s23 = smov 88  }
   0x6   :  { %168 = vmatpush.bf16.msra.mxu1 %v1679_v35  ;;  %s1847_s24 = smov 120   ;;  %vm335_vm15 = vcmask 1043456   ;;  %s1848_s25 = smov 56  }
   0x7   :  { %s1849_s26 = smov 80   ;;  %s1850_s27 = smov 112  }
   0x8   :  { %s1851_s28 = smov 48   ;;  %s1852_s29 = smov 72  }
   0x9   :  { %s1853_s30 = smov 104   ;;  %s1854_s10 = smov 40  }
   0xa   :  { %169 = vmatpush.bf16.msra.mxu1 %v1678_v36  ;;  %s1855_s11 = smov 8   ;;  %s1856_s12 = smov 16  }
   0xb   :  { %49 = vadd.xlane.f32.xlu1 %v48_v6  ;;  %43 = vadd.xlane.f32.xlu0 %v42_v7  ;;  %v1716_v9 = vpop.eup %1715  ;;  %s1857_s13 = smov 24  }
   0xc   :  { %v52_v10 = vmul.f32 32.0, %v1716_v9  ;;  %vm56_vm1 = vweird.f32 %v1716_v9 }
   0xe   :  { %v53_v11 = vsub.f32 1.0, %v52_v10 }
  0x10   :  { %v54_v12 = vmul.f32 %v1716_v9, %v53_v11 }
  0x12   :  { %v55_v13 = vadd.f32 %v1716_v9, %v54_v12 }
  0x14   :  { %v1926_v14 = vsel %vm56_vm1, %v1716_v9, %v55_v13  ;;  %vm419_vm1 = vcmask 60416  }
  0x76   :  { %v47_v15 = vpop.xlane.xlu1 %46  ;;  %v41_v16 = vpop.xlane.xlu0 %40 }
  0x77   :  { %v60_v17 = vmul.f32 %v1926_v14, %v47_v15  ;;  %v58_v18 = vmul.f32 %v1926_v14, %v41_v16 }
  0x79   :  { %v1930_v19 = vsub.f32 %v36_v0, %v60_v17  ;;  %v1932_v20 = vsub.f32 %v34_v1, %v58_v18 }
  0x7b   :  { %v68_v21 = vmul.f32 %v1930_v19, %v1930_v19  ;;  %v66_v22 = vmul.f32 %v1932_v20, %v1932_v20 }
  0x7d   :  { %v76_v23 = vsel %vm38_vm0, %v68_v21, 0.0  ;;  %v70_v24 = vsel %vm38_vm0, %v66_v22, 0.0  ;;  %v1711_v21 = vld [vmem:[%s2311_s2] ss:$0 sm:$0xff]  ;;  %s1845_s2 = smov 64  }
  0x7e   :  { %v50_v25 = vpop.xlane.xlu1 %49  ;;  %77 = vadd.xlane.f32.xlu0 %v76_v23  ;;  %71 = vadd.xlane.f32.xlu2 %v70_v24  ;;  %v44_v26 = vpop.xlane.xlu0 %43 }
  0x7f   :  { %v61_v27 = vmul.f32 %v1926_v14, %v50_v25  ;;  %v59_v28 = vmul.f32 %v1926_v14, %v44_v26 }
  0x81   :  { %v1942_v29 = vsub.f32 %v37_v4, %v61_v27  ;;  %v63_v30 = vsub.f32 %v35_v5, %v59_v28 }
  0x83   :  { %v69_v31 = vmul.f32 %v1942_v29, %v1942_v29  ;;  %v67_v32 = vmul.f32 %v63_v30, %v63_v30 }
  0x85   :  { %v79_v33 = vsel %vm38_vm0, %v69_v31, 0.0  ;;  %v73_v34 = vsel %vm38_vm0, %v67_v32, 0.0 }
  0x86   :  { %80 = vadd.xlane.f32.xlu1 %v79_v33  ;;  %74 = vadd.xlane.f32.xlu2 %v73_v34 }
  0xf1   :  { %v72_v37 = vpop.xlane.xlu2 %71  ;;  %v78_v40 = vpop.xlane.xlu0 %77 }
  0xf2   :  { %v82_v38 = vmul.f32 %v72_v37, %v1926_v14  ;;  %v84_v41 = vmul.f32 %v78_v40, %v1926_v14 }
  0xf4   :  { %v86_v39 = vadd.f32 1e-05, %v82_v38  ;;  %v88_v50 = vadd.f32 1e-05, %v84_v41 }
  0xf6   :  { %1717 = vrsqrt.f32 %v86_v39  ;;  %vm96_vm3 = vweird.f32 %v86_v39  ;;  %vm116_vm10 = vweird.f32 %v88_v50 }
  0xf9   :  { %v81_v42 = vpop.xlane.xlu1 %80  ;;  %v75_v43 = vpop.xlane.xlu2 %74 }
  0xfa   :  { %v85_v44 = vmul.f32 %v81_v42, %v1926_v14  ;;  %v83_v45 = vmul.f32 %v75_v43, %v1926_v14 }
  0xfc   :  { %v1718_v46 = vpop.eup %1717  ;;  %v89_v47 = vadd.f32 1e-05, %v85_v44  ;;  %v87_v48 = vadd.f32 1e-05, %v83_v45 }
  0xfd   :  { %v91_v49 = vmul.f32 %v1718_v46, %v86_v39  ;;  %vm97_vm2 = vweird.f32 %v1718_v46 }
  0xfe   :  { %1719 = vrsqrt.f32 %v89_v47  ;;  %vm98_vm5 = vmor %vm96_vm3, %vm97_vm2  ;;  %vm106_vm6 = vweird.f32 %v87_v48  ;;  %vm126_vm8 = vweird.f32 %v89_v47  ;;  %vm668_vm2 = vcmask 126016  }
  0xff   :  { %v92_v51 = vmul.f32 %v1718_v46, %v91_v49  ;;  %1721 = vrsqrt.f32 %v87_v48  ;;  %vm917_vm3 = vcmask 191616  }
 0x100   :  { %1723 = vrsqrt.f32 %v88_v50 }
 0x101   :  { %v93_v52 = vmul.f32 0.5, %v92_v51 }
 0x103   :  { %v94_v55 = vsub.f32 1.5, %v93_v52 }
 0x104   :  { %v1720_v53 = vpop.eup %1719 }
 0x105   :  { %v1722_v54 = vpop.eup %1721  ;;  %v121_v58 = vmul.f32 %v1720_v53, %v89_v47  ;;  %v95_v60 = vmul.f32 %v1718_v46, %v94_v55  ;;  %vm127_vm9 = vweird.f32 %v1720_v53 }
 0x106   :  { %v101_v56 = vmul.f32 %v1722_v54, %v87_v48  ;;  %v1724_v57 = vpop.eup %1723  ;;  %vm107_vm4 = vweird.f32 %v1722_v54  ;;  %vm128_vm12 = vmor %vm126_vm8, %vm127_vm9 }
 0x107   :  { %v111_v61 = vmul.f32 %v1724_v57, %v88_v50  ;;  %v122_v63 = vmul.f32 %v1720_v53, %v121_v58  ;;  %v99_v3 = vsel %vm98_vm5, %v1718_v46, %v95_v60  ;;  %vm108_vm7 = vmor %vm106_vm6, %vm107_vm4  ;;  %vm117_vm11 = vweird.f32 %v1724_v57 }
 0x108   :  { %v102_v59 = vmul.f32 %v1722_v54, %v101_v56  ;;  %v130_v6 = vmul.f32 %v99_v3, %v1932_v20  ;;  %vm118_vm13 = vmor %vm116_vm10, %vm117_vm11  ;;  %vm1166_vm4 = vcmask 257216  }
 0x109   :  { %v112_v1 = vmul.f32 %v1724_v57, %v111_v61  ;;  %v123_v4 = vmul.f32 0.5, %v122_v63 }
 0x10a   :  { %v103_v62 = vmul.f32 0.5, %v102_v59 }
 0x10b   :  { %v113_v8 = vmul.f32 0.5, %v112_v1  ;;  %v124_v10 = vsub.f32 1.5, %v123_v4 }
 0x10c   :  { %v104_v0 = vsub.f32 1.5, %v103_v62 }
 0x10d   :  { %v114_v11 = vsub.f32 1.5, %v113_v8  ;;  %v125_v12 = vmul.f32 %v1720_v53, %v124_v10 }
 0x10e   :  { %v105_v2 = vmul.f32 %v1722_v54, %v104_v0 }
 0x10f   :  { %v115_v13 = vmul.f32 %v1724_v57, %v114_v11  ;;  %v129_v15 = vsel %vm128_vm12, %v1720_v53, %v125_v12 }
 0x110   :  { %v109_v5 = vsel %vm108_vm7, %v1722_v54, %v105_v2  ;;  %v133_v17 = vmul.f32 %v129_v15, %v1942_v29 }
 0x111   :  { %v131_v7 = vmul.f32 %v109_v5, %v63_v30  ;;  %v119_v16 = vsel %vm118_vm13, %v1724_v57, %v115_v13 }
 0x112   :  { %v132_v18 = vmul.f32 %v119_v16, %v1930_v19 }
 0x113   :  { %v134_v9 = vpack.c.bf16 %v131_v7, %v130_v6 }
 0x114   :  { %v135_v20 = vpack.c.bf16 %v133_v17, %v132_v18 }
 0x115   :  { %1580 = vmatmul.msk.bf16.vlgmr.msra.gmra.mxu1 %vm38_vm0, %v134_v9 }
 0x125   :  { %1581 = vmatmul.msk.bf16.gmra.mxu1 %vm38_vm0, %v135_v20 }
 0x192   :  { %v171_v22 = vpop.f32.mrf.mxu1 }
 0x193   :  { %v172_v23 = vadd.f32 %v1711_v21, %v171_v22 }
 0x195   :  { %v181_v24 = vpack.c.bf16 %v172_v23, %v172_v23 }
 0x197   :  { %v186_v25 = vunpack.c.l.b16 %v181_v24 }
 0x199   :  { %v1966_v26 = vpack.c.b16 %v186_v25, %v186_v25 }
 0x19a   :  { %v173_v27 = vpop.f32.mrf.mxu1 }
 0x19b   :  { %v174_v28 = vadd.f32 %v1711_v21, %v173_v27  ;;  %188 = vrot.lane.b32.xlu0 %v1966_v26, %s1844_s22 }
 0x19d   :  { %v182_v29 = vpack.c.bf16 %v174_v28, %v174_v28 }
 0x19f   :  { %v211_v19 = vunpack.c.l.b16 %v182_v29 }
 0x1a1   :  { %v1969_v30 = vpack.c.b16 %v211_v19, %v211_v19 }
 0x1a2   :  { %v176_v31 = vpop.f32.mrf.mxu1 }
 0x1a3   :  { %v177_v32 = vadd.f32 %v1711_v21, %v176_v31  ;;  %213 = vrot.lane.b32.xlu2 %v1969_v30, %s1844_s22 }
 0x1a5   :  { %v183_v33 = vpack.c.bf16 %v177_v32, %v177_v32 }
 0x1a7   :  { %v235_v34 = vunpack.c.l.b16 %v183_v33 }
 0x1a9   :  { %v1972_v35 = vpack.c.b16 %v235_v34, %v235_v34 }
 0x1aa   :  { %v178_v36 = vpop.f32.mrf.mxu1 }
 0x1ab   :  { %v179_v37 = vadd.f32 %v1711_v21, %v178_v36  ;;  %237 = vrot.lane.b32.xlu1 %v1972_v35, %s1844_s22 }
 0x1ad   :  { %v184_v38 = vpack.c.bf16 %v179_v37, %v179_v37 }
 0x1af   :  { %v259_v39 = vunpack.c.l.b16 %v184_v38 }
 0x1b1   :  { %v1975_v40 = vpack.c.b16 %v259_v39, %v259_v39 }
 0x1b3   :  { %261 = vrot.lane.b32.xlu2 %v1975_v40, %s1844_s22 }
 0x1fd   :  { %v214_v41 = vpop.permute.xlu2 %213 }
 0x1fe   :  { %v219_v42 = vsel %vm190_vm14, %v214_v41, 0 }
 0x1ff   :  { %228 = vmatpush.bf16.xpose.msra.mxu2 %v219_v42 }
 0x206   :  { %1583 = vmatmul.msk.bf16.vlgmr.msra.gmra.mxu2 %vm190_vm14, %v182_v29 }
 0x20d   :  { %v262_v43 = vpop.permute.xlu2 %261  ;;  %v189_v44 = vpop.permute.xlu0 %188 }
 0x20e   :  { %v267_v45 = vsel %vm190_vm14, %v262_v43, 0  ;;  %v195_v46 = vsel %vm190_vm14, %v189_v44, 0 }
 0x20f   :  { %204 = vmatpush.bf16.xpose.msrb.mxu1 %v195_v46 }
 0x216   :  { %1582 = vmatmul.msk.bf16.vlgmr.msrb.gmra.mxu1 %vm190_vm14, %v181_v24 }
 0x217   :  { %276 = vmatpush.bf16.xpose.msra.mxu1 %v267_v45 }
 0x21d   :  { %v238_v47 = vpop.permute.xlu1 %237 }
 0x21e   :  { %v243_v48 = vsel %vm190_vm14, %v238_v47, 0 }
 0x21f   :  { %252 = vmatpush.bf16.xpose.msra.mxu3 %v243_v48 }
 0x226   :  { %1584 = vmatmul.msk.bf16.vlgmr.msra.gmra.mxu3 %vm190_vm14, %v183_v33  ;;  %1585 = vmatmul.msk.bf16.vlgmr.msra.gmra.mxu1 %vm190_vm14, %v184_v38 }
 0x289   :  { %v230_v49 = vpop.f32.mrf.mxu2 }
 0x28a   :  { %v285_v50 = vsel %vm190_vm14, %v230_v49, -inf }
 0x28b   :  { %286 = vmax.xlane.f32.xlu2 %v285_v50 }
 0x291   :  { %v232_v51 = vpop.f32.mrf.mxu2 }
 0x293   :  { %v206_v52 = vpop.f32.mrf.mxu1 }
 0x294   :  { %v282_v53 = vsel %vm190_vm14, %v206_v52, -inf }
 0x295   :  { %283 = vmax.xlane.f32.xlu0 %v282_v53 }
 0x29b   :  { %v208_v54 = vpop.f32.mrf.mxu1 }
 0x2a3   :  { %v278_v55 = vpop.f32.mrf.mxu1 }
 0x2a4   :  { %v291_v60 = vsel %vm190_vm14, %v278_v55, -inf }
 0x2a9   :  { %v254_v56 = vpop.f32.mrf.mxu3  ;;  %330 = vrot.lane.b32.xlu0 %v1966_v26, %s1845_s2 }
 0x2aa   :  { %v288_v57 = vsel %vm190_vm14, %v254_v56, -inf }
 0x2ab   :  { %289 = vmax.xlane.f32.xlu1 %v288_v57  ;;  %v280_v58 = vpop.f32.mrf.mxu1 }
 0x2b1   :  { %v256_v59 = vpop.f32.mrf.mxu3 }
 0x2c4   :  { %426 = vrot.lane.b32.xlu1 %v1966_v26, %s1846_s23 }
 0x2d3   :  { %292 = vmax.xlane.f32.xlu0 %v291_v60 }
 0x2e7   :  { %449 = vrot.lane.b32.xlu0 %v1969_v30, %s1846_s23 }
 0x2ef   :  { %424 = vrot.lane.b32.xlu0 %v1966_v26, %s1847_s24 }
 0x2f7   :  { %373 = vrot.lane.b32.xlu0 %v1972_v35, %s1845_s2 }
 0x2fe   :  { %v287_v61 = vpop.xlane.xlu2 %286 }
 0x2ff   :  { %v295_v62 = vsub.f32 %v230_v49, %v287_v61  ;;  %394 = vrot.lane.b32.xlu0 %v1975_v40, %s1845_s2 }
 0x301   :  { %v300_v63 = vmul.f32 1.442695, %v295_v62 }
 0x303   :  { %1725 = vpow2.f32 %v300_v63 }
 0x307   :  { %472 = vrot.lane.b32.xlu0 %v1972_v35, %s1846_s23 }
 0x308   :  { %v284_v0 = vpop.xlane.xlu0 %283 }
 0x309   :  { %v1726_v1 = vpop.eup %1725  ;;  %v294_v2 = vsub.f32 %v206_v52, %v284_v0 }
 0x30a   :  { %v309_v3 = vsel %vm190_vm14, %v1726_v1, 0.0 }
 0x30b   :  { %v298_v4 = vmul.f32 1.442695, %v294_v2  ;;  %310 = vadd.xlane.f32.xlu1 %v309_v3 }
 0x30d   :  { %1727 = vpow2.f32 %v298_v4 }
 0x30f   :  { %495 = vrot.lane.b32.xlu0 %v1975_v40, %s1846_s23  ;;  %s1560_s23 = sshll.u32 %s2318_s9, 4  ;;  %s1561_s23 = int_to_ptr.hbm [resolvable:$true] %s1560_s23 }
 0x313   :  { %v1728_v5 = vpop.eup %1727 }
 0x314   :  { %v306_v6 = vsel %vm190_vm14, %v1728_v5, 0.0 }
 0x315   :  { %307 = vadd.xlane.f32.xlu2 %v306_v6 }
 0x317   :  { %470 = vrot.lane.b32.xlu0 %v1972_v35, %s1847_s24 }
 0x31b   :  { %v331_v7 = vpop.permute.xlu0 %330 }
 0x31c   :  { %v337_v8 = vsel %vm335_vm15, %v331_v7, 0 }
 0x31d   :  { %346 = vmatpush.bf16.msrb.mxu2 %v337_v8 }
 0x31e   :  { %v290_v9 = vpop.xlane.xlu1 %289 }
 0x31f   :  { %v296_v12 = vsub.f32 %v254_v56, %v290_v9 }
 0x321   :  { %v302_v16 = vmul.f32 1.442695, %v296_v12 }
 0x324   :  { %447 = vrot.lane.b32.xlu1 %v1969_v30, %s1847_s24 }
 0x32d   :  { %352 = vrot.lane.b32.xlu2 %v1969_v30, %s1845_s2 }
 0x336   :  { %v427_v10 = vpop.permute.xlu1 %426 }
 0x337   :  { %v432_v11 = vsel %vm190_vm14, %v427_v10, 0 }
 0x338   :  { %441 = vmatpush.bf16.xpose.msra.mxu2 %v432_v11 }
 0x346   :  { %v293_v13 = vpop.xlane.xlu0 %292 }
 0x347   :  { %v297_v15 = vsub.f32 %v278_v55, %v293_v13 }
 0x349   :  { %v304_v17 = vmul.f32 1.442695, %v297_v15 }
 0x34b   :  { %1729 = vpow2.f32 %v304_v17 }
 0x34c   :  { %1731 = vpow2.f32 %v302_v16 }
 0x351   :  { %v1730_v18 = vpop.eup %1729 }
 0x352   :  { %v1732_v20 = vpop.eup %1731  ;;  %v315_v21 = vsel %vm190_vm14, %v1730_v18, 0.0 }
 0x353   :  { %316 = vadd.xlane.f32.xlu1 %v315_v21  ;;  %v312_v22 = vsel %vm190_vm14, %v1732_v20, 0.0 }
 0x356   :  { %313 = vadd.xlane.f32.xlu2 %v312_v22 }
 0x359   :  { %v450_v23 = vpop.permute.xlu0 %449 }
 0x35a   :  { %v455_v43 = vsel %vm190_vm14, %v450_v23, 0 }
 0x361   :  { %v425_v24 = vpop.permute.xlu0 %424 }
 0x369   :  { %v374_v25 = vpop.permute.xlu0 %373 }
 0x36a   :  { %v379_v27 = vsel %vm335_vm15, %v374_v25, 0 }
 0x36b   :  { %388 = vmatpush.bf16.msra.mxu0 %v379_v27 }
 0x36c   :  { %564 = vrot.lane.b32.xlu1 %v1966_v26, %s1848_s25 }
 0x36e   :  { %493 = vrot.lane.b32.xlu2 %v1975_v40, %s1847_s24 }
 0x371   :  { %v395_v28 = vpop.permute.xlu0 %394 }
 0x372   :  { %v400_v29 = vsel %vm335_vm15, %v395_v28, 0 }
 0x373   :  { %409 = vmatpush.bf16.msrb.mxu0 %v400_v29 }
 0x374   :  { %698 = vrot.lane.b32.xlu1 %v1969_v30, %s1849_s26 }
 0x379   :  { %v473_v19 = vpop.permute.xlu0 %472 }
 0x37a   :  { %v478_v53 = vsel %vm190_vm14, %v473_v19, 0 }
 0x37e   :  { %v311_v33 = vpop.xlane.xlu1 %310 }
 0x37f   :  { %1733 = vrcp.f32 %v311_v33 }
 0x381   :  { %v496_v31 = vpop.permute.xlu0 %495 }
 0x382   :  { %v501_v32 = vsel %vm190_vm14, %v496_v31, 0 }
 0x383   :  { %510 = vmatpush.bf16.xpose.msrb.mxu1 %v501_v32 }
 0x385   :  { %v1734_v36 = vpop.eup %1733 }
 0x386   :  { %v323_v38 = vmul.f32 %v1734_v36, %v1726_v1 }
 0x388   :  { %v308_v34 = vpop.xlane.xlu2 %307  ;;  %v327_v45 = vpack.c.bf16 %v323_v38, %v323_v38 }
 0x389   :  { %1735 = vrcp.f32 %v308_v34  ;;  %v471_v59 = vpop.permute.xlu0 %470 }
 0x38f   :  { %v1736_v37 = vpop.eup %1735 }
 0x390   :  { %v322_v39 = vmul.f32 %v1736_v37, %v1728_v5  ;;  %v353_v41 = vpop.permute.xlu2 %352 }
 0x391   :  { %v358_v42 = vsel %vm335_vm15, %v353_v41, 0 }
 0x392   :  { %367 = vmatpush.bf16.msrb.mxu3 %v358_v42  ;;  %v326_v44 = vpack.c.bf16 %v322_v39, %v322_v39 }
 0x394   :  { %1586 = vmatmul.msk.bf16.vlgmr.msrb.gmra.mxu2 %vm190_vm14, %v326_v44 }
 0x395   :  { %1587 = vmatmul.msk.bf16.vlgmr.msrb.gmra.mxu3 %vm190_vm14, %v327_v45 }
 0x396   :  { %464 = vmatpush.bf16.xpose.msra.mxu3 %v455_v43  ;;  %v448_v46 = vpop.permute.xlu1 %447 }
 0x3a4   :  { %1590 = vmatmul.msk.bf16.vlgmr.msra.gmra.mxu2 %vm190_vm14, %v425_v24 }
 0x3a5   :  { %1591 = vmatmul.msk.bf16.vlgmr.msra.gmra.mxu3 %vm190_vm14, %v448_v46 }
 0x3c6   :  { %v317_v51 = vpop.xlane.xlu1 %316 }
 0x3c9   :  { %v314_v47 = vpop.xlane.xlu2 %313 }
 0x3ca   :  { %1737 = vrcp.f32 %v314_v47 }
 0x3cb   :  { %1739 = vrcp.f32 %v317_v51 }
 0x3d0   :  { %v1738_v48 = vpop.eup %1737 }
 0x3d1   :  { %v494_v49 = vpop.permute.xlu2 %493  ;;  %v324_v50 = vmul.f32 %v1738_v48, %v1732_v20  ;;  %v1740_v54 = vpop.eup %1739 }
 0x3d2   :  { %1593 = vmatmul.msk.bf16.vlgmr.msrb.gmra.mxu1 %vm190_vm14, %v494_v49  ;;  %v325_v56 = vmul.f32 %v1740_v54, %v1730_v18 }
 0x3d3   :  { %v328_v52 = vpack.c.bf16 %v324_v50, %v324_v50 }
 0x3d4   :  { %v329_v58 = vpack.c.bf16 %v325_v56, %v325_v56 }
 0x3d5   :  { %1588 = vmatmul.msk.bf16.vlgmr.msra.gmra.mxu0 %vm190_vm14, %v328_v52 }
 0x3d6   :  { %487 = vmatpush.bf16.xpose.msra.mxu0 %v478_v53 }
 0x3de   :  { %v565_v55 = vpop.permute.xlu1 %564 }
 0x3df   :  { %v570_v57 = vsel %vm335_vm15, %v565_v55, 0 }
 0x3e0   :  { %579 = vmatpush.bf16.msrb.mxu2 %v570_v57 }
 0x3e5   :  { %1589 = vmatmul.msk.bf16.vlgmr.msrb.gmra.mxu0 %vm190_vm14, %v329_v58 }
 0x3e6   :  { %v699_v22 = vpop.permute.xlu1 %698 }
 0x3e7   :  { %v704_v37 = vsel %vm190_vm14, %v699_v22, 0 }
 0x3f5   :  { %1592 = vmatmul.msk.bf16.vlgmr.msra.gmra.mxu0 %vm190_vm14, %v471_v59 }
 0x417   :  { %v348_v60 = vpop.f32.mrf.mxu2 }
 0x418   :  { %v415_v61 = vpack.c.bf16 %v348_v60, %v348_v60  ;;  %v369_v62 = vpop.f32.mrf.mxu3 }
 0x419   :  { %v416_v63 = vpack.c.bf16 %v369_v62, %v369_v62 }
 0x41a   :  { %420 = vst.msk [vmem:[#allocation2] sm:$0xf] %vm419_vm1, %v415_v61 }
 0x41b   :  { %421 = vst.msk [vmem:[#allocation2 + $0x4] sm:$0xf] %vm419_vm1, %v416_v63 }
 0x41f   :  { %v350_v0 = vpop.f32.mrf.mxu2 }
 0x420   :  { %v371_v1 = vpop.f32.mrf.mxu3 }
 0x427   :  { %v443_v2 = vpop.f32.mrf.mxu2 }
 0x428   :  { %v466_v3 = vpop.f32.mrf.mxu3  ;;  %v516_v4 = vsel %vm190_vm14, %v443_v2, -inf }
 0x429   :  { %517 = vmax.xlane.f32.xlu0 %v516_v4  ;;  %v519_v5 = vsel %vm190_vm14, %v466_v3, -inf }
 0x42a   :  { %520 = vmax.xlane.f32.xlu1 %v519_v5 }
 0x42f   :  { %v445_v6 = vpop.f32.mrf.mxu2 }
 0x430   :  { %v468_v7 = vpop.f32.mrf.mxu3 }
 0x43d   :  { %585 = vrot.lane.b32.xlu0 %v1969_v30, %s1848_s25 }
 0x445   :  { %673 = vrot.lane.b32.xlu0 %v1966_v26, %s1850_s27 }
 0x44f   :  { %v512_v8 = vpop.f32.mrf.mxu1 }
 0x450   :  { %v525_v9 = vsel %vm190_vm14, %v512_v8, -inf }
 0x451   :  { %526 = vmax.xlane.f32.xlu2 %v525_v9 }
 0x452   :  { %v390_v10 = vpop.f32.mrf.mxu0 }
 0x453   :  { %v417_v11 = vpack.c.bf16 %v390_v10, %v390_v10 }
 0x455   :  { %422 = vst.msk [vmem:[#allocation2 + $0x8] sm:$0xf] %vm419_vm1, %v417_v11 }
 0x457   :  { %v514_v12 = vpop.f32.mrf.mxu1 }
 0x45a   :  { %v392_v13 = vpop.f32.mrf.mxu0 }
 0x462   :  { %v411_v15 = vpop.f32.mrf.mxu0 }
 0x463   :  { %v418_v16 = vpack.c.bf16 %v411_v15, %v411_v15 }
 0x465   :  { %423 = vst.msk [vmem:[#allocation2 + $0xc] sm:$0xf] %vm419_vm1, %v418_v16 }
 0x469   :  { %675 = vrot.lane.b32.xlu2 %v1966_v26, %s1849_s26 }
 0x46a   :  { %v413_v17 = vpop.f32.mrf.mxu0 }
 0x471   :  { %606 = vrot.lane.b32.xlu2 %v1972_v35, %s1848_s25 }
 0x472   :  { %v489_v18 = vpop.f32.mrf.mxu0 }
 0x473   :  { %v522_v20 = vsel %vm190_vm14, %v489_v18, -inf }
 0x474   :  { %523 = vmax.xlane.f32.xlu1 %v522_v20 }
 0x479   :  { %627 = vrot.lane.b32.xlu2 %v1975_v40, %s1848_s25 }
 0x47a   :  { %v491_v21 = vpop.f32.mrf.mxu0 }
 0x481   :  { %721 = vrot.lane.b32.xlu2 %v1972_v35, %s1849_s26 }
 0x489   :  { %744 = vrot.lane.b32.xlu2 %v1975_v40, %s1849_s26 }
 0x491   :  { %742 = vrot.lane.b32.xlu2 %v1975_v40, %s1850_s27 }
 0x49c   :  { %v518_v23 = vpop.xlane.xlu0 %517 }
 0x49d   :  { %v528_v24 = vsub.f32 %v443_v2, %v518_v23  ;;  %v521_v25 = vpop.xlane.xlu1 %520 }
 0x49e   :  { %v529_v28 = vsub.f32 %v466_v3, %v521_v25 }
 0x49f   :  { %v532_v27 = vmul.f32 1.442695, %v528_v24 }
 0x4a0   :  { %v534_v29 = vmul.f32 1.442695, %v529_v28 }
 0x4a1   :  { %1741 = vpow2.f32 %v532_v27 }
 0x4a2   :  { %1743 = vpow2.f32 %v534_v29 }
 0x4a7   :  { %v1742_v19 = vpop.eup %1741 }
 0x4a8   :  { %v540_v31 = vsel %vm190_vm14, %v1742_v19, 0.0  ;;  %v1744_v32 = vpop.eup %1743 }
 0x4a9   :  { %541 = vadd.xlane.f32.xlu1 %v540_v31  ;;  %v543_v36 = vsel %vm190_vm14, %v1744_v32, 0.0 }
 0x4af   :  { %v586_v33 = vpop.permute.xlu0 %585 }
 0x4b0   :  { %v591_v34 = vsel %vm335_vm15, %v586_v33, 0 }
 0x4b1   :  { %544 = vadd.xlane.f32.xlu1 %v543_v36  ;;  %600 = vmatpush.bf16.msrb.mxu3 %v591_v34 }
 0x4b5   :  { %713 = vmatpush.bf16.xpose.msra.mxu3 %v704_v37 }
 0x4b7   :  { %v674_v3 = vpop.permute.xlu0 %673 }
 0x4c4   :  { %v527_v38 = vpop.xlane.xlu2 %526 }
 0x4c5   :  { %v531_v46 = vsub.f32 %v512_v8, %v527_v38 }
 0x4c7   :  { %v538_v49 = vmul.f32 1.442695, %v531_v46 }
 0x4c9   :  { %1745 = vpow2.f32 %v538_v49 }
 0x4ca   :  { %696 = vrot.lane.b32.xlu1 %v1969_v30, %s1850_s27 }
 0x4cc   :  { %v676_v39 = vpop.permute.xlu2 %675 }
 0x4cd   :  { %v681_v41 = vsel %vm190_vm14, %v676_v39, 0 }
 0x4ce   :  { %690 = vmatpush.bf16.xpose.msra.mxu2 %v681_v41 }
 0x4cf   :  { %v1746_v55 = vpop.eup %1745 }
 0x4d0   :  { %v549_v58 = vsel %vm190_vm14, %v1746_v55, 0.0 }
 0x4d4   :  { %v607_v42 = vpop.permute.xlu2 %606 }
 0x4d5   :  { %v612_v43 = vsel %vm335_vm15, %v607_v42, 0 }
 0x4d6   :  { %621 = vmatpush.bf16.msrb.mxu0 %v612_v43 }
 0x4dc   :  { %v628_v44 = vpop.permute.xlu2 %627 }
 0x4dd   :  { %v633_v45 = vsel %vm335_vm15, %v628_v44, 0 }
 0x4de   :  { %642 = vmatpush.bf16.msra.mxu1 %v633_v45 }
 0x4e4   :  { %v722_v47 = vpop.permute.xlu2 %721 }
 0x4e5   :  { %v727_v48 = vsel %vm190_vm14, %v722_v47, 0 }
 0x4e6   :  { %736 = vmatpush.bf16.xpose.msra.mxu0 %v727_v48 }
 0x4e7   :  { %v524_v50 = vpop.xlane.xlu1 %523 }
 0x4e8   :  { %v530_v51 = vsub.f32 %v489_v18, %v524_v50 }
 0x4ea   :  { %v536_v52 = vmul.f32 1.442695, %v530_v51 }
 0x4ec   :  { %1747 = vpow2.f32 %v536_v52  ;;  %v745_v53 = vpop.permute.xlu2 %744 }
 0x4ed   :  { %v750_v54 = vsel %vm190_vm14, %v745_v53, 0 }
 0x4ee   :  { %759 = vmatpush.bf16.xpose.msrb.mxu1 %v750_v54 }
 0x4f2   :  { %v1748_v56 = vpop.eup %1747 }
 0x4f3   :  { %v546_v57 = vsel %vm190_vm14, %v1748_v56, 0.0 }
 0x4f4   :  { %547 = vadd.xlane.f32.xlu0 %v546_v57  ;;  %550 = vadd.xlane.f32.xlu1 %v549_v58  ;;  %v743_v15 = vpop.permute.xlu2 %742 }
 0x508   :  { %719 = vrot.lane.b32.xlu0 %v1972_v35, %s1850_s27 }
 0x51c   :  { %v542_v59 = vpop.xlane.xlu1 %541 }
 0x51d   :  { %1749 = vrcp.f32 %v542_v59 }
 0x523   :  { %v1750_v60 = vpop.eup %1749 }
 0x524   :  { %v556_v61 = vmul.f32 %v1750_v60, %v1742_v19  ;;  %v545_v62 = vpop.xlane.xlu1 %544 }
 0x525   :  { %1751 = vrcp.f32 %v545_v62 }
 0x526   :  { %v560_v63 = vpack.c.bf16 %v556_v61, %v556_v61 }
 0x528   :  { %1594 = vmatmul.msk.bf16.vlgmr.msrb.gmra.mxu2 %vm190_vm14, %v560_v63 }
 0x52b   :  { %v1752_v0 = vpop.eup %1751 }
 0x52c   :  { %v557_v1 = vmul.f32 %v1752_v0, %v1744_v32 }
 0x52e   :  { %v561_v2 = vpack.c.bf16 %v557_v1, %v557_v1 }
 0x530   :  { %1595 = vmatmul.msk.bf16.vlgmr.msrb.gmra.mxu3 %vm190_vm14, %v561_v2 }
 0x538   :  { %1598 = vmatmul.msk.bf16.vlgmr.msra.gmra.mxu2 %vm190_vm14, %v674_v3 }
 0x53c   :  { %v697_v4 = vpop.permute.xlu1 %696 }
 0x540   :  { %1599 = vmatmul.msk.bf16.vlgmr.msra.gmra.mxu3 %vm190_vm14, %v697_v4 }
 0x567   :  { %v548_v5 = vpop.xlane.xlu0 %547  ;;  %v551_v6 = vpop.xlane.xlu1 %550 }
 0x568   :  { %1753 = vrcp.f32 %v548_v5 }
 0x569   :  { %1755 = vrcp.f32 %v551_v6 }
 0x56e   :  { %v1754_v7 = vpop.eup %1753 }
 0x56f   :  { %v1756_v8 = vpop.eup %1755  ;;  %v558_v9 = vmul.f32 %v1754_v7, %v1748_v56 }
 0x570   :  { %v559_v10 = vmul.f32 %v1756_v8, %v1746_v55 }
 0x571   :  { %v562_v11 = vpack.c.bf16 %v558_v9, %v558_v9 }
 0x572   :  { %v563_v12 = vpack.c.bf16 %v559_v10, %v559_v10 }
 0x573   :  { %1596 = vmatmul.msk.bf16.vlgmr.msrb.gmra.mxu0 %vm190_vm14, %v562_v11 }
 0x574   :  { %1597 = vmatmul.msk.bf16.vlgmr.msra.gmra.mxu1 %vm190_vm14, %v563_v12 }
 0x57a   :  { %v720_v13 = vpop.permute.xlu0 %719 }
 0x583   :  { %1600 = vmatmul.msk.bf16.vlgmr.msra.gmra.mxu0 %vm190_vm14, %v720_v13 }
 0x584   :  { %1601 = vmatmul.msk.bf16.vlgmr.msrb.gmra.mxu1 %vm190_vm14, %v743_v15 }
 0x5ab   :  { %v2082_v16 = vpop.f32.mrf.mxu2 }
 0x5b3   :  { %v583_v17 = vpop.f32.mrf.mxu2  ;;  %v2084_v18 = vpop.f32.mrf.mxu3 }
 0x5bb   :  { %v604_v20 = vpop.f32.mrf.mxu3  ;;  %v692_v21 = vpop.f32.mrf.mxu2 }
 0x5bc   :  { %v765_v22 = vsel %vm190_vm14, %v692_v21, -inf }
 0x5bd   :  { %766 = vmax.xlane.f32.xlu1 %v765_v22 }
 0x5c3   :  { %v694_v23 = vpop.f32.mrf.mxu2  ;;  %v715_v24 = vpop.f32.mrf.mxu3 }
 0x5c4   :  { %v768_v25 = vsel %vm190_vm14, %v715_v24, -inf }
 0x5c5   :  { %769 = vmax.xlane.f32.xlu2 %v768_v25 }
 0x5cb   :  { %v717_v27 = vpop.f32.mrf.mxu3 }
 0x5d6   :  { %813 = vrot.lane.b32.xlu1 %v1966_v26, %s1851_s28 }
 0x5dd   :  { %834 = vrot.lane.b32.xlu2 %v1969_v30, %s1851_s28 }
 0x5f0   :  { %v2090_v28 = vpop.f32.mrf.mxu0 }
 0x5f1   :  { %v2092_v29 = vpop.f32.mrf.mxu1 }
 0x5f8   :  { %v625_v19 = vpop.f32.mrf.mxu0 }
 0x5f9   :  { %v646_v31 = vpop.f32.mrf.mxu1 }
 0x600   :  { %v738_v32 = vpop.f32.mrf.mxu0 }
 0x601   :  { %v761_v33 = vpop.f32.mrf.mxu1  ;;  %v771_v34 = vsel %vm190_vm14, %v738_v32, -inf }
 0x602   :  { %772 = vmax.xlane.f32.xlu1 %v771_v34  ;;  %v774_v36 = vsel %vm190_vm14, %v761_v33, -inf }
 0x603   :  { %775 = vmax.xlane.f32.xlu0 %v774_v36 }
 0x608   :  { %v740_v37 = vpop.f32.mrf.mxu0 }
 0x609   :  { %v763_v38 = vpop.f32.mrf.mxu1 }
 0x617   :  { %924 = vrot.lane.b32.xlu0 %v1966_v26, %s1852_s29 }
 0x61b   :  { %947 = vrot.lane.b32.xlu1 %v1969_v30, %s1852_s29 }
 0x61f   :  { %922 = vrot.lane.b32.xlu0 %v1966_v26, %s1853_s30 }
 0x627   :  { %945 = vrot.lane.b32.xlu0 %v1969_v30, %s1853_s30 }
 0x62f   :  { %855 = vrot.lane.b32.xlu0 %v1972_v35, %s1851_s28 }
 0x630   :  { %v767_v39 = vpop.xlane.xlu1 %766 }
 0x631   :  { %v777_v41 = vsub.f32 %v692_v21, %v767_v39 }
 0x633   :  { %v781_v42 = vmul.f32 1.442695, %v777_v41 }
 0x635   :  { %1757 = vpow2.f32 %v781_v42 }
 0x637   :  { %876 = vrot.lane.b32.xlu0 %v1975_v40, %s1851_s28 }
 0x638   :  { %v770_v43 = vpop.xlane.xlu2 %769 }
 0x639   :  { %v778_v44 = vsub.f32 %v715_v24, %v770_v43 }
 0x63b   :  { %v783_v45 = vmul.f32 1.442695, %v778_v44  ;;  %v1758_v47 = vpop.eup %1757 }
 0x63c   :  { %v789_v49 = vsel %vm190_vm14, %v1758_v47, 0.0 }
 0x63d   :  { %1759 = vpow2.f32 %v783_v45 }
 0x63f   :  { %970 = vrot.lane.b32.xlu0 %v1972_v35, %s1852_s29 }
 0x640   :  { %v835_v46 = vpop.permute.xlu2 %834 }
 0x641   :  { %v840_v48 = vsel %vm335_vm15, %v835_v46, 0 }
 0x642   :  { %849 = vmatpush.bf16.msrb.mxu3 %v840_v48 }
 0x643   :  { %v1760_v51 = vpop.eup %1759 }
 0x644   :  { %v792_v53 = vsel %vm190_vm14, %v1760_v51, 0.0 }
 0x645   :  { %790 = vadd.xlane.f32.xlu1 %v789_v49 }
 0x647   :  { %991 = vrot.lane.b32.xlu0 %v1975_v40, %s1853_s30 }
 0x648   :  { %v814_v50 = vpop.permute.xlu1 %813 }
 0x649   :  { %v819_v52 = vsel %vm335_vm15, %v814_v50, 0 }
 0x64a   :  { %828 = vmatpush.bf16.msrb.mxu2 %v819_v52 }
 0x64d   :  { %793 = vadd.xlane.f32.xlu1 %v792_v53 }
 0x675   :  { %v773_v54 = vpop.xlane.xlu1 %772 }
 0x676   :  { %v779_v55 = vsub.f32 %v738_v32, %v773_v54  ;;  %v776_v56 = vpop.xlane.xlu0 %775 }
 0x677   :  { %v780_v57 = vsub.f32 %v761_v33, %v776_v56 }
 0x678   :  { %v785_v58 = vmul.f32 1.442695, %v779_v55  ;;  %v649_v55 = vpack.c.bf16 %v2084_v18, %v2084_v18 }
 0x679   :  { %v787_v59 = vmul.f32 1.442695, %v780_v57 }
 0x67a   :  { %1761 = vpow2.f32 %v785_v58 }
 0x67b   :  { %1763 = vpow2.f32 %v787_v59 }
 0x680   :  { %v1762_v60 = vpop.eup %1761 }
 0x681   :  { %v1764_v61 = vpop.eup %1763  ;;  %v795_v62 = vsel %vm190_vm14, %v1762_v60, 0.0 }
 0x682   :  { %796 = vadd.xlane.f32.xlu1 %v795_v62  ;;  %v798_v63 = vsel %vm190_vm14, %v1764_v61, 0.0 }
 0x683   :  { %799 = vadd.xlane.f32.xlu2 %v798_v63 }
 0x689   :  { %v925_v0 = vpop.permute.xlu0 %924 }
 0x68a   :  { %v930_v1 = vsel %vm190_vm14, %v925_v0, 0 }
 0x68b   :  { %939 = vmatpush.bf16.xpose.msra.mxu2 %v930_v1 }
 0x68d   :  { %v948_v2 = vpop.permute.xlu1 %947 }
 0x68e   :  { %v953_v3 = vsel %vm190_vm14, %v948_v2, 0 }
 0x68f   :  { %962 = vmatpush.bf16.xpose.msra.mxu3 %v953_v3 }
 0x691   :  { %v923_v4 = vpop.permute.xlu0 %922 }
 0x699   :  { %v946_v5 = vpop.permute.xlu0 %945 }
 0x69b   :  { %968 = vrot.lane.b32.xlu2 %v1972_v35, %s1853_s30  ;;  %993 = vrot.lane.b32.xlu1 %v1975_v40, %s1852_s29 }
 0x6a1   :  { %v856_v6 = vpop.permute.xlu0 %855 }
 0x6a2   :  { %v861_v7 = vsel %vm335_vm15, %v856_v6, 0 }
 0x6a3   :  { %870 = vmatpush.bf16.msrb.mxu0 %v861_v7 }
 0x6a9   :  { %v877_v8 = vpop.permute.xlu0 %876 }
 0x6aa   :  { %v882_v9 = vsel %vm335_vm15, %v877_v8, 0 }
 0x6ab   :  { %891 = vmatpush.bf16.msra.mxu1 %v882_v9 }
 0x6b1   :  { %v971_v10 = vpop.permute.xlu0 %970 }
 0x6b2   :  { %v976_v11 = vsel %vm190_vm14, %v971_v10, 0 }
 0x6b3   :  { %985 = vmatpush.bf16.xpose.msra.mxu0 %v976_v11 }
 0x6b8   :  { %v791_v12 = vpop.xlane.xlu1 %790 }
 0x6b9   :  { %1765 = vrcp.f32 %v791_v12  ;;  %v992_v39 = vpop.permute.xlu0 %991 }
 0x6bf   :  { %v1766_v13 = vpop.eup %1765 }
 0x6c0   :  { %v805_v15 = vmul.f32 %v1766_v13, %v1758_v47  ;;  %v794_v17 = vpop.xlane.xlu1 %793 }
 0x6c1   :  { %1767 = vrcp.f32 %v794_v17 }
 0x6c2   :  { %v809_v20 = vpack.c.bf16 %v805_v15, %v805_v15 }
 0x6c4   :  { %1602 = vmatmul.msk.bf16.vlgmr.msrb.gmra.mxu2 %vm190_vm14, %v809_v20 }
 0x6c7   :  { %v1768_v21 = vpop.eup %1767 }
 0x6c8   :  { %v806_v22 = vmul.f32 %v1768_v21, %v1760_v51 }
 0x6ca   :  { %v810_v23 = vpack.c.bf16 %v806_v22, %v806_v22 }
 0x6cc   :  { %1603 = vmatmul.msk.bf16.vlgmr.msrb.gmra.mxu3 %vm190_vm14, %v810_v23 }
 0x6d4   :  { %1606 = vmatmul.msk.bf16.vlgmr.msra.gmra.mxu2 %vm190_vm14, %v923_v4 }
 0x6dc   :  { %1607 = vmatmul.msk.bf16.vlgmr.msra.gmra.mxu3 %vm190_vm14, %v946_v5 }
 0x6f5   :  { %v797_v24 = vpop.xlane.xlu1 %796 }
 0x6f6   :  { %1769 = vrcp.f32 %v797_v24  ;;  %v800_v25 = vpop.xlane.xlu2 %799 }
 0x6f7   :  { %1771 = vrcp.f32 %v800_v25 }
 0x6fc   :  { %v1770_v27 = vpop.eup %1769 }
 0x6fd   :  { %v1772_v19 = vpop.eup %1771  ;;  %v807_v31 = vmul.f32 %v1770_v27, %v1762_v60  ;;  %v650_v60 = vpack.c.bf16 %v2090_v28, %v2090_v28  ;;  %v648_v28 = vpack.c.bf16 %v2082_v16, %v2082_v16 }
 0x6fe   :  { %v808_v32 = vmul.f32 %v1772_v19, %v1764_v61  ;;  %v969_v38 = vpop.permute.xlu2 %968 }
 0x6ff   :  { %v811_v33 = vpack.c.bf16 %v807_v31, %v807_v31 }
 0x700   :  { %v812_v34 = vpack.c.bf16 %v808_v32, %v808_v32 }
 0x701   :  { %1604 = vmatmul.msk.bf16.vlgmr.msrb.gmra.mxu0 %vm190_vm14, %v811_v33 }
 0x702   :  { %1605 = vmatmul.msk.bf16.vlgmr.msra.gmra.mxu1 %vm190_vm14, %v812_v34 }
 0x70d   :  { %v994_v36 = vpop.permute.xlu1 %993 }
 0x70e   :  { %v999_v37 = vsel %vm190_vm14, %v994_v36, 0 }
 0x70f   :  { %1008 = vmatpush.bf16.xpose.msrb.mxu1 %v999_v37 }
 0x711   :  { %1608 = vmatmul.msk.bf16.vlgmr.msra.gmra.mxu0 %vm190_vm14, %v969_v38 }
 0x716   :  { %1609 = vmatmul.msk.bf16.vlgmr.msrb.gmra.mxu1 %vm190_vm14, %v992_v39 }
 0x747   :  { %v830_v41 = vpop.f32.mrf.mxu2 }
 0x748   :  { %v897_v8 = vpack.c.bf16 %v830_v41, %v830_v41 }
 0x74f   :  { %v832_v42 = vpop.f32.mrf.mxu2  ;;  %v851_v43 = vpop.f32.mrf.mxu3 }
 0x750   :  { %v898_v58 = vpack.c.bf16 %v851_v43, %v851_v43 }
 0x757   :  { %v853_v44 = vpop.f32.mrf.mxu3  ;;  %v941_v45 = vpop.f32.mrf.mxu2 }
 0x758   :  { %v1014_v46 = vsel %vm190_vm14, %v941_v45, -inf }
 0x759   :  { %1015 = vmax.xlane.f32.xlu0 %v1014_v46 }
 0x75f   :  { %v943_v47 = vpop.f32.mrf.mxu2  ;;  %v964_v48 = vpop.f32.mrf.mxu3 }
 0x760   :  { %v1017_v49 = vsel %vm190_vm14, %v964_v48, -inf }
 0x761   :  { %1018 = vmax.xlane.f32.xlu1 %v1017_v49 }
 0x767   :  { %v966_v50 = vpop.f32.mrf.mxu3 }
 0x77a   :  { %1062 = vrot.lane.b32.xlu1 %v1966_v26, %s1854_s10 }
 0x77e   :  { %v2138_v51 = vpop.f32.mrf.mxu0 }
 0x77f   :  { %v893_v52 = vpop.f32.mrf.mxu1 }
 0x780   :  { %v900_v61 = vpack.c.bf16 %v893_v52, %v893_v52 }
 0x782   :  { %1125 = vrot.lane.b32.xlu1 %v1975_v40, %s1854_s10 }
 0x786   :  { %v874_v53 = vpop.f32.mrf.mxu0 }
 0x787   :  { %v895_v54 = vpop.f32.mrf.mxu1 }
 0x78a   :  { %658 = vrot.lane.b32.xlu1 %v649_v55, %s1855_s11 }
 0x78e   :  { %v987_v56 = vpop.f32.mrf.mxu0 }
 0x78f   :  { %v1020_v57 = vsel %vm190_vm14, %v987_v56, -inf }
 0x790   :  { %1021 = vmax.xlane.f32.xlu2 %v1020_v57 }
 0x792   :  { %907 = vrot.lane.b32.xlu1 %v898_v58, %s1856_s12  ;;  %v651_v58 = vpack.c.bf16 %v2092_v29, %v2092_v29 }
 0x793   :  { %v1010_v26 = vpop.f32.mrf.mxu1 }
 0x794   :  { %v1023_v59 = vsel %vm190_vm14, %v1010_v26, -inf }
 0x795   :  { %1024 = vmax.xlane.f32.xlu0 %v1023_v59 }
 0x796   :  { %v989_v40 = vpop.f32.mrf.mxu0 }
 0x79a   :  { %660 = vrot.lane.b32.xlu1 %v650_v60, %s1855_s11 }
 0x79b   :  { %v1012_v18 = vpop.f32.mrf.mxu1 }
 0x7a2   :  { %911 = vrot.lane.b32.xlu1 %v900_v61, %s1856_s12 }
 0x7cc   :  { %v1016_v62 = vpop.xlane.xlu0 %1015 }
 0x7cd   :  { %v1026_v63 = vsub.f32 %v941_v45, %v1016_v62 }
 0x7cf   :  { %v1030_v0 = vmul.f32 1.442695, %v1026_v63  ;;  %v899_v63 = vpack.c.bf16 %v2138_v51, %v2138_v51  ;;  %v1682_v51 = vld [vmem:[%s2312_s3] sm:$0xff] }
 0x7d1   :  { %1773 = vpow2.f32 %v1030_v0 }
 0x7d4   :  { %v1019_v3 = vpop.xlane.xlu1 %1018 }
 0x7d5   :  { %v1027_v16 = vsub.f32 %v964_v48, %v1019_v3 }
 0x7d7   :  { %v1774_v1 = vpop.eup %1773  ;;  %v1032_v15 = vmul.f32 1.442695, %v1027_v16  ;;  %v1813_v16 = vld [vmem:[%s2309_s0] sm:$0xff] }
 0x7d8   :  { %v1038_v2 = vsel %vm190_vm14, %v1774_v1, 0.0 }
 0x7d9   :  { %1039 = vadd.xlane.f32.xlu0 %v1038_v2 }
 0x7ec   :  { %v1063_v4 = vpop.permute.xlu1 %1062 }
 0x7ed   :  { %v1068_v5 = vsel %vm335_vm15, %v1063_v4, 0  ;;  %1083 = vrot.lane.b32.xlu0 %v1969_v30, %s1854_s10  ;;  %v1683_v4 = vld [vmem:[%s2312_s3 + $0x8] sm:$0xff] }
 0x7ee   :  { %1077 = vmatpush.bf16.msrb.mxu2 %v1068_v5 }
 0x7f2   :  { %1217 = vmatpush.bf16.msra.mxu2 %v1683_v4 }
 0x7f4   :  { %v1126_v6 = vpop.permute.xlu1 %1125 }
 0x7f5   :  { %v1131_v7 = vsel %vm335_vm15, %v1126_v6, 0  ;;  %656 = vrot.lane.b32.xlu0 %v648_v28, %s1855_s11 }
 0x7f6   :  { %1140 = vmatpush.bf16.msra.mxu1 %v1131_v7  ;;  %1218 = vmatpush.bf16.msra.mxu2 %v1682_v51 }
 0x7fc   :  { %v659_v9 = vpop.permute.xlu1 %658 }
 0x7fd   :  { %670 = vst.msk [vmem:[#allocation2 + $0x4] sm:$0xf] %vm668_vm2, %v659_v9  ;;  %905 = vrot.lane.b32.xlu0 %v897_v8, %s1856_s12 }
 0x803   :  { %v1022_v17 = vpop.xlane.xlu2 %1021 }
 0x804   :  { %v908_v10 = vpop.permute.xlu1 %907  ;;  %v1028_v21 = vsub.f32 %v987_v56, %v1022_v17 }
 0x805   :  { %919 = vst.msk [vmem:[#allocation2 + $0x4] sm:$0xf] %vm917_vm3, %v908_v10  ;;  %v1712_v10 = vld [vmem:[%s2313_s4] ss:$0 sm:$0xff]  ;;  %s1858_s4 = smov [#allocation3]  }
 0x806   :  { %v1034_v23 = vmul.f32 1.442695, %v1028_v21 }
 0x808   :  { %v1025_v30 = vpop.xlane.xlu0 %1024 }
 0x809   :  { %v1029_v11 = vsub.f32 %v1010_v26, %v1025_v30 }
 0x80b   :  { %v1036_v12 = vmul.f32 1.442695, %v1029_v11 }
 0x80c   :  { %v661_v13 = vpop.permute.xlu1 %660 }
 0x80d   :  { %1775 = vpow2.f32 %v1036_v12  ;;  %671 = vst.msk [vmem:[#allocation2 + $0x8] sm:$0xf] %vm668_vm2, %v661_v13 }
 0x80e   :  { %1777 = vpow2.f32 %v1032_v15 }
 0x80f   :  { %1779 = vpow2.f32 %v1034_v23 }
 0x813   :  { %v1776_v20 = vpop.eup %1775 }
 0x814   :  { %v1047_v22 = vsel %vm190_vm14, %v1776_v20, 0.0  ;;  %v1778_v24 = vpop.eup %1777  ;;  %v912_v3 = vpop.permute.xlu1 %911 }
 0x815   :  { %1048 = vadd.xlane.f32.xlu2 %v1047_v22  ;;  %v1041_v25 = vsel %vm190_vm14, %v1778_v24, 0.0  ;;  %v1780_v27 = vpop.eup %1779 }
 0x816   :  { %v1044_v19 = vsel %vm190_vm14, %v1780_v27, 0.0 }
 0x81d   :  { %1042 = vadd.xlane.f32.xlu2 %v1041_v25  ;;  %v1815_v25 = vld [vmem:[%s2309_s0 + $0x10] sm:$0xff] }
 0x825   :  { %1045 = vadd.xlane.f32.xlu2 %v1044_v19 }
 0x83d   :  { %1104 = vrot.lane.b32.xlu2 %v1972_v35, %s1854_s10 }
 0x84c   :  { %v1040_v31 = vpop.xlane.xlu0 %1039 }
 0x84d   :  { %1781 = vrcp.f32 %v1040_v31 }
 0x853   :  { %v1782_v32 = vpop.eup %1781 }
 0x854   :  { %v1054_v33 = vmul.f32 %v1782_v32, %v1774_v1 }
 0x856   :  { %v1058_v34 = vpack.c.bf16 %v1054_v33, %v1054_v33  ;;  %v1816_v33 = vld [vmem:[%s2309_s0 + $0x18] sm:$0xff] }
 0x858   :  { %1610 = vmatmul.msk.bf16.vlgmr.msrb.gmra.mxu2 %vm190_vm14, %v1058_v34 }
 0x85f   :  { %v1084_v36 = vpop.permute.xlu0 %1083 }
 0x860   :  { %v1089_v37 = vsel %vm335_vm15, %v1084_v36, 0 }
 0x861   :  { %1098 = vmatpush.bf16.msrb.mxu3 %v1089_v37 }
 0x867   :  { %v657_v38 = vpop.permute.xlu0 %656 }
 0x868   :  { %669 = vst.msk [vmem:[#allocation2] sm:$0xf] %vm668_vm2, %v657_v38 }
 0x86f   :  { %v906_v39 = vpop.permute.xlu0 %905 }
 0x870   :  { %918 = vst.msk [vmem:[#allocation2] sm:$0xf] %vm917_vm3, %v906_v39 }
 0x888   :  { %v1049_v41 = vpop.xlane.xlu2 %1048 }
 0x889   :  { %1783 = vrcp.f32 %v1049_v41 }
 0x88f   :  { %v1784_v35 = vpop.eup %1783 }
 0x890   :  { %v1057_v42 = vmul.f32 %v1784_v35, %v1776_v20  ;;  %v1043_v43 = vpop.xlane.xlu2 %1042  ;;  %v1814_v20 = vld [vmem:[%s2309_s0 + $0x8] sm:$0xff]  ;;  %s1859_s0 = smov 128  }
 0x891   :  { %1785 = vrcp.f32 %v1043_v43 }
 0x892   :  { %v1061_v44 = vpack.c.bf16 %v1057_v42, %v1057_v42 }
 0x894   :  { %1613 = vmatmul.msk.bf16.vlgmr.msra.gmra.mxu1 %vm190_vm14, %v1061_v44 }
 0x897   :  { %v1786_v45 = vpop.eup %1785 }
 0x898   :  { %v1055_v46 = vmul.f32 %v1786_v45, %v1778_v24  ;;  %v1046_v47 = vpop.xlane.xlu2 %1045 }
 0x899   :  { %1787 = vrcp.f32 %v1046_v47 }
 0x89a   :  { %v1059_v48 = vpack.c.bf16 %v1055_v46, %v1055_v46 }
 0x89c   :  { %1611 = vmatmul.msk.bf16.vlgmr.msrb.gmra.mxu3 %vm190_vm14, %v1059_v48 }
 0x89f   :  { %v1788_v49 = vpop.eup %1787 }
 0x8a0   :  { %v1056_v50 = vmul.f32 %v1788_v49, %v1780_v27  ;;  %v1105_v52 = vpop.permute.xlu2 %1104 }
 0x8a1   :  { %v1110_v53 = vsel %vm335_vm15, %v1105_v52, 0 }
 0x8a2   :  { %v1060_v54 = vpack.c.bf16 %v1056_v50, %v1056_v50  ;;  %1119 = vmatpush.bf16.msrb.mxu0 %v1110_v53 }
 0x8a5   :  { %1612 = vmatmul.msk.bf16.vlgmr.msrb.gmra.mxu0 %vm190_vm14, %v1060_v54 }
 0x8db   :  { %v1079_v55 = vpop.f32.mrf.mxu2 }
 0x8dc   :  { %v1146_v56 = vpack.c.bf16 %v1079_v55, %v1079_v55 }
 0x8de   :  { %1154 = vrot.lane.b32.xlu0 %v1146_v56, %s1857_s13 }
 0x8e3   :  { %v1081_v57 = vpop.f32.mrf.mxu2 }
 0x8e6   :  { %662 = vrot.lane.b32.xlu0 %v651_v58, %s1855_s11  ;;  %v1685_v58 = vld [vmem:[%s2314_s5 + $0x8] sm:$0xff] }
 0x8e7   :  { %1364 = vmatpush.bf16.msra.mxu3 %v1685_v58 }
 0x911   :  { %v1142_v26 = vpop.f32.mrf.mxu1 }
 0x912   :  { %v1149_v1 = vpack.c.bf16 %v1142_v26, %v1142_v26  ;;  %v1684_v26 = vld [vmem:[%s2314_s5] sm:$0xff] }
 0x913   :  { %1365 = vmatpush.bf16.msra.mxu3 %v1684_v26 }
 0x919   :  { %v1144_v59 = vpop.f32.mrf.mxu1 }
 0x91f   :  { %v1100_v40 = vpop.f32.mrf.mxu3 }
 0x920   :  { %v1147_v60 = vpack.c.bf16 %v1100_v40, %v1100_v40 }
 0x922   :  { %v1121_v18 = vpop.f32.mrf.mxu0  ;;  %1156 = vrot.lane.b32.xlu2 %v1147_v60, %s1857_s13 }
 0x923   :  { %v1148_v61 = vpack.c.bf16 %v1121_v18, %v1121_v18 }
 0x925   :  { %1158 = vrot.lane.b32.xlu0 %v1148_v61, %s1857_s13 }
 0x927   :  { %v1102_v62 = vpop.f32.mrf.mxu3 }
 0x92a   :  { %v1123_v0 = vpop.f32.mrf.mxu0  ;;  %909 = vrot.lane.b32.xlu2 %v899_v63, %s1856_s12 }
 0x932   :  { %1160 = vrot.lane.b32.xlu2 %v1149_v1, %s1857_s13 }
 0x950   :  { %v1155_v29 = vpop.permute.xlu0 %1154 }
 0x951   :  { %1167 = vst.msk [vmem:[#allocation2] sm:$0xf] %vm1166_vm4, %v1155_v29 }
 0x958   :  { %v663_v2 = vpop.permute.xlu0 %662 }
 0x959   :  { %672 = vst.msk [vmem:[#allocation2 + $0xc] sm:$0xf] %vm668_vm2, %v663_v2 }
 0x95a   :  { %921 = vst.msk [vmem:[#allocation2 + $0xc] sm:$0xf] %vm917_vm3, %v912_v3 }
 0x97c   :  { %v1157_v5 = vpop.permute.xlu2 %1156 }
 0x97d   :  { %1168 = vst.msk [vmem:[#allocation2 + $0x4] sm:$0xf] %vm1166_vm4, %v1157_v5 }
 0x984   :  { %v910_v28 = vpop.permute.xlu2 %909  ;;  %v1680_v6 = vld [vmem:[#allocation2] sm:$0xff] }
 0x985   :  { %920 = vst.msk [vmem:[#allocation2 + $0x8] sm:$0xf] %vm917_vm3, %v910_v28  ;;  %1630 = vmatmul.msk.bf16.vlgmr.msra.gmra.mxu2 %vm38_vm0, %v1680_v6 }
 0x98c   :  { %v1161_v7 = vpop.permute.xlu2 %1160 }
 0x98d   :  { %1170 = vst.msk [vmem:[#allocation2 + $0xc] sm:$0xf] %vm1166_vm4, %v1161_v7 }
 0x997   :  { %v1159_v8 = vpop.permute.xlu0 %1158 }
 0x998   :  { %1169 = vst.msk [vmem:[#allocation2 + $0x8] sm:$0xf] %vm1166_vm4, %v1159_v8 }
 0x99f   :  { %v1681_v9 = vld [vmem:[#allocation2 + $0x8] sm:$0xff] }
 0x9a0   :  { %1631 = vmatmul.msk.bf16.gmra.mxu2 %vm38_vm0, %v1681_v9 }
 0xa08   :  { %v1220_v30 = vpop.f32.mrf.mxu2 }
 0xa09   :  { %v1221_v11 = vadd.f32 %v1712_v10, %v1220_v30 }
 0xa0b   :  { %v2204_v12 = vadd.f32 %v1813_v16, %v1221_v11 }
 0xa0d   :  { %v1234_v13 = vsel %vm38_vm0, %v2204_v12, 0.0 }
 0xa0e   :  { %1235 = vadd.xlane.f32.xlu1 %v1234_v13 }
 0xa10   :  { %v1222_v15 = vpop.f32.mrf.mxu2 }
 0xa11   :  { %v1223_v17 = vadd.f32 %v1712_v10, %v1222_v15 }
 0xa13   :  { %v2211_v21 = vadd.f32 %v1814_v20, %v1223_v17 }
 0xa15   :  { %v1237_v22 = vsel %vm38_vm0, %v2211_v21, 0.0 }
 0xa16   :  { %1238 = vadd.xlane.f32.xlu0 %v1237_v22 }
 0xa23   :  { %v1225_v23 = vpop.f32.mrf.mxu2 }
 0xa24   :  { %v1226_v24 = vadd.f32 %v1712_v10, %v1225_v23 }
 0xa26   :  { %v2218_v27 = vadd.f32 %v1815_v25, %v1226_v24 }
 0xa28   :  { %v1240_v19 = vsel %vm38_vm0, %v2218_v27, 0.0 }
 0xa29   :  { %1241 = vadd.xlane.f32.xlu2 %v1240_v19 }
 0xa2b   :  { %v1227_v31 = vpop.f32.mrf.mxu2 }
 0xa2c   :  { %v1228_v32 = vadd.f32 %v1712_v10, %v1227_v31 }
 0xa2e   :  { %v2225_v34 = vadd.f32 %v1816_v33, %v1228_v32 }
 0xa30   :  { %v1243_v36 = vsel %vm38_vm0, %v2225_v34, 0.0 }
 0xa31   :  { %1244 = vadd.xlane.f32.xlu1 %v1243_v36 }
 0xa81   :  { %v1236_v37 = vpop.xlane.xlu1 %1235 }
 0xa82   :  { %v1246_v38 = vmul.f32 %v1236_v37, %v1926_v14 }
 0xa84   :  { %v1250_v39 = vsub.f32 %v2204_v12, %v1246_v38 }
 0xa86   :  { %v1254_v41 = vmul.f32 %v1250_v39, %v1250_v39 }
 0xa88   :  { %v1258_v35 = vsel %vm38_vm0, %v1254_v41, 0.0 }
 0xa89   :  { %1259 = vadd.xlane.f32.xlu0 %v1258_v35  ;;  %v1239_v42 = vpop.xlane.xlu0 %1238 }
 0xa8a   :  { %v1247_v43 = vmul.f32 %v1239_v42, %v1926_v14 }
 0xa8c   :  { %v1251_v44 = vsub.f32 %v2211_v21, %v1247_v43 }
 0xa8e   :  { %v1255_v45 = vmul.f32 %v1251_v44, %v1251_v44 }
 0xa90   :  { %v1261_v46 = vsel %vm38_vm0, %v1255_v45, 0.0  ;;  %v1693_v45 = vld [vmem:[%s2316_s7 + $0x38] sm:$0xff] }
 0xa91   :  { %1262 = vadd.xlane.f32.xlu2 %v1261_v46  ;;  %1527 = vmatpush.bf16.msra.mxu0 %v1693_v45  ;;  %v1692_v46 = vld [vmem:[%s2316_s7 + $0x30] sm:$0xff] }
 0xa95   :  { %1528 = vmatpush.bf16.msra.mxu0 %v1692_v46 }
 0xa9c   :  { %v1242_v47 = vpop.xlane.xlu2 %1241 }
 0xa9d   :  { %v1248_v48 = vmul.f32 %v1242_v47, %v1926_v14  ;;  %v1691_v47 = vld [vmem:[%s2316_s7 + $0x28] sm:$0xff] }
 0xa9e   :  { %1529 = vmatpush.bf16.msra.mxu0 %v1691_v47 }
 0xa9f   :  { %v2237_v49 = vsub.f32 %v2218_v27, %v1248_v48  ;;  %v1690_v48 = vld [vmem:[%s2316_s7 + $0x20] sm:$0xff] }
 0xaa1   :  { %v1256_v50 = vmul.f32 %v2237_v49, %v2237_v49 }
 0xaa2   :  { %1530 = vmatpush.bf16.msra.mxu0 %v1690_v48 }
 0xaa3   :  { %v1264_v52 = vsel %vm38_vm0, %v1256_v50, 0.0  ;;  %v1689_v50 = vld [vmem:[%s2316_s7 + $0x18] sm:$0xff] }
 0xaa4   :  { %v1245_v53 = vpop.xlane.xlu1 %1244  ;;  %1265 = vadd.xlane.f32.xlu1 %v1264_v52 }
 0xaa5   :  { %v1249_v54 = vmul.f32 %v1245_v53, %v1926_v14 }
 0xaa6   :  { %1531 = vmatpush.bf16.msra.mxu0 %v1689_v50 }
 0xaa7   :  { %v2244_v55 = vsub.f32 %v2225_v34, %v1249_v54  ;;  %v1688_v54 = vld [vmem:[%s2316_s7 + $0x10] sm:$0xff] }
 0xaa9   :  { %v1257_v56 = vmul.f32 %v2244_v55, %v2244_v55 }
 0xaaa   :  { %1532 = vmatpush.bf16.msra.mxu0 %v1688_v54 }
 0xaab   :  { %v1267_v57 = vsel %vm38_vm0, %v1257_v56, 0.0 }
 0xaac   :  { %1268 = vadd.xlane.f32.xlu0 %v1267_v57  ;;  %v1687_v57 = vld [vmem:[%s2316_s7 + $0x8] sm:$0xff] }
 0xaae   :  { %1533 = vmatpush.bf16.msra.mxu0 %v1687_v57 }
 0xafc   :  { %v1260_v59 = vpop.xlane.xlu0 %1259 }
 0xafd   :  { %v1270_v40 = vmul.f32 %v1260_v59, %v1926_v14  ;;  %v1686_v59 = vld [vmem:[%s2316_s7] sm:$0xff] }
 0xafe   :  { %1534 = vmatpush.bf16.msra.mxu0 %v1686_v59 }
 0xaff   :  { %v1274_v60 = vadd.f32 1e-05, %v1270_v40 }
 0xb01   :  { %1789 = vrsqrt.f32 %v1274_v60  ;;  %vm1284_vm6 = vweird.f32 %v1274_v60 }
 0xb04   :  { %v1263_v18 = vpop.xlane.xlu2 %1262 }
 0xb05   :  { %v1271_v61 = vmul.f32 %v1263_v18, %v1926_v14 }
 0xb07   :  { %v1790_v62 = vpop.eup %1789  ;;  %v1275_v63 = vadd.f32 1e-05, %v1271_v61 }
 0xb08   :  { %v1279_v0 = vmul.f32 %v1790_v62, %v1274_v60  ;;  %vm1285_vm5 = vweird.f32 %v1790_v62 }
 0xb09   :  { %1791 = vrsqrt.f32 %v1275_v63  ;;  %vm1286_vm8 = vmor %vm1284_vm6, %vm1285_vm5  ;;  %vm1294_vm9 = vweird.f32 %v1275_v63 }
 0xb0a   :  { %v1280_v1 = vmul.f32 %v1790_v62, %v1279_v0 }
 0xb0c   :  { %v1281_v29 = vmul.f32 0.5, %v1280_v1 }
 0xb0e   :  { %v1282_v3 = vsub.f32 1.5, %v1281_v29 }
 0xb0f   :  { %v1792_v2 = vpop.eup %1791 }
 0xb10   :  { %v1289_v4 = vmul.f32 %v1792_v2, %v1275_v63  ;;  %v1283_v5 = vmul.f32 %v1790_v62, %v1282_v3  ;;  %vm1295_vm7 = vweird.f32 %v1792_v2 }
 0xb11   :  { %vm1296_vm10 = vmor %vm1294_vm9, %vm1295_vm7 }
 0xb12   :  { %v1290_v51 = vmul.f32 %v1792_v2, %v1289_v4  ;;  %v1287_v8 = vsel %vm1286_vm8, %v1790_v62, %v1283_v5 }
 0xb13   :  { %v1318_v16 = vmul.f32 %v1287_v8, %v1250_v39 }
 0xb14   :  { %v1291_v28 = vmul.f32 0.5, %v1290_v51 }
 0xb16   :  { %v1292_v6 = vsub.f32 1.5, %v1291_v28 }
 0xb17   :  { %v1266_v7 = vpop.xlane.xlu1 %1265 }
 0xb18   :  { %v1293_v9 = vmul.f32 %v1792_v2, %v1292_v6  ;;  %v1272_v10 = vmul.f32 %v1266_v7, %v1926_v14 }
 0xb1a   :  { %v1297_v30 = vsel %vm1296_vm10, %v1792_v2, %v1293_v9  ;;  %v1276_v11 = vadd.f32 1e-05, %v1272_v10 }
 0xb1b   :  { %v1319_v13 = vmul.f32 %v1297_v30, %v1251_v44 }
 0xb1c   :  { %1793 = vrsqrt.f32 %v1276_v11  ;;  %vm1304_vm12 = vweird.f32 %v1276_v11 }
 0xb1d   :  { %v1322_v15 = vpack.c.bf16 %v1319_v13, %v1318_v16 }
 0xb1f   :  { %v1269_v17 = vpop.xlane.xlu0 %1268  ;;  %1640 = vmatmul.msk.bf16.vlgmr.msra.gmra.mxu3 %vm38_vm0, %v1322_v15 }
 0xb20   :  { %v1273_v20 = vmul.f32 %v1269_v17, %v1926_v14 }
 0xb22   :  { %v1794_v22 = vpop.eup %1793  ;;  %v1277_v23 = vadd.f32 1e-05, %v1273_v20 }
 0xb23   :  { %v1299_v24 = vmul.f32 %v1794_v22, %v1276_v11  ;;  %vm1305_vm11 = vweird.f32 %v1794_v22 }
 0xb24   :  { %1795 = vrsqrt.f32 %v1277_v23  ;;  %vm1306_vm14 = vmor %vm1304_vm12, %vm1305_vm11  ;;  %vm1314_vm15 = vweird.f32 %v1277_v23 }
 0xb25   :  { %v1300_v25 = vmul.f32 %v1794_v22, %v1299_v24 }
 0xb27   :  { %v1301_v19 = vmul.f32 0.5, %v1300_v25 }
 0xb29   :  { %v1302_v32 = vsub.f32 1.5, %v1301_v19 }
 0xb2a   :  { %v1796_v31 = vpop.eup %1795 }
 0xb2b   :  { %v1309_v33 = vmul.f32 %v1796_v31, %v1277_v23  ;;  %v1303_v37 = vmul.f32 %v1794_v22, %v1302_v32  ;;  %vm1315_vm13 = vweird.f32 %v1796_v31 }
 0xb2c   :  { %vm1316_vm1 = vmor %vm1314_vm15, %vm1315_vm13 }
 0xb2d   :  { %v1310_v36 = vmul.f32 %v1796_v31, %v1309_v33  ;;  %v1307_v14 = vsel %vm1306_vm14, %v1794_v22, %v1303_v37 }
 0xb2e   :  { %v1320_v42 = vmul.f32 %v1307_v14, %v2237_v49  ;;  %v1713_v49 = vld [vmem:[%s2315_s6] ss:$0 sm:$0xff] }
 0xb2f   :  { %v1311_v38 = vmul.f32 0.5, %v1310_v36 }
 0xb31   :  { %v1312_v39 = vsub.f32 1.5, %v1311_v38 }
 0xb33   :  { %v1313_v41 = vmul.f32 %v1796_v31, %v1312_v39 }
 0xb35   :  { %v1317_v35 = vsel %vm1316_vm1, %v1796_v31, %v1313_v41 }
 0xb36   :  { %v1321_v43 = vmul.f32 %v1317_v35, %v2244_v55 }
 0xb38   :  { %v1323_v44 = vpack.c.bf16 %v1321_v43, %v1320_v42 }
 0xb3a   :  { %1641 = vmatmul.msk.bf16.gmra.mxu3 %vm38_vm0, %v1323_v44 }
 0xba2   :  { %v1367_v52 = vpop.f32.mrf.mxu3 }
 0xba3   :  { %v1368_v53 = vadd.f32 %v1713_v49, %v1367_v52 }
 0xba5   :  { %v1642_v55 = vmul.f32 -1.702, %v1368_v53 }
 0xba7   :  { %v1385_v56 = vmul.f32 1.442695, %v1642_v55 }
 0xba9   :  { %1797 = vpow2.f32 %v1385_v56 }
 0xbaa   :  { %v1369_v58 = vpop.f32.mrf.mxu3 }
 0xbab   :  { %v1370_v26 = vadd.f32 %v1713_v49, %v1369_v58 }
 0xbad   :  { %v1643_v40 = vmul.f32 -1.702, %v1370_v26 }
 0xbaf   :  { %v1798_v60 = vpop.eup %1797  ;;  %v1387_v18 = vmul.f32 1.442695, %v1643_v40 }
 0xbb0   :  { %v1393_v61 = vadd.f32 1.0, %v1798_v60 }
 0xbb1   :  { %1799 = vpow2.f32 %v1387_v18 }
 0xbb2   :  { %1801 = vrcp.f32 %v1393_v61  ;;  %v1408_v7 = vand.u32 2147483648, %v1393_v61  ;;  %vm1402_vm3 = vweird.f32 %v1393_v61  ;;  %v1406_v9 = vand.u32 2147483647, %v1393_v61 }
 0xbb4   :  { %v1409_v17 = vor.u32 1.1754944e-38, %v1408_v7  ;;  %vm1407_vm6 = vcmp.eq.f32.partialorder %v1406_v9, 8.507059e+37 }
 0xbb7   :  { %v1800_v62 = vpop.eup %1799 }
 0xbb8   :  { %v1802_v63 = vpop.eup %1801  ;;  %v1394_v0 = vadd.f32 1.0, %v1800_v62  ;;  %v1714_v62 = vld [vmem:[%s2317_s8] ss:$0 sm:$0xff]  ;;  %s1558_s8 = sshll.u32 %s1858_s4, 4  ;;  %s1559_s8 = int_to_ptr.vmem [resolvable:$true] %s1558_s8 }
 0xbb9   :  { %v1398_v1 = vmul.f32 %v1802_v63, %v1393_v61  ;;  %vm1403_vm2 = vweird.f32 %v1802_v63 }
 0xbba   :  { %1803 = vrcp.f32 %v1394_v0  ;;  %vm1404_vm4 = vmor %vm1402_vm3, %vm1403_vm2  ;;  %v1423_v30 = vand.u32 2147483648, %v1394_v0  ;;  %v1421_v13 = vand.u32 2147483647, %v1394_v0  ;;  %vm1417_vm7 = vweird.f32 %v1394_v0 }
 0xbbb   :  { %v1399_v29 = vsub.f32 1.0, %v1398_v1 }
 0xbbc   :  { %v1424_v24 = vor.u32 1.1754944e-38, %v1423_v30  ;;  %vm1422_vm9 = vcmp.eq.f32.partialorder %v1421_v13, 8.507059e+37 }
 0xbbd   :  { %v1400_v2 = vmul.f32 %v1802_v63, %v1399_v29  ;;  %v1372_v3 = vpop.f32.mrf.mxu3  ;;  %v1329_v29 = vadd.f32 %v1714_v62, %v2211_v21 }
 0xbbe   :  { %v2290_v4 = vadd.f32 %v1713_v49, %v1372_v3 }
 0xbbf   :  { %v1401_v28 = vadd.f32 %v1802_v63, %v1400_v2 }
 0xbc0   :  { %v1804_v51 = vpop.eup %1803  ;;  %v1644_v5 = vmul.f32 -1.702, %v2290_v4 }
 0xbc1   :  { %v1413_v6 = vmul.f32 %v1804_v51, %v1394_v0  ;;  %v1405_v11 = vsel %vm1404_vm4, %v1802_v63, %v1401_v28  ;;  %vm1418_vm5 = vweird.f32 %v1804_v51  ;;  %v1328_v63 = vadd.f32 %v1714_v62, %v2204_v12 }
 0xbc2   :  { %v1389_v8 = vmul.f32 1.442695, %v1644_v5  ;;  %v1410_v23 = vsel %vm1407_vm6, %v1409_v17, %v1405_v11  ;;  %vm1419_vm8 = vmor %vm1417_vm7, %vm1418_vm5  ;;  %v1331_v12 = vadd.f32 %v1714_v62, %v2225_v34 }
 0xbc3   :  { %v1414_v10 = vsub.f32 1.0, %v1413_v6  ;;  %v1457_v36 = vmul.f32 %v1410_v23, %v1368_v53 }
 0xbc4   :  { %1805 = vpow2.f32 %v1389_v8 }
 0xbc5   :  { %v1415_v16 = vmul.f32 %v1804_v51, %v1414_v10  ;;  %v1374_v15 = vpop.f32.mrf.mxu3 }
 0xbc6   :  { %v1375_v20 = vadd.f32 %v1713_v49, %v1374_v15 }
 0xbc7   :  { %v1416_v22 = vadd.f32 %v1804_v51, %v1415_v16 }
 0xbc8   :  { %v1645_v25 = vmul.f32 -1.702, %v1375_v20 }
 0xbc9   :  { %v1420_v19 = vsel %vm1419_vm8, %v1804_v51, %v1416_v22 }
 0xbca   :  { %v1806_v31 = vpop.eup %1805  ;;  %v1425_v32 = vsel %vm1422_vm9, %v1424_v24, %v1420_v19  ;;  %v1391_v33 = vmul.f32 1.442695, %v1645_v25 }
 0xbcb   :  { %v1458_v37 = vmul.f32 %v1425_v32, %v1370_v26  ;;  %v1395_v38 = vadd.f32 1.0, %v1806_v31 }
 0xbcc   :  { %1807 = vpow2.f32 %v1391_v33 }
 0xbcd   :  { %v1461_v39 = vpack.c.bf16 %v1458_v37, %v1457_v36  ;;  %1809 = vrcp.f32 %v1395_v38  ;;  %v1438_v48 = vand.u32 2147483648, %v1395_v38  ;;  %vm1432_vm11 = vweird.f32 %v1395_v38 }
 0xbce   :  { %v1436_v49 = vand.u32 2147483647, %v1395_v38 }
 0xbcf   :  { %1535 = vmatmul.bf16.vlgmr.msra.gmra.mxu0 %v1461_v39  ;;  %v1439_v56 = vor.u32 1.1754944e-38, %v1438_v48 }
 0xbd0   :  { %vm1437_vm14 = vcmp.eq.f32.partialorder %v1436_v49, 8.507059e+37 }
 0xbd2   :  { %v1808_v41 = vpop.eup %1807 }
 0xbd3   :  { %v1810_v14 = vpop.eup %1809  ;;  %v1396_v35 = vadd.f32 1.0, %v1808_v41 }
 0xbd4   :  { %v1428_v42 = vmul.f32 %v1810_v14, %v1395_v38  ;;  %vm1433_vm10 = vweird.f32 %v1810_v14 }
 0xbd5   :  { %1811 = vrcp.f32 %v1396_v35  ;;  %vm1434_vm12 = vmor %vm1432_vm11, %vm1433_vm10  ;;  %v1453_v52 = vand.u32 2147483648, %v1396_v35  ;;  %v1451_v55 = vand.u32 2147483647, %v1396_v35  ;;  %vm1447_vm15 = vweird.f32 %v1396_v35 }
 0xbd6   :  { %v1429_v43 = vsub.f32 1.0, %v1428_v42 }
 0xbd7   :  { %v1454_v26 = vor.u32 1.1754944e-38, %v1453_v52  ;;  %vm1452_vm2 = vcmp.eq.f32.partialorder %v1451_v55, 8.507059e+37 }
 0xbd8   :  { %v1430_v44 = vmul.f32 %v1810_v14, %v1429_v43 }
 0xbda   :  { %v1431_v46 = vadd.f32 %v1810_v14, %v1430_v44 }
 0xbdb   :  { %v1812_v45 = vpop.eup %1811 }
 0xbdc   :  { %v1443_v47 = vmul.f32 %v1812_v45, %v1396_v35  ;;  %v1435_v53 = vsel %vm1434_vm12, %v1810_v14, %v1431_v46  ;;  %vm1448_vm13 = vweird.f32 %v1812_v45 }
 0xbdd   :  { %v1440_v58 = vsel %vm1437_vm14, %v1439_v56, %v1435_v53  ;;  %vm1449_vm1 = vmor %vm1447_vm15, %vm1448_vm13 }
 0xbde   :  { %v1444_v50 = vsub.f32 1.0, %v1443_v47  ;;  %v1459_v60 = vmul.f32 %v1440_v58, %v2290_v4  ;;  %v1330_v4 = vadd.f32 %v1714_v62, %v2218_v27 }
 0xbe0   :  { %v1445_v54 = vmul.f32 %v1812_v45, %v1444_v50 }
 0xbe2   :  { %v1446_v57 = vadd.f32 %v1812_v45, %v1445_v54 }
 0xbe4   :  { %v1450_v59 = vsel %vm1449_vm1, %v1812_v45, %v1446_v57 }
 0xbe5   :  { %v1455_v40 = vsel %vm1452_vm2, %v1454_v26, %v1450_v59 }
 0xbe6   :  { %v1460_v18 = vmul.f32 %v1455_v40, %v1375_v20 }
 0xbe8   :  { %v1462_v61 = vpack.c.bf16 %v1460_v18, %v1459_v60 }
 0xbea   :  { %1540 = vmatmul.bf16.gmra.mxu0 %v1462_v61 }
 0xc4c   :  { %v1536_v0 = vpop.f32.mrf.mxu0 }
 0xc4d   :  { %v1546_v1 = vadd.f32 %v1536_v0, %v1328_v63 }
 0xc4f   :  { %1550 = vst.msk [vmem:[#allocation3] sm:$0xff] %vm38_vm0, %v1546_v1 }
 0xc54   :  { %v1538_v2 = vpop.f32.mrf.mxu0 }
 0xc55   :  { %v1547_v3 = vadd.f32 %v1538_v2, %v1329_v29 }
 0xc57   :  { %1551 = vst.msk [vmem:[#allocation3 + $0x8] sm:$0xff] %vm38_vm0, %v1547_v3 }
 0xc67   :  { %v1541_v51 = vpop.f32.mrf.mxu0 }
 0xc68   :  { %v1548_v5 = vadd.f32 %v1541_v51, %v1330_v4 }
 0xc6a   :  { %1552 = vst.msk [vmem:[#allocation3 + $0x10] sm:$0xff] %vm38_vm0, %v1548_v5 }
 0xc6f   :  { %v1543_v28 = vpop.f32.mrf.mxu0 }
 0xc70   :  { %v1549_v21 = vadd.f32 %v1543_v28, %v1331_v12 }
 0xc72   :  { %1553 = vst.msk [vmem:[#allocation3 + $0x18] sm:$0xff] %vm38_vm0, %v1549_v21 }
 0xc73   :  { %1566 = dma.vmem_to_hbm [thread:$0]  %s1559_s8, 512, %s1561_s23, [#allocation4], %s1859_s0, %s1859_s0, %s1855_s11  }
 0xc74   :  { %1841 = dma.done.wait [#allocation4], 512  }
 0xc75   :  { %1842 = vsyncadd [#allocation4], 4294966784 }
 0xc76   :  { %1571 = vsyncpa [#allocation4], 1 }

</bundles_post_ra>
